<compile_context>
chip_gen: v6e
topology: v6e:2x2x1
jax: 0.10.0
libtpu: 0.0.40
codegen_flags: <defaults>
</compile_context>

<pallas_src>
import functools

import jax
import jax.numpy as jnp
from jax.experimental import pallas as pl
from jax.experimental.pallas import tpu as pltpu


# ----------------------------------------------------------------------------
# Pallas kernel: one grid step == T_b GRU time steps for one batch tile
# ----------------------------------------------------------------------------
def gru_block_kernel(len_ref,    # (Bt, 1)            int32  lengths (batch tile)
                     gates_ref,  # (T_b, Bt, 3*Hp)    bf16   x@W_ih^T + fused biases
                     whh_ref,    # (Hp, 3*Hp)         bf16   fused W_hh^T (r|z|n)
                     bhn_ref,    # (1, Hp)            f32    b_hn
                     out_ref,    # (T_b, Bt, Hp)      f32    output time block
                     hN_ref,     # (Bt, Hp)           f32    final hidden (resident)
                     h_scratch,  # (Bt, Hp)           f32    recurrent state
                     *, unroll):
    T_b = gates_ref.shape[0]
    Hp = h_scratch.shape[-1]
    t_blk = pl.program_id(1)          # time-block index (inner, "arbitrary" axis)

    # Zero-init the carry at the start of every batch tile's time sweep.
    @pl.when(t_blk == 0)
    def _():
        h_scratch[...] = jnp.zeros_like(h_scratch)

    lens = len_ref[...]               # (Bt, 1)
    whh = whh_ref[...]                # (Hp, 3*Hp) bf16 -- single fused matmul operand
    bhn = bhn_ref[...]                # (1, Hp)    f32
    t0 = t_blk * T_b

    def step(i, h):
        gx = gates_ref[i].astype(jnp.float32)                       # (Bt, 3*Hp)
        gh = jnp.dot(h.astype(jnp.bfloat16), whh,
                     preferred_element_type=jnp.float32)            # one bf16 MXU matmul
        # r and z share one sigmoid over 2*Hp lanes (128-aligned slices).
        rz = jax.nn.sigmoid(gx[:, : 2 * Hp] + gh[:, : 2 * Hp])
        r = rz[:, :Hp]
        z = rz[:, Hp:]
        n = jnp.tanh(gx[:, 2 * Hp:] + r * (gh[:, 2 * Hp:] + bhn))
        h_new = (1.0 - z) * n + z * h
        # pack_padded semantics: freeze state and zero the padded output rows.
        valid = lens > (t0 + i)                                     # (Bt, 1)
        out_ref[i] = jnp.where(valid, h_new, 0.0)
        return jnp.where(valid, h_new, h)

    h = jax.lax.fori_loop(0, T_b, step, h_scratch[...], unroll=unroll)
    h_scratch[...] = h

    # Only the last time block's state is the final hidden; skip the store
    # on every other grid step (frees vector-store slots).
    @pl.when(t_blk == pl.num_programs(1) - 1)
    def _():
        hN_ref[...] = h


def _const_spec(block_shape, index_map):
    """Invariant (constant-index) block: request single-buffering to save VMEM."""
    try:
        return pl.BlockSpec(block_shape, index_map, pipeline_mode=pl.Buffered(1))
    except TypeError:  # older JAX without pipeline_mode kwarg
        return pl.BlockSpec(block_shape, index_map)


# ----------------------------------------------------------------------------
# Parameter prep: gate-split, transpose, lane-pad H->Hp, fold b_hr/b_hz into
# the input-side bias (b_hn must stay separate). Weights cast to bf16.
# ----------------------------------------------------------------------------
def _prep_params(params, Hp):
    H = params["embedding"].shape[1]
    w_ih = params["w_ih"].astype(jnp.float32).reshape(3, H, H)   # rows: r, z, n
    w_hh = params["w_hh"].astype(jnp.float32).reshape(3, H, H)
    b_ih = params["b_ih"].astype(jnp.float32).reshape(3, H)
    b_hh = params["b_hh"].astype(jnp.float32).reshape(3, H)

    wihT = jnp.zeros((H, 3 * Hp), jnp.float32)    # x-side:  x @ wihT -> [r|z|n] (padded)
    whhT = jnp.zeros((Hp, 3 * Hp), jnp.float32)   # h-side:  h @ whhT -> [r|z|n] (padded)
    bx = jnp.zeros((3 * Hp,), jnp.float32)
    bcomb = jnp.stack([b_ih[0] + b_hh[0], b_ih[1] + b_hh[1], b_ih[2]], axis=0)
    for g in range(3):
        wihT = wihT.at[:, g * Hp: g * Hp + H].set(w_ih[g].T)
        whhT = whhT.at[:H, g * Hp: g * Hp + H].set(w_hh[g].T)
        bx = bx.at[g * Hp: g * Hp + H].set(bcomb[g])
    bhn = jnp.zeros((1, Hp), jnp.float32).at[:, :H].set(b_hh[2])
    return wihT.astype(jnp.bfloat16), whhT.astype(jnp.bfloat16), bx, bhn


# ----------------------------------------------------------------------------
# Wrapper: embedding gather + hoisted input projection (XLA glue) + pallas_call
# ----------------------------------------------------------------------------
def gru_encoder_forward(input_seqs, input_lengths, params, *,
                        time_block=16, batch_tile=None, unroll=None):
    """input_seqs: (batch, seq) int32; input_lengths: (batch,) int32 (descending)."""
    emb = params["embedding"].astype(jnp.float32)        # (vocab, H)
    H = emb.shape[1]
    batch, seq = input_seqs.shape

    Hp = ((H + 127) // 128) * 128                        # lane-pad hidden dim
    Tb = time_block
    seq_pad = ((seq + Tb - 1) // Tb) * Tb

    # Batch tile: the only parallel dimension of a serial recurrence. >=128 per
    # tile keeps the MXU M-dim fat; multiple tiles let v7x's 2 TCs split work.
    if batch_tile is not None:
        Bt = batch_tile
    elif batch >= 256 and batch % 128 == 0:
        Bt = 128
    else:
        Bt = batch
    if not (batch % Bt == 0 and (Bt == batch or Bt % 8 == 0)):
        raise ValueError(f"batch_tile {Bt} must divide batch {batch} and be a multiple of 8")
    n_bt = batch // Bt

    # Unroll fully only when per-step live vectors stay comfortably in vregs.
    if unroll is None:
        unroll = True if Bt * 3 * Hp * 4 <= 96 * 1024 else 2

    wihT, whhT, bx, bhn = _prep_params(params, Hp)

    # Embedding lookup directly time-major (replaces the .transpose(0, 1)).
    x_tm = jnp.take(emb, input_seqs.T, axis=0)            # (seq, batch, H)

    # Hoisted input-side projection for ALL time steps: one big bf16 MXU matmul
    # (f32 accumulate); the gates stream itself is kept in bf16.
    gates = (jnp.dot(x_tm.reshape(seq * batch, H).astype(jnp.bfloat16), wihT,
                     preferred_element_type=jnp.float32) + bx)
    gates = gates.astype(jnp.bfloat16).reshape(seq, batch, 3 * Hp)
    gates = jnp.pad(gates, ((0, seq_pad - seq), (0, 0), (0, 0)))

    lens = input_lengths.astype(jnp.int32).reshape(batch, 1)

    # VMEM budget: double-buffered gates/out blocks + (single-buffered) weights.
    gates_blk = Tb * Bt * 3 * Hp * 2          # bf16
    out_blk = Tb * Bt * Hp * 4                # f32
    whh_blk = Hp * 3 * Hp * 2                 # bf16
    misc = 3 * Bt * Hp * 4 + Hp * 4 + Bt * 4 * 2
    vmem_need = 2 * gates_blk + 2 * out_blk + 2 * whh_blk + misc
    vmem_limit = min(max(int(vmem_need * 1.5) + (4 << 20), 32 << 20), 96 << 20)

    grid = (n_bt, seq_pad // Tb)
    out_pad, hN_pad = pl.pallas_call(
        functools.partial(gru_block_kernel, unroll=unroll),
        out_shape=(
            jax.ShapeDtypeStruct((seq_pad, batch, Hp), jnp.float32),
            jax.ShapeDtypeStruct((batch, Hp), jnp.float32),
        ),
        grid_spec=pltpu.PrefetchScalarGridSpec(
            num_scalar_prefetch=0,
            grid=grid,
            in_specs=[
                pl.BlockSpec((Bt, 1), lambda b, t: (b, 0)),               # lengths tile
                pl.BlockSpec((Tb, Bt, 3 * Hp), lambda b, t: (t, b, 0)),   # gates block (bf16)
                _const_spec((Hp, 3 * Hp), lambda b, t: (0, 0)),           # fused W_hh^T
                _const_spec((1, Hp), lambda b, t: (0, 0)),                # b_hn
            ],
            out_specs=[
                pl.BlockSpec((Tb, Bt, Hp), lambda b, t: (t, b, 0)),       # output block
                pl.BlockSpec((Bt, Hp), lambda b, t: (b, 0)),              # final hidden
            ],
            scratch_shapes=[pltpu.VMEM((Bt, Hp), jnp.float32)],           # recurrent state
        ),
        compiler_params=pltpu.CompilerParams(
            # batch tiles independent (megacore); time blocks sequential.
            dimension_semantics=("parallel", "arbitrary"),
            vmem_limit_bytes=vmem_limit,
        ),
    )(lens, gates, whhT, bhn)

    output = out_pad[:seq, :, :H]                # (seq, batch, H)
    hidden = hN_pad[None, :, :H]                 # (1, batch, H)
    return output, hidden


# ----------------------------------------------------------------------------
# Pure-JAX reference (sanity check of the kernel semantics)
# ----------------------------------------------------------------------------
def gru_encoder_reference(input_seqs, input_lengths, params):
    emb, w_ih, w_hh, b_ih, b_hh = (params["embedding"], params["w_ih"],
                                   params["w_hh"], params["b_ih"], params["b_hh"])
    H = emb.shape[1]
    x_emb = jnp.take(emb, input_seqs, axis=0).transpose(1, 0, 2).astype(jnp.float32)
    seq, batch, _ = x_emb.shape
    hi = jax.lax.Precision.HIGHEST

    def step(h, inp):
        x_t, t = inp
        gi = jnp.dot(x_t, w_ih.T, precision=hi) + b_ih
        gh = jnp.dot(h, w_hh.T, precision=hi) + b_hh
        i_r, i_z, i_n = jnp.split(gi, 3, axis=-1)
        h_r, h_z, h_n = jnp.split(gh, 3, axis=-1)
        r = jax.nn.sigmoid(i_r + h_r)
        z = jax.nn.sigmoid(i_z + h_z)
        n = jnp.tanh(i_n + r * h_n)
        h_new = (1.0 - z) * n + z * h
        valid = (input_lengths[:, None] > t)
        h_next = jnp.where(valid, h_new, h)
        out = jnp.where(valid, h_new, 0.0)
        return h_next, out

    h0 = jnp.zeros((batch, H), jnp.float32)
    hN, out = jax.lax.scan(step, h0, (x_emb, jnp.arange(seq)))
    return out, hN[None]


# ----------------------------------------------------------------------------
if __name__ == "__main__":
    vocab_size, hidden_size = 16, 32
    batch, seq = 4, 12
    num_layers = 1  # module default

    key = jax.random.PRNGKey(0)
    k_emb, k_wih, k_whh, k_bih, k_bhh, k_tok = jax.random.split(key, 6)

    bound = 1.0 / jnp.sqrt(hidden_size)  # PyTorch GRU init range
    params = {
        "embedding": jax.random.normal(k_emb, (vocab_size, hidden_size), jnp.float32),
        "w_ih": jax.random.uniform(k_wih, (3 * hidden_size, hidden_size),
                                   jnp.float32, -bound, bound),
        "w_hh": jax.random.uniform(k_whh, (3 * hidden_size, hidden_size),
                                   jnp.float32, -bound, bound),
        "b_ih": jax.random.uniform(k_bih, (3 * hidden_size,), jnp.float32, -bound, bound),
        "b_hh": jax.random.uniform(k_bhh, (3 * hidden_size,), jnp.float32, -bound, bound),
    }

    input_seqs = jax.random.randint(k_tok, (batch, seq), 0, vocab_size, jnp.int32)
    input_lengths = jnp.array([12, 9, 5, 2], dtype=jnp.int32)  # sorted descending

    out, hidden = jax.jit(gru_encoder_forward)(input_seqs, input_lengths, params)
    jax.block_until_ready((out, hidden))

    # Sanity check vs pure-JAX f32 reference. Tolerance relaxed because the
    # kernel streams gates and runs the MXU matmuls in bf16 (f32 accumulate).
    out_ref, hidden_ref = gru_encoder_reference(input_seqs, input_lengths, params)
    assert out.shape == (seq, batch, hidden_size)
    assert hidden.shape == (num_layers, batch, hidden_size)
    assert jnp.allclose(out, out_ref, atol=5e-2, rtol=5e-2)
    assert jnp.allclose(hidden, hidden_ref, atol=5e-2, rtol=5e-2)

    print("KERNEL_OK")
</pallas_src>

<mosaic_0001>
module attributes {stable_mosaic.version = 11 : i64} {
  func.func @gru_block_kernel(%arg0: i32, %arg1: i32, %arg2: memref<4x1xi32, #tpu.memory_space<vmem>>, %arg3: memref<16x4x384xbf16, #tpu.memory_space<vmem>>, %arg4: memref<128x384xbf16, #tpu.memory_space<vmem>>, %arg5: memref<1x128xf32, #tpu.memory_space<vmem>>, %arg6: memref<16x4x128xf32, #tpu.memory_space<vmem>>, %arg7: memref<4x128xf32, #tpu.memory_space<vmem>>, %arg8: memref<4x128xf32, #tpu.memory_space<vmem>>) attributes {dimension_semantics = [#tpu.dimension_semantics<parallel>, #tpu.dimension_semantics<arbitrary>], iteration_bounds = array<i64: 1, 1>, scalar_prefetch = 0 : i64, scratch_operands = 1 : i64, tpu.core_type = #tpu.core_type<tc>, window_params = [{transform_indices = @transform_0, window_bounds = array<i64: 4, 1>}, {transform_indices = @transform_1, window_bounds = array<i64: 16, 4, 384>}, {pipeline_mode = #tpu.pipeline_mode<synchronous>, transform_indices = @transform_2, window_bounds = array<i64: 128, 384>}, {pipeline_mode = #tpu.pipeline_mode<synchronous>, transform_indices = @transform_3, window_bounds = array<i64: 1, 128>}, {transform_indices = @transform_4, window_bounds = array<i64: 16, 4, 128>}, {transform_indices = @transform_5, window_bounds = array<i64: 4, 128>}]} {
    %c0_i32 = arith.constant 0 : i32
    %0 = arith.cmpi eq, %arg1, %c0_i32 : i32
    %1 = arith.extui %0 : i1 to i32
    %c0_i32_0 = arith.constant 0 : i32
    %2 = arith.cmpi ne, %1, %c0_i32_0 : i32
    scf.if %2 {
      %cst_141 = arith.constant 0.000000e+00 : f32
      %684 = vector.broadcast %cst_141 : f32 to vector<4x128xf32>
      %c0_142 = arith.constant 0 : index
      %c0_143 = arith.constant 0 : index
      %685 = vector.load %arg8[%c0_142, %c0_143] : memref<4x128xf32, #tpu.memory_space<vmem>>, vector<4x128xf32>
      tpu.vector_store %arg8[%c0_142, %c0_143], %684 {strides = array<i32>} : memref<4x128xf32, #tpu.memory_space<vmem>>, vector<4x128xf32>,
    } else {
    }
    %c0 = arith.constant 0 : index
    %c0_1 = arith.constant 0 : index
    %3 = vector.load %arg2[%c0, %c0_1] : memref<4x1xi32, #tpu.memory_space<vmem>>, vector<4x1xi32>
    %c0_2 = arith.constant 0 : index
    %c0_3 = arith.constant 0 : index
    %4 = vector.load %arg4[%c0_2, %c0_3] : memref<128x384xbf16, #tpu.memory_space<vmem>>, vector<128x384xbf16>
    %c0_4 = arith.constant 0 : index
    %c0_5 = arith.constant 0 : index
    %5 = vector.load %arg5[%c0_4, %c0_5] : memref<1x128xf32, #tpu.memory_space<vmem>>, vector<1x128xf32>
    %c16_i32 = arith.constant 16 : i32
    %6 = arith.muli %arg1, %c16_i32 : i32
    %c0_6 = arith.constant 0 : index
    %c0_7 = arith.constant 0 : index
    %7 = vector.load %arg8[%c0_6, %c0_7] : memref<4x128xf32, #tpu.memory_space<vmem>>, vector<4x128xf32>
    %c0_i32_8 = arith.constant 0 : i32
    %8 = arith.index_cast %c0_i32_8 : i32 to index
    %c0_9 = arith.constant 0 : index
    %c0_10 = arith.constant 0 : index
    %9 = vector.load %arg3[%8, %c0_9, %c0_10] : memref<16x4x384xbf16, #tpu.memory_space<vmem>>, vector<1x4x384xbf16>
    %10 = vector.shape_cast %9 : vector<1x4x384xbf16> to vector<4x384xbf16>
    %11 = arith.extf %10 : vector<4x384xbf16> to vector<4x384xf32>
    %12 = arith.truncf %7 : vector<4x128xf32> to vector<4x128xbf16>
    %cst = arith.constant dense<0.000000e+00> : vector<4x384xf32>
    %13 = tpu.matmul %12, %4, %cst {dimension_numbers = #tpu.dot_dimension_numbers<[1], [0], [0], [1], [0, 0, 1, 1], [], []>} : vector<4x128xbf16>, vector<128x384xbf16>, vector<4x384xf32> -> vector<4x384xf32>
    %14 = vector.extract_strided_slice %11 {offsets = [0, 0], sizes = [4, 256], strides = [1, 1]} : vector<4x384xf32> to vector<4x256xf32>
    %15 = vector.extract_strided_slice %13 {offsets = [0, 0], sizes = [4, 256], strides = [1, 1]} : vector<4x384xf32> to vector<4x256xf32>
    %16 = arith.addf %14, %15 : vector<4x256xf32>
    %17 = arith.negf %16 : vector<4x256xf32>
    %18 = math.exp %17 : vector<4x256xf32>
    %cst_11 = arith.constant 1.000000e+00 : f32
    %19 = vector.broadcast %cst_11 : f32 to vector<4x256xf32>
    %20 = arith.addf %19, %18 : vector<4x256xf32>
    %21 = arith.divf %19, %20 : vector<4x256xf32>
    %22 = vector.extract_strided_slice %21 {offsets = [0, 0], sizes = [4, 128], strides = [1, 1]} : vector<4x256xf32> to vector<4x128xf32>
    %23 = vector.extract_strided_slice %21 {offsets = [0, 128], sizes = [4, 128], strides = [1, 1]} : vector<4x256xf32> to vector<4x128xf32>
    %24 = vector.extract_strided_slice %11 {offsets = [0, 256], sizes = [4, 128], strides = [1, 1]} : vector<4x384xf32> to vector<4x128xf32>
    %25 = vector.extract_strided_slice %13 {offsets = [0, 256], sizes = [4, 128], strides = [1, 1]} : vector<4x384xf32> to vector<4x128xf32>
    %26 = vector.broadcast %5 : vector<1x128xf32> to vector<4x128xf32>
    %27 = arith.addf %25, %26 : vector<4x128xf32>
    %28 = arith.mulf %22, %27 : vector<4x128xf32>
    %29 = arith.addf %24, %28 : vector<4x128xf32>
    %30 = math.tanh %29 : vector<4x128xf32>
    %cst_12 = arith.constant 1.000000e+00 : f32
    %31 = vector.broadcast %cst_12 : f32 to vector<4x128xf32>
    %32 = arith.subf %31, %23 : vector<4x128xf32>
    %33 = arith.mulf %32, %30 : vector<4x128xf32>
    %34 = arith.mulf %23, %7 : vector<4x128xf32>
    %35 = arith.addf %33, %34 : vector<4x128xf32>
    %36 = arith.addi %6, %c0_i32_8 : i32
    %37 = vector.broadcast %36 : i32 to vector<4x1xi32>
    %38 = arith.cmpi sgt, %3, %37 : vector<4x1xi32>
    %cst_13 = arith.constant 0.000000e+00 : f32
    %39 = vector.shape_cast %38 : vector<4x1xi1> to vector<4x1xi1>
    %40 = vector.broadcast %39 : vector<4x1xi1> to vector<4x128xi1>
    %41 = vector.broadcast %cst_13 : f32 to vector<4x128xf32>
    %42 = arith.select %40, %35, %41 : vector<4x128xi1>, vector<4x128xf32>
    %43 = arith.index_cast %c0_i32_8 : i32 to index
    %c0_14 = arith.constant 0 : index
    %c0_15 = arith.constant 0 : index
    %44 = vector.load %arg6[%43, %c0_14, %c0_15] : memref<16x4x128xf32, #tpu.memory_space<vmem>>, vector<1x4x128xf32>
    %45 = vector.shape_cast %44 : vector<1x4x128xf32> to vector<4x128xf32>
    %46 = vector.shape_cast %42 : vector<4x128xf32> to vector<1x4x128xf32>
    tpu.vector_store %arg6[%43, %c0_14, %c0_15], %46 {strides = array<i32>} : memref<16x4x128xf32, #tpu.memory_space<vmem>>, vector<1x4x128xf32>,
    %47 = vector.shape_cast %38 : vector<4x1xi1> to vector<4x1xi1>
    %48 = vector.broadcast %47 : vector<4x1xi1> to vector<4x128xi1>
    %49 = arith.select %48, %35, %7 : vector<4x128xi1>, vector<4x128xf32>
    %c1_i32 = arith.constant 1 : i32
    %50 = arith.index_cast %c1_i32 : i32 to index
    %c0_16 = arith.constant 0 : index
    %c0_17 = arith.constant 0 : index
    %51 = vector.load %arg3[%50, %c0_16, %c0_17] : memref<16x4x384xbf16, #tpu.memory_space<vmem>>, vector<1x4x384xbf16>
    %52 = vector.shape_cast %51 : vector<1x4x384xbf16> to vector<4x384xbf16>
    %53 = arith.extf %52 : vector<4x384xbf16> to vector<4x384xf32>
    %54 = arith.truncf %49 : vector<4x128xf32> to vector<4x128xbf16>
    %cst_18 = arith.constant dense<0.000000e+00> : vector<4x384xf32>
    %55 = tpu.matmul %54, %4, %cst_18 {dimension_numbers = #tpu.dot_dimension_numbers<[1], [0], [0], [1], [0, 0, 1, 1], [], []>} : vector<4x128xbf16>, vector<128x384xbf16>, vector<4x384xf32> -> vector<4x384xf32>
    %56 = vector.extract_strided_slice %53 {offsets = [0, 0], sizes = [4, 256], strides = [1, 1]} : vector<4x384xf32> to vector<4x256xf32>
    %57 = vector.extract_strided_slice %55 {offsets = [0, 0], sizes = [4, 256], strides = [1, 1]} : vector<4x384xf32> to vector<4x256xf32>
    %58 = arith.addf %56, %57 : vector<4x256xf32>
    %59 = arith.negf %58 : vector<4x256xf32>
    %60 = math.exp %59 : vector<4x256xf32>
    %cst_19 = arith.constant 1.000000e+00 : f32
    %61 = vector.broadcast %cst_19 : f32 to vector<4x256xf32>
    %62 = arith.addf %61, %60 : vector<4x256xf32>
    %63 = arith.divf %61, %62 : vector<4x256xf32>
    %64 = vector.extract_strided_slice %63 {offsets = [0, 0], sizes = [4, 128], strides = [1, 1]} : vector<4x256xf32> to vector<4x128xf32>
    %65 = vector.extract_strided_slice %63 {offsets = [0, 128], sizes = [4, 128], strides = [1, 1]} : vector<4x256xf32> to vector<4x128xf32>
    %66 = vector.extract_strided_slice %53 {offsets = [0, 256], sizes = [4, 128], strides = [1, 1]} : vector<4x384xf32> to vector<4x128xf32>
    %67 = vector.extract_strided_slice %55 {offsets = [0, 256], sizes = [4, 128], strides = [1, 1]} : vector<4x384xf32> to vector<4x128xf32>
    %68 = vector.broadcast %5 : vector<1x128xf32> to vector<4x128xf32>
    %69 = arith.addf %67, %68 : vector<4x128xf32>
    %70 = arith.mulf %64, %69 : vector<4x128xf32>
    %71 = arith.addf %66, %70 : vector<4x128xf32>
    %72 = math.tanh %71 : vector<4x128xf32>
    %cst_20 = arith.constant 1.000000e+00 : f32
    %73 = vector.broadcast %cst_20 : f32 to vector<4x128xf32>
    %74 = arith.subf %73, %65 : vector<4x128xf32>
    %75 = arith.mulf %74, %72 : vector<4x128xf32>
    %76 = arith.mulf %65, %49 : vector<4x128xf32>
    %77 = arith.addf %75, %76 : vector<4x128xf32>
    %78 = arith.addi %6, %c1_i32 : i32
    %79 = vector.broadcast %78 : i32 to vector<4x1xi32>
    %80 = arith.cmpi sgt, %3, %79 : vector<4x1xi32>
    %cst_21 = arith.constant 0.000000e+00 : f32
    %81 = vector.shape_cast %80 : vector<4x1xi1> to vector<4x1xi1>
    %82 = vector.broadcast %81 : vector<4x1xi1> to vector<4x128xi1>
    %83 = vector.broadcast %cst_21 : f32 to vector<4x128xf32>
    %84 = arith.select %82, %77, %83 : vector<4x128xi1>, vector<4x128xf32>
    %85 = arith.index_cast %c1_i32 : i32 to index
    %c0_22 = arith.constant 0 : index
    %c0_23 = arith.constant 0 : index
    %86 = vector.load %arg6[%85, %c0_22, %c0_23] : memref<16x4x128xf32, #tpu.memory_space<vmem>>, vector<1x4x128xf32>
    %87 = vector.shape_cast %86 : vector<1x4x128xf32> to vector<4x128xf32>
    %88 = vector.shape_cast %84 : vector<4x128xf32> to vector<1x4x128xf32>
    tpu.vector_store %arg6[%85, %c0_22, %c0_23], %88 {strides = array<i32>} : memref<16x4x128xf32, #tpu.memory_space<vmem>>, vector<1x4x128xf32>,
    %89 = vector.shape_cast %80 : vector<4x1xi1> to vector<4x1xi1>
    %90 = vector.broadcast %89 : vector<4x1xi1> to vector<4x128xi1>
    %91 = arith.select %90, %77, %49 : vector<4x128xi1>, vector<4x128xf32>
    %c2_i32 = arith.constant 2 : i32
    %92 = arith.index_cast %c2_i32 : i32 to index
    %c0_24 = arith.constant 0 : index
    %c0_25 = arith.constant 0 : index
    %93 = vector.load %arg3[%92, %c0_24, %c0_25] : memref<16x4x384xbf16, #tpu.memory_space<vmem>>, vector<1x4x384xbf16>
    %94 = vector.shape_cast %93 : vector<1x4x384xbf16> to vector<4x384xbf16>
    %95 = arith.extf %94 : vector<4x384xbf16> to vector<4x384xf32>
    %96 = arith.truncf %91 : vector<4x128xf32> to vector<4x128xbf16>
    %cst_26 = arith.constant dense<0.000000e+00> : vector<4x384xf32>
    %97 = tpu.matmul %96, %4, %cst_26 {dimension_numbers = #tpu.dot_dimension_numbers<[1], [0], [0], [1], [0, 0, 1, 1], [], []>} : vector<4x128xbf16>, vector<128x384xbf16>, vector<4x384xf32> -> vector<4x384xf32>
    %98 = vector.extract_strided_slice %95 {offsets = [0, 0], sizes = [4, 256], strides = [1, 1]} : vector<4x384xf32> to vector<4x256xf32>
    %99 = vector.extract_strided_slice %97 {offsets = [0, 0], sizes = [4, 256], strides = [1, 1]} : vector<4x384xf32> to vector<4x256xf32>
    %100 = arith.addf %98, %99 : vector<4x256xf32>
    %101 = arith.negf %100 : vector<4x256xf32>
    %102 = math.exp %101 : vector<4x256xf32>
    %cst_27 = arith.constant 1.000000e+00 : f32
    %103 = vector.broadcast %cst_27 : f32 to vector<4x256xf32>
    %104 = arith.addf %103, %102 : vector<4x256xf32>
    %105 = arith.divf %103, %104 : vector<4x256xf32>
    %106 = vector.extract_strided_slice %105 {offsets = [0, 0], sizes = [4, 128], strides = [1, 1]} : vector<4x256xf32> to vector<4x128xf32>
    %107 = vector.extract_strided_slice %105 {offsets = [0, 128], sizes = [4, 128], strides = [1, 1]} : vector<4x256xf32> to vector<4x128xf32>
    %108 = vector.extract_strided_slice %95 {offsets = [0, 256], sizes = [4, 128], strides = [1, 1]} : vector<4x384xf32> to vector<4x128xf32>
    %109 = vector.extract_strided_slice %97 {offsets = [0, 256], sizes = [4, 128], strides = [1, 1]} : vector<4x384xf32> to vector<4x128xf32>
    %110 = vector.broadcast %5 : vector<1x128xf32> to vector<4x128xf32>
    %111 = arith.addf %109, %110 : vector<4x128xf32>
    %112 = arith.mulf %106, %111 : vector<4x128xf32>
    %113 = arith.addf %108, %112 : vector<4x128xf32>
    %114 = math.tanh %113 : vector<4x128xf32>
    %cst_28 = arith.constant 1.000000e+00 : f32
    %115 = vector.broadcast %cst_28 : f32 to vector<4x128xf32>
    %116 = arith.subf %115, %107 : vector<4x128xf32>
    %117 = arith.mulf %116, %114 : vector<4x128xf32>
    %118 = arith.mulf %107, %91 : vector<4x128xf32>
    %119 = arith.addf %117, %118 : vector<4x128xf32>
    %120 = arith.addi %6, %c2_i32 : i32
    %121 = vector.broadcast %120 : i32 to vector<4x1xi32>
    %122 = arith.cmpi sgt, %3, %121 : vector<4x1xi32>
    %cst_29 = arith.constant 0.000000e+00 : f32
    %123 = vector.shape_cast %122 : vector<4x1xi1> to vector<4x1xi1>
    %124 = vector.broadcast %123 : vector<4x1xi1> to vector<4x128xi1>
    %125 = vector.broadcast %cst_29 : f32 to vector<4x128xf32>
    %126 = arith.select %124, %119, %125 : vector<4x128xi1>, vector<4x128xf32>
    %127 = arith.index_cast %c2_i32 : i32 to index
    %c0_30 = arith.constant 0 : index
    %c0_31 = arith.constant 0 : index
    %128 = vector.load %arg6[%127, %c0_30, %c0_31] : memref<16x4x128xf32, #tpu.memory_space<vmem>>, vector<1x4x128xf32>
    %129 = vector.shape_cast %128 : vector<1x4x128xf32> to vector<4x128xf32>
    %130 = vector.shape_cast %126 : vector<4x128xf32> to vector<1x4x128xf32>
    tpu.vector_store %arg6[%127, %c0_30, %c0_31], %130 {strides = array<i32>} : memref<16x4x128xf32, #tpu.memory_space<vmem>>, vector<1x4x128xf32>,
    %131 = vector.shape_cast %122 : vector<4x1xi1> to vector<4x1xi1>
    %132 = vector.broadcast %131 : vector<4x1xi1> to vector<4x128xi1>
    %133 = arith.select %132, %119, %91 : vector<4x128xi1>, vector<4x128xf32>
    %c3_i32 = arith.constant 3 : i32
    %134 = arith.index_cast %c3_i32 : i32 to index
    %c0_32 = arith.constant 0 : index
    %c0_33 = arith.constant 0 : index
    %135 = vector.load %arg3[%134, %c0_32, %c0_33] : memref<16x4x384xbf16, #tpu.memory_space<vmem>>, vector<1x4x384xbf16>
    %136 = vector.shape_cast %135 : vector<1x4x384xbf16> to vector<4x384xbf16>
    %137 = arith.extf %136 : vector<4x384xbf16> to vector<4x384xf32>
    %138 = arith.truncf %133 : vector<4x128xf32> to vector<4x128xbf16>
    %cst_34 = arith.constant dense<0.000000e+00> : vector<4x384xf32>
    %139 = tpu.matmul %138, %4, %cst_34 {dimension_numbers = #tpu.dot_dimension_numbers<[1], [0], [0], [1], [0, 0, 1, 1], [], []>} : vector<4x128xbf16>, vector<128x384xbf16>, vector<4x384xf32> -> vector<4x384xf32>
    %140 = vector.extract_strided_slice %137 {offsets = [0, 0], sizes = [4, 256], strides = [1, 1]} : vector<4x384xf32> to vector<4x256xf32>
    %141 = vector.extract_strided_slice %139 {offsets = [0, 0], sizes = [4, 256], strides = [1, 1]} : vector<4x384xf32> to vector<4x256xf32>
    %142 = arith.addf %140, %141 : vector<4x256xf32>
    %143 = arith.negf %142 : vector<4x256xf32>
    %144 = math.exp %143 : vector<4x256xf32>
    %cst_35 = arith.constant 1.000000e+00 : f32
    %145 = vector.broadcast %cst_35 : f32 to vector<4x256xf32>
    %146 = arith.addf %145, %144 : vector<4x256xf32>
    %147 = arith.divf %145, %146 : vector<4x256xf32>
    %148 = vector.extract_strided_slice %147 {offsets = [0, 0], sizes = [4, 128], strides = [1, 1]} : vector<4x256xf32> to vector<4x128xf32>
    %149 = vector.extract_strided_slice %147 {offsets = [0, 128], sizes = [4, 128], strides = [1, 1]} : vector<4x256xf32> to vector<4x128xf32>
    %150 = vector.extract_strided_slice %137 {offsets = [0, 256], sizes = [4, 128], strides = [1, 1]} : vector<4x384xf32> to vector<4x128xf32>
    %151 = vector.extract_strided_slice %139 {offsets = [0, 256], sizes = [4, 128], strides = [1, 1]} : vector<4x384xf32> to vector<4x128xf32>
    %152 = vector.broadcast %5 : vector<1x128xf32> to vector<4x128xf32>
    %153 = arith.addf %151, %152 : vector<4x128xf32>
    %154 = arith.mulf %148, %153 : vector<4x128xf32>
    %155 = arith.addf %150, %154 : vector<4x128xf32>
    %156 = math.tanh %155 : vector<4x128xf32>
    %cst_36 = arith.constant 1.000000e+00 : f32
    %157 = vector.broadcast %cst_36 : f32 to vector<4x128xf32>
    %158 = arith.subf %157, %149 : vector<4x128xf32>
    %159 = arith.mulf %158, %156 : vector<4x128xf32>
    %160 = arith.mulf %149, %133 : vector<4x128xf32>
    %161 = arith.addf %159, %160 : vector<4x128xf32>
    %162 = arith.addi %6, %c3_i32 : i32
    %163 = vector.broadcast %162 : i32 to vector<4x1xi32>
    %164 = arith.cmpi sgt, %3, %163 : vector<4x1xi32>
    %cst_37 = arith.constant 0.000000e+00 : f32
    %165 = vector.shape_cast %164 : vector<4x1xi1> to vector<4x1xi1>
    %166 = vector.broadcast %165 : vector<4x1xi1> to vector<4x128xi1>
    %167 = vector.broadcast %cst_37 : f32 to vector<4x128xf32>
    %168 = arith.select %166, %161, %167 : vector<4x128xi1>, vector<4x128xf32>
    %169 = arith.index_cast %c3_i32 : i32 to index
    %c0_38 = arith.constant 0 : index
    %c0_39 = arith.constant 0 : index
    %170 = vector.load %arg6[%169, %c0_38, %c0_39] : memref<16x4x128xf32, #tpu.memory_space<vmem>>, vector<1x4x128xf32>
    %171 = vector.shape_cast %170 : vector<1x4x128xf32> to vector<4x128xf32>
    %172 = vector.shape_cast %168 : vector<4x128xf32> to vector<1x4x128xf32>
    tpu.vector_store %arg6[%169, %c0_38, %c0_39], %172 {strides = array<i32>} : memref<16x4x128xf32, #tpu.memory_space<vmem>>, vector<1x4x128xf32>,
    %173 = vector.shape_cast %164 : vector<4x1xi1> to vector<4x1xi1>
    %174 = vector.broadcast %173 : vector<4x1xi1> to vector<4x128xi1>
    %175 = arith.select %174, %161, %133 : vector<4x128xi1>, vector<4x128xf32>
    %c4_i32 = arith.constant 4 : i32
    %176 = arith.index_cast %c4_i32 : i32 to index
    %c0_40 = arith.constant 0 : index
    %c0_41 = arith.constant 0 : index
    %177 = vector.load %arg3[%176, %c0_40, %c0_41] : memref<16x4x384xbf16, #tpu.memory_space<vmem>>, vector<1x4x384xbf16>
    %178 = vector.shape_cast %177 : vector<1x4x384xbf16> to vector<4x384xbf16>
    %179 = arith.extf %178 : vector<4x384xbf16> to vector<4x384xf32>
    %180 = arith.truncf %175 : vector<4x128xf32> to vector<4x128xbf16>
    %cst_42 = arith.constant dense<0.000000e+00> : vector<4x384xf32>
    %181 = tpu.matmul %180, %4, %cst_42 {dimension_numbers = #tpu.dot_dimension_numbers<[1], [0], [0], [1], [0, 0, 1, 1], [], []>} : vector<4x128xbf16>, vector<128x384xbf16>, vector<4x384xf32> -> vector<4x384xf32>
    %182 = vector.extract_strided_slice %179 {offsets = [0, 0], sizes = [4, 256], strides = [1, 1]} : vector<4x384xf32> to vector<4x256xf32>
    %183 = vector.extract_strided_slice %181 {offsets = [0, 0], sizes = [4, 256], strides = [1, 1]} : vector<4x384xf32> to vector<4x256xf32>
    %184 = arith.addf %182, %183 : vector<4x256xf32>
    %185 = arith.negf %184 : vector<4x256xf32>
    %186 = math.exp %185 : vector<4x256xf32>
    %cst_43 = arith.constant 1.000000e+00 : f32
    %187 = vector.broadcast %cst_43 : f32 to vector<4x256xf32>
    %188 = arith.addf %187, %186 : vector<4x256xf32>
    %189 = arith.divf %187, %188 : vector<4x256xf32>
    %190 = vector.extract_strided_slice %189 {offsets = [0, 0], sizes = [4, 128], strides = [1, 1]} : vector<4x256xf32> to vector<4x128xf32>
    %191 = vector.extract_strided_slice %189 {offsets = [0, 128], sizes = [4, 128], strides = [1, 1]} : vector<4x256xf32> to vector<4x128xf32>
    %192 = vector.extract_strided_slice %179 {offsets = [0, 256], sizes = [4, 128], strides = [1, 1]} : vector<4x384xf32> to vector<4x128xf32>
    %193 = vector.extract_strided_slice %181 {offsets = [0, 256], sizes = [4, 128], strides = [1, 1]} : vector<4x384xf32> to vector<4x128xf32>
    %194 = vector.broadcast %5 : vector<1x128xf32> to vector<4x128xf32>
    %195 = arith.addf %193, %194 : vector<4x128xf32>
    %196 = arith.mulf %190, %195 : vector<4x128xf32>
    %197 = arith.addf %192, %196 : vector<4x128xf32>
    %198 = math.tanh %197 : vector<4x128xf32>
    %cst_44 = arith.constant 1.000000e+00 : f32
    %199 = vector.broadcast %cst_44 : f32 to vector<4x128xf32>
    %200 = arith.subf %199, %191 : vector<4x128xf32>
    %201 = arith.mulf %200, %198 : vector<4x128xf32>
    %202 = arith.mulf %191, %175 : vector<4x128xf32>
    %203 = arith.addf %201, %202 : vector<4x128xf32>
    %204 = arith.addi %6, %c4_i32 : i32
    %205 = vector.broadcast %204 : i32 to vector<4x1xi32>
    %206 = arith.cmpi sgt, %3, %205 : vector<4x1xi32>
    %cst_45 = arith.constant 0.000000e+00 : f32
    %207 = vector.shape_cast %206 : vector<4x1xi1> to vector<4x1xi1>
    %208 = vector.broadcast %207 : vector<4x1xi1> to vector<4x128xi1>
    %209 = vector.broadcast %cst_45 : f32 to vector<4x128xf32>
    %210 = arith.select %208, %203, %209 : vector<4x128xi1>, vector<4x128xf32>
    %211 = arith.index_cast %c4_i32 : i32 to index
    %c0_46 = arith.constant 0 : index
    %c0_47 = arith.constant 0 : index
    %212 = vector.load %arg6[%211, %c0_46, %c0_47] : memref<16x4x128xf32, #tpu.memory_space<vmem>>, vector<1x4x128xf32>
    %213 = vector.shape_cast %212 : vector<1x4x128xf32> to vector<4x128xf32>
    %214 = vector.shape_cast %210 : vector<4x128xf32> to vector<1x4x128xf32>
    tpu.vector_store %arg6[%211, %c0_46, %c0_47], %214 {strides = array<i32>} : memref<16x4x128xf32, #tpu.memory_space<vmem>>, vector<1x4x128xf32>,
    %215 = vector.shape_cast %206 : vector<4x1xi1> to vector<4x1xi1>
    %216 = vector.broadcast %215 : vector<4x1xi1> to vector<4x128xi1>
    %217 = arith.select %216, %203, %175 : vector<4x128xi1>, vector<4x128xf32>
    %c5_i32 = arith.constant 5 : i32
    %218 = arith.index_cast %c5_i32 : i32 to index
    %c0_48 = arith.constant 0 : index
    %c0_49 = arith.constant 0 : index
    %219 = vector.load %arg3[%218, %c0_48, %c0_49] : memref<16x4x384xbf16, #tpu.memory_space<vmem>>, vector<1x4x384xbf16>
    %220 = vector.shape_cast %219 : vector<1x4x384xbf16> to vector<4x384xbf16>
    %221 = arith.extf %220 : vector<4x384xbf16> to vector<4x384xf32>
    %222 = arith.truncf %217 : vector<4x128xf32> to vector<4x128xbf16>
    %cst_50 = arith.constant dense<0.000000e+00> : vector<4x384xf32>
    %223 = tpu.matmul %222, %4, %cst_50 {dimension_numbers = #tpu.dot_dimension_numbers<[1], [0], [0], [1], [0, 0, 1, 1], [], []>} : vector<4x128xbf16>, vector<128x384xbf16>, vector<4x384xf32> -> vector<4x384xf32>
    %224 = vector.extract_strided_slice %221 {offsets = [0, 0], sizes = [4, 256], strides = [1, 1]} : vector<4x384xf32> to vector<4x256xf32>
    %225 = vector.extract_strided_slice %223 {offsets = [0, 0], sizes = [4, 256], strides = [1, 1]} : vector<4x384xf32> to vector<4x256xf32>
    %226 = arith.addf %224, %225 : vector<4x256xf32>
    %227 = arith.negf %226 : vector<4x256xf32>
    %228 = math.exp %227 : vector<4x256xf32>
    %cst_51 = arith.constant 1.000000e+00 : f32
    %229 = vector.broadcast %cst_51 : f32 to vector<4x256xf32>
    %230 = arith.addf %229, %228 : vector<4x256xf32>
    %231 = arith.divf %229, %230 : vector<4x256xf32>
    %232 = vector.extract_strided_slice %231 {offsets = [0, 0], sizes = [4, 128], strides = [1, 1]} : vector<4x256xf32> to vector<4x128xf32>
    %233 = vector.extract_strided_slice %231 {offsets = [0, 128], sizes = [4, 128], strides = [1, 1]} : vector<4x256xf32> to vector<4x128xf32>
    %234 = vector.extract_strided_slice %221 {offsets = [0, 256], sizes = [4, 128], strides = [1, 1]} : vector<4x384xf32> to vector<4x128xf32>
    %235 = vector.extract_strided_slice %223 {offsets = [0, 256], sizes = [4, 128], strides = [1, 1]} : vector<4x384xf32> to vector<4x128xf32>
    %236 = vector.broadcast %5 : vector<1x128xf32> to vector<4x128xf32>
    %237 = arith.addf %235, %236 : vector<4x128xf32>
    %238 = arith.mulf %232, %237 : vector<4x128xf32>
    %239 = arith.addf %234, %238 : vector<4x128xf32>
    %240 = math.tanh %239 : vector<4x128xf32>
    %cst_52 = arith.constant 1.000000e+00 : f32
    %241 = vector.broadcast %cst_52 : f32 to vector<4x128xf32>
    %242 = arith.subf %241, %233 : vector<4x128xf32>
    %243 = arith.mulf %242, %240 : vector<4x128xf32>
    %244 = arith.mulf %233, %217 : vector<4x128xf32>
    %245 = arith.addf %243, %244 : vector<4x128xf32>
    %246 = arith.addi %6, %c5_i32 : i32
    %247 = vector.broadcast %246 : i32 to vector<4x1xi32>
    %248 = arith.cmpi sgt, %3, %247 : vector<4x1xi32>
    %cst_53 = arith.constant 0.000000e+00 : f32
    %249 = vector.shape_cast %248 : vector<4x1xi1> to vector<4x1xi1>
    %250 = vector.broadcast %249 : vector<4x1xi1> to vector<4x128xi1>
    %251 = vector.broadcast %cst_53 : f32 to vector<4x128xf32>
    %252 = arith.select %250, %245, %251 : vector<4x128xi1>, vector<4x128xf32>
    %253 = arith.index_cast %c5_i32 : i32 to index
    %c0_54 = arith.constant 0 : index
    %c0_55 = arith.constant 0 : index
    %254 = vector.load %arg6[%253, %c0_54, %c0_55] : memref<16x4x128xf32, #tpu.memory_space<vmem>>, vector<1x4x128xf32>
    %255 = vector.shape_cast %254 : vector<1x4x128xf32> to vector<4x128xf32>
    %256 = vector.shape_cast %252 : vector<4x128xf32> to vector<1x4x128xf32>
    tpu.vector_store %arg6[%253, %c0_54, %c0_55], %256 {strides = array<i32>} : memref<16x4x128xf32, #tpu.memory_space<vmem>>, vector<1x4x128xf32>,
    %257 = vector.shape_cast %248 : vector<4x1xi1> to vector<4x1xi1>
    %258 = vector.broadcast %257 : vector<4x1xi1> to vector<4x128xi1>
    %259 = arith.select %258, %245, %217 : vector<4x128xi1>, vector<4x128xf32>
    %c6_i32 = arith.constant 6 : i32
    %260 = arith.index_cast %c6_i32 : i32 to index
    %c0_56 = arith.constant 0 : index
    %c0_57 = arith.constant 0 : index
    %261 = vector.load %arg3[%260, %c0_56, %c0_57] : memref<16x4x384xbf16, #tpu.memory_space<vmem>>, vector<1x4x384xbf16>
    %262 = vector.shape_cast %261 : vector<1x4x384xbf16> to vector<4x384xbf16>
    %263 = arith.extf %262 : vector<4x384xbf16> to vector<4x384xf32>
    %264 = arith.truncf %259 : vector<4x128xf32> to vector<4x128xbf16>
    %cst_58 = arith.constant dense<0.000000e+00> : vector<4x384xf32>
    %265 = tpu.matmul %264, %4, %cst_58 {dimension_numbers = #tpu.dot_dimension_numbers<[1], [0], [0], [1], [0, 0, 1, 1], [], []>} : vector<4x128xbf16>, vector<128x384xbf16>, vector<4x384xf32> -> vector<4x384xf32>
    %266 = vector.extract_strided_slice %263 {offsets = [0, 0], sizes = [4, 256], strides = [1, 1]} : vector<4x384xf32> to vector<4x256xf32>
    %267 = vector.extract_strided_slice %265 {offsets = [0, 0], sizes = [4, 256], strides = [1, 1]} : vector<4x384xf32> to vector<4x256xf32>
    %268 = arith.addf %266, %267 : vector<4x256xf32>
    %269 = arith.negf %268 : vector<4x256xf32>
    %270 = math.exp %269 : vector<4x256xf32>
    %cst_59 = arith.constant 1.000000e+00 : f32
    %271 = vector.broadcast %cst_59 : f32 to vector<4x256xf32>
    %272 = arith.addf %271, %270 : vector<4x256xf32>
    %273 = arith.divf %271, %272 : vector<4x256xf32>
    %274 = vector.extract_strided_slice %273 {offsets = [0, 0], sizes = [4, 128], strides = [1, 1]} : vector<4x256xf32> to vector<4x128xf32>
    %275 = vector.extract_strided_slice %273 {offsets = [0, 128], sizes = [4, 128], strides = [1, 1]} : vector<4x256xf32> to vector<4x128xf32>
    %276 = vector.extract_strided_slice %263 {offsets = [0, 256], sizes = [4, 128], strides = [1, 1]} : vector<4x384xf32> to vector<4x128xf32>
    %277 = vector.extract_strided_slice %265 {offsets = [0, 256], sizes = [4, 128], strides = [1, 1]} : vector<4x384xf32> to vector<4x128xf32>
    %278 = vector.broadcast %5 : vector<1x128xf32> to vector<4x128xf32>
    %279 = arith.addf %277, %278 : vector<4x128xf32>
    %280 = arith.mulf %274, %279 : vector<4x128xf32>
    %281 = arith.addf %276, %280 : vector<4x128xf32>
    %282 = math.tanh %281 : vector<4x128xf32>
    %cst_60 = arith.constant 1.000000e+00 : f32
    %283 = vector.broadcast %cst_60 : f32 to vector<4x128xf32>
    %284 = arith.subf %283, %275 : vector<4x128xf32>
    %285 = arith.mulf %284, %282 : vector<4x128xf32>
    %286 = arith.mulf %275, %259 : vector<4x128xf32>
    %287 = arith.addf %285, %286 : vector<4x128xf32>
    %288 = arith.addi %6, %c6_i32 : i32
    %289 = vector.broadcast %288 : i32 to vector<4x1xi32>
    %290 = arith.cmpi sgt, %3, %289 : vector<4x1xi32>
    %cst_61 = arith.constant 0.000000e+00 : f32
    %291 = vector.shape_cast %290 : vector<4x1xi1> to vector<4x1xi1>
    %292 = vector.broadcast %291 : vector<4x1xi1> to vector<4x128xi1>
    %293 = vector.broadcast %cst_61 : f32 to vector<4x128xf32>
    %294 = arith.select %292, %287, %293 : vector<4x128xi1>, vector<4x128xf32>
    %295 = arith.index_cast %c6_i32 : i32 to index
    %c0_62 = arith.constant 0 : index
    %c0_63 = arith.constant 0 : index
    %296 = vector.load %arg6[%295, %c0_62, %c0_63] : memref<16x4x128xf32, #tpu.memory_space<vmem>>, vector<1x4x128xf32>
    %297 = vector.shape_cast %296 : vector<1x4x128xf32> to vector<4x128xf32>
    %298 = vector.shape_cast %294 : vector<4x128xf32> to vector<1x4x128xf32>
    tpu.vector_store %arg6[%295, %c0_62, %c0_63], %298 {strides = array<i32>} : memref<16x4x128xf32, #tpu.memory_space<vmem>>, vector<1x4x128xf32>,
    %299 = vector.shape_cast %290 : vector<4x1xi1> to vector<4x1xi1>
    %300 = vector.broadcast %299 : vector<4x1xi1> to vector<4x128xi1>
    %301 = arith.select %300, %287, %259 : vector<4x128xi1>, vector<4x128xf32>
    %c7_i32 = arith.constant 7 : i32
    %302 = arith.index_cast %c7_i32 : i32 to index
    %c0_64 = arith.constant 0 : index
    %c0_65 = arith.constant 0 : index
    %303 = vector.load %arg3[%302, %c0_64, %c0_65] : memref<16x4x384xbf16, #tpu.memory_space<vmem>>, vector<1x4x384xbf16>
    %304 = vector.shape_cast %303 : vector<1x4x384xbf16> to vector<4x384xbf16>
    %305 = arith.extf %304 : vector<4x384xbf16> to vector<4x384xf32>
    %306 = arith.truncf %301 : vector<4x128xf32> to vector<4x128xbf16>
    %cst_66 = arith.constant dense<0.000000e+00> : vector<4x384xf32>
    %307 = tpu.matmul %306, %4, %cst_66 {dimension_numbers = #tpu.dot_dimension_numbers<[1], [0], [0], [1], [0, 0, 1, 1], [], []>} : vector<4x128xbf16>, vector<128x384xbf16>, vector<4x384xf32> -> vector<4x384xf32>
    %308 = vector.extract_strided_slice %305 {offsets = [0, 0], sizes = [4, 256], strides = [1, 1]} : vector<4x384xf32> to vector<4x256xf32>
    %309 = vector.extract_strided_slice %307 {offsets = [0, 0], sizes = [4, 256], strides = [1, 1]} : vector<4x384xf32> to vector<4x256xf32>
    %310 = arith.addf %308, %309 : vector<4x256xf32>
    %311 = arith.negf %310 : vector<4x256xf32>
    %312 = math.exp %311 : vector<4x256xf32>
    %cst_67 = arith.constant 1.000000e+00 : f32
    %313 = vector.broadcast %cst_67 : f32 to vector<4x256xf32>
    %314 = arith.addf %313, %312 : vector<4x256xf32>
    %315 = arith.divf %313, %314 : vector<4x256xf32>
    %316 = vector.extract_strided_slice %315 {offsets = [0, 0], sizes = [4, 128], strides = [1, 1]} : vector<4x256xf32> to vector<4x128xf32>
    %317 = vector.extract_strided_slice %315 {offsets = [0, 128], sizes = [4, 128], strides = [1, 1]} : vector<4x256xf32> to vector<4x128xf32>
    %318 = vector.extract_strided_slice %305 {offsets = [0, 256], sizes = [4, 128], strides = [1, 1]} : vector<4x384xf32> to vector<4x128xf32>
    %319 = vector.extract_strided_slice %307 {offsets = [0, 256], sizes = [4, 128], strides = [1, 1]} : vector<4x384xf32> to vector<4x128xf32>
    %320 = vector.broadcast %5 : vector<1x128xf32> to vector<4x128xf32>
    %321 = arith.addf %319, %320 : vector<4x128xf32>
    %322 = arith.mulf %316, %321 : vector<4x128xf32>
    %323 = arith.addf %318, %322 : vector<4x128xf32>
    %324 = math.tanh %323 : vector<4x128xf32>
    %cst_68 = arith.constant 1.000000e+00 : f32
    %325 = vector.broadcast %cst_68 : f32 to vector<4x128xf32>
    %326 = arith.subf %325, %317 : vector<4x128xf32>
    %327 = arith.mulf %326, %324 : vector<4x128xf32>
    %328 = arith.mulf %317, %301 : vector<4x128xf32>
    %329 = arith.addf %327, %328 : vector<4x128xf32>
    %330 = arith.addi %6, %c7_i32 : i32
    %331 = vector.broadcast %330 : i32 to vector<4x1xi32>
    %332 = arith.cmpi sgt, %3, %331 : vector<4x1xi32>
    %cst_69 = arith.constant 0.000000e+00 : f32
    %333 = vector.shape_cast %332 : vector<4x1xi1> to vector<4x1xi1>
    %334 = vector.broadcast %333 : vector<4x1xi1> to vector<4x128xi1>
    %335 = vector.broadcast %cst_69 : f32 to vector<4x128xf32>
    %336 = arith.select %334, %329, %335 : vector<4x128xi1>, vector<4x128xf32>
    %337 = arith.index_cast %c7_i32 : i32 to index
    %c0_70 = arith.constant 0 : index
    %c0_71 = arith.constant 0 : index
    %338 = vector.load %arg6[%337, %c0_70, %c0_71] : memref<16x4x128xf32, #tpu.memory_space<vmem>>, vector<1x4x128xf32>
    %339 = vector.shape_cast %338 : vector<1x4x128xf32> to vector<4x128xf32>
    %340 = vector.shape_cast %336 : vector<4x128xf32> to vector<1x4x128xf32>
    tpu.vector_store %arg6[%337, %c0_70, %c0_71], %340 {strides = array<i32>} : memref<16x4x128xf32, #tpu.memory_space<vmem>>, vector<1x4x128xf32>,
    %341 = vector.shape_cast %332 : vector<4x1xi1> to vector<4x1xi1>
    %342 = vector.broadcast %341 : vector<4x1xi1> to vector<4x128xi1>
    %343 = arith.select %342, %329, %301 : vector<4x128xi1>, vector<4x128xf32>
    %c8_i32 = arith.constant 8 : i32
    %344 = arith.index_cast %c8_i32 : i32 to index
    %c0_72 = arith.constant 0 : index
    %c0_73 = arith.constant 0 : index
    %345 = vector.load %arg3[%344, %c0_72, %c0_73] : memref<16x4x384xbf16, #tpu.memory_space<vmem>>, vector<1x4x384xbf16>
    %346 = vector.shape_cast %345 : vector<1x4x384xbf16> to vector<4x384xbf16>
    %347 = arith.extf %346 : vector<4x384xbf16> to vector<4x384xf32>
    %348 = arith.truncf %343 : vector<4x128xf32> to vector<4x128xbf16>
    %cst_74 = arith.constant dense<0.000000e+00> : vector<4x384xf32>
    %349 = tpu.matmul %348, %4, %cst_74 {dimension_numbers = #tpu.dot_dimension_numbers<[1], [0], [0], [1], [0, 0, 1, 1], [], []>} : vector<4x128xbf16>, vector<128x384xbf16>, vector<4x384xf32> -> vector<4x384xf32>
    %350 = vector.extract_strided_slice %347 {offsets = [0, 0], sizes = [4, 256], strides = [1, 1]} : vector<4x384xf32> to vector<4x256xf32>
    %351 = vector.extract_strided_slice %349 {offsets = [0, 0], sizes = [4, 256], strides = [1, 1]} : vector<4x384xf32> to vector<4x256xf32>
    %352 = arith.addf %350, %351 : vector<4x256xf32>
    %353 = arith.negf %352 : vector<4x256xf32>
    %354 = math.exp %353 : vector<4x256xf32>
    %cst_75 = arith.constant 1.000000e+00 : f32
    %355 = vector.broadcast %cst_75 : f32 to vector<4x256xf32>
    %356 = arith.addf %355, %354 : vector<4x256xf32>
    %357 = arith.divf %355, %356 : vector<4x256xf32>
    %358 = vector.extract_strided_slice %357 {offsets = [0, 0], sizes = [4, 128], strides = [1, 1]} : vector<4x256xf32> to vector<4x128xf32>
    %359 = vector.extract_strided_slice %357 {offsets = [0, 128], sizes = [4, 128], strides = [1, 1]} : vector<4x256xf32> to vector<4x128xf32>
    %360 = vector.extract_strided_slice %347 {offsets = [0, 256], sizes = [4, 128], strides = [1, 1]} : vector<4x384xf32> to vector<4x128xf32>
    %361 = vector.extract_strided_slice %349 {offsets = [0, 256], sizes = [4, 128], strides = [1, 1]} : vector<4x384xf32> to vector<4x128xf32>
    %362 = vector.broadcast %5 : vector<1x128xf32> to vector<4x128xf32>
    %363 = arith.addf %361, %362 : vector<4x128xf32>
    %364 = arith.mulf %358, %363 : vector<4x128xf32>
    %365 = arith.addf %360, %364 : vector<4x128xf32>
    %366 = math.tanh %365 : vector<4x128xf32>
    %cst_76 = arith.constant 1.000000e+00 : f32
    %367 = vector.broadcast %cst_76 : f32 to vector<4x128xf32>
    %368 = arith.subf %367, %359 : vector<4x128xf32>
    %369 = arith.mulf %368, %366 : vector<4x128xf32>
    %370 = arith.mulf %359, %343 : vector<4x128xf32>
    %371 = arith.addf %369, %370 : vector<4x128xf32>
    %372 = arith.addi %6, %c8_i32 : i32
    %373 = vector.broadcast %372 : i32 to vector<4x1xi32>
    %374 = arith.cmpi sgt, %3, %373 : vector<4x1xi32>
    %cst_77 = arith.constant 0.000000e+00 : f32
    %375 = vector.shape_cast %374 : vector<4x1xi1> to vector<4x1xi1>
    %376 = vector.broadcast %375 : vector<4x1xi1> to vector<4x128xi1>
    %377 = vector.broadcast %cst_77 : f32 to vector<4x128xf32>
    %378 = arith.select %376, %371, %377 : vector<4x128xi1>, vector<4x128xf32>
    %379 = arith.index_cast %c8_i32 : i32 to index
    %c0_78 = arith.constant 0 : index
    %c0_79 = arith.constant 0 : index
    %380 = vector.load %arg6[%379, %c0_78, %c0_79] : memref<16x4x128xf32, #tpu.memory_space<vmem>>, vector<1x4x128xf32>
    %381 = vector.shape_cast %380 : vector<1x4x128xf32> to vector<4x128xf32>
    %382 = vector.shape_cast %378 : vector<4x128xf32> to vector<1x4x128xf32>
    tpu.vector_store %arg6[%379, %c0_78, %c0_79], %382 {strides = array<i32>} : memref<16x4x128xf32, #tpu.memory_space<vmem>>, vector<1x4x128xf32>,
    %383 = vector.shape_cast %374 : vector<4x1xi1> to vector<4x1xi1>
    %384 = vector.broadcast %383 : vector<4x1xi1> to vector<4x128xi1>
    %385 = arith.select %384, %371, %343 : vector<4x128xi1>, vector<4x128xf32>
    %c9_i32 = arith.constant 9 : i32
    %386 = arith.index_cast %c9_i32 : i32 to index
    %c0_80 = arith.constant 0 : index
    %c0_81 = arith.constant 0 : index
    %387 = vector.load %arg3[%386, %c0_80, %c0_81] : memref<16x4x384xbf16, #tpu.memory_space<vmem>>, vector<1x4x384xbf16>
    %388 = vector.shape_cast %387 : vector<1x4x384xbf16> to vector<4x384xbf16>
    %389 = arith.extf %388 : vector<4x384xbf16> to vector<4x384xf32>
    %390 = arith.truncf %385 : vector<4x128xf32> to vector<4x128xbf16>
    %cst_82 = arith.constant dense<0.000000e+00> : vector<4x384xf32>
    %391 = tpu.matmul %390, %4, %cst_82 {dimension_numbers = #tpu.dot_dimension_numbers<[1], [0], [0], [1], [0, 0, 1, 1], [], []>} : vector<4x128xbf16>, vector<128x384xbf16>, vector<4x384xf32> -> vector<4x384xf32>
    %392 = vector.extract_strided_slice %389 {offsets = [0, 0], sizes = [4, 256], strides = [1, 1]} : vector<4x384xf32> to vector<4x256xf32>
    %393 = vector.extract_strided_slice %391 {offsets = [0, 0], sizes = [4, 256], strides = [1, 1]} : vector<4x384xf32> to vector<4x256xf32>
    %394 = arith.addf %392, %393 : vector<4x256xf32>
    %395 = arith.negf %394 : vector<4x256xf32>
    %396 = math.exp %395 : vector<4x256xf32>
    %cst_83 = arith.constant 1.000000e+00 : f32
    %397 = vector.broadcast %cst_83 : f32 to vector<4x256xf32>
    %398 = arith.addf %397, %396 : vector<4x256xf32>
    %399 = arith.divf %397, %398 : vector<4x256xf32>
    %400 = vector.extract_strided_slice %399 {offsets = [0, 0], sizes = [4, 128], strides = [1, 1]} : vector<4x256xf32> to vector<4x128xf32>
    %401 = vector.extract_strided_slice %399 {offsets = [0, 128], sizes = [4, 128], strides = [1, 1]} : vector<4x256xf32> to vector<4x128xf32>
    %402 = vector.extract_strided_slice %389 {offsets = [0, 256], sizes = [4, 128], strides = [1, 1]} : vector<4x384xf32> to vector<4x128xf32>
    %403 = vector.extract_strided_slice %391 {offsets = [0, 256], sizes = [4, 128], strides = [1, 1]} : vector<4x384xf32> to vector<4x128xf32>
    %404 = vector.broadcast %5 : vector<1x128xf32> to vector<4x128xf32>
    %405 = arith.addf %403, %404 : vector<4x128xf32>
    %406 = arith.mulf %400, %405 : vector<4x128xf32>
    %407 = arith.addf %402, %406 : vector<4x128xf32>
    %408 = math.tanh %407 : vector<4x128xf32>
    %cst_84 = arith.constant 1.000000e+00 : f32
    %409 = vector.broadcast %cst_84 : f32 to vector<4x128xf32>
    %410 = arith.subf %409, %401 : vector<4x128xf32>
    %411 = arith.mulf %410, %408 : vector<4x128xf32>
    %412 = arith.mulf %401, %385 : vector<4x128xf32>
    %413 = arith.addf %411, %412 : vector<4x128xf32>
    %414 = arith.addi %6, %c9_i32 : i32
    %415 = vector.broadcast %414 : i32 to vector<4x1xi32>
    %416 = arith.cmpi sgt, %3, %415 : vector<4x1xi32>
    %cst_85 = arith.constant 0.000000e+00 : f32
    %417 = vector.shape_cast %416 : vector<4x1xi1> to vector<4x1xi1>
    %418 = vector.broadcast %417 : vector<4x1xi1> to vector<4x128xi1>
    %419 = vector.broadcast %cst_85 : f32 to vector<4x128xf32>
    %420 = arith.select %418, %413, %419 : vector<4x128xi1>, vector<4x128xf32>
    %421 = arith.index_cast %c9_i32 : i32 to index
    %c0_86 = arith.constant 0 : index
    %c0_87 = arith.constant 0 : index
    %422 = vector.load %arg6[%421, %c0_86, %c0_87] : memref<16x4x128xf32, #tpu.memory_space<vmem>>, vector<1x4x128xf32>
    %423 = vector.shape_cast %422 : vector<1x4x128xf32> to vector<4x128xf32>
    %424 = vector.shape_cast %420 : vector<4x128xf32> to vector<1x4x128xf32>
    tpu.vector_store %arg6[%421, %c0_86, %c0_87], %424 {strides = array<i32>} : memref<16x4x128xf32, #tpu.memory_space<vmem>>, vector<1x4x128xf32>,
    %425 = vector.shape_cast %416 : vector<4x1xi1> to vector<4x1xi1>
    %426 = vector.broadcast %425 : vector<4x1xi1> to vector<4x128xi1>
    %427 = arith.select %426, %413, %385 : vector<4x128xi1>, vector<4x128xf32>
    %c10_i32 = arith.constant 10 : i32
    %428 = arith.index_cast %c10_i32 : i32 to index
    %c0_88 = arith.constant 0 : index
    %c0_89 = arith.constant 0 : index
    %429 = vector.load %arg3[%428, %c0_88, %c0_89] : memref<16x4x384xbf16, #tpu.memory_space<vmem>>, vector<1x4x384xbf16>
    %430 = vector.shape_cast %429 : vector<1x4x384xbf16> to vector<4x384xbf16>
    %431 = arith.extf %430 : vector<4x384xbf16> to vector<4x384xf32>
    %432 = arith.truncf %427 : vector<4x128xf32> to vector<4x128xbf16>
    %cst_90 = arith.constant dense<0.000000e+00> : vector<4x384xf32>
    %433 = tpu.matmul %432, %4, %cst_90 {dimension_numbers = #tpu.dot_dimension_numbers<[1], [0], [0], [1], [0, 0, 1, 1], [], []>} : vector<4x128xbf16>, vector<128x384xbf16>, vector<4x384xf32> -> vector<4x384xf32>
    %434 = vector.extract_strided_slice %431 {offsets = [0, 0], sizes = [4, 256], strides = [1, 1]} : vector<4x384xf32> to vector<4x256xf32>
    %435 = vector.extract_strided_slice %433 {offsets = [0, 0], sizes = [4, 256], strides = [1, 1]} : vector<4x384xf32> to vector<4x256xf32>
    %436 = arith.addf %434, %435 : vector<4x256xf32>
    %437 = arith.negf %436 : vector<4x256xf32>
    %438 = math.exp %437 : vector<4x256xf32>
    %cst_91 = arith.constant 1.000000e+00 : f32
    %439 = vector.broadcast %cst_91 : f32 to vector<4x256xf32>
    %440 = arith.addf %439, %438 : vector<4x256xf32>
    %441 = arith.divf %439, %440 : vector<4x256xf32>
    %442 = vector.extract_strided_slice %441 {offsets = [0, 0], sizes = [4, 128], strides = [1, 1]} : vector<4x256xf32> to vector<4x128xf32>
    %443 = vector.extract_strided_slice %441 {offsets = [0, 128], sizes = [4, 128], strides = [1, 1]} : vector<4x256xf32> to vector<4x128xf32>
    %444 = vector.extract_strided_slice %431 {offsets = [0, 256], sizes = [4, 128], strides = [1, 1]} : vector<4x384xf32> to vector<4x128xf32>
    %445 = vector.extract_strided_slice %433 {offsets = [0, 256], sizes = [4, 128], strides = [1, 1]} : vector<4x384xf32> to vector<4x128xf32>
    %446 = vector.broadcast %5 : vector<1x128xf32> to vector<4x128xf32>
    %447 = arith.addf %445, %446 : vector<4x128xf32>
    %448 = arith.mulf %442, %447 : vector<4x128xf32>
    %449 = arith.addf %444, %448 : vector<4x128xf32>
    %450 = math.tanh %449 : vector<4x128xf32>
    %cst_92 = arith.constant 1.000000e+00 : f32
    %451 = vector.broadcast %cst_92 : f32 to vector<4x128xf32>
    %452 = arith.subf %451, %443 : vector<4x128xf32>
    %453 = arith.mulf %452, %450 : vector<4x128xf32>
    %454 = arith.mulf %443, %427 : vector<4x128xf32>
    %455 = arith.addf %453, %454 : vector<4x128xf32>
    %456 = arith.addi %6, %c10_i32 : i32
    %457 = vector.broadcast %456 : i32 to vector<4x1xi32>
    %458 = arith.cmpi sgt, %3, %457 : vector<4x1xi32>
    %cst_93 = arith.constant 0.000000e+00 : f32
    %459 = vector.shape_cast %458 : vector<4x1xi1> to vector<4x1xi1>
    %460 = vector.broadcast %459 : vector<4x1xi1> to vector<4x128xi1>
    %461 = vector.broadcast %cst_93 : f32 to vector<4x128xf32>
    %462 = arith.select %460, %455, %461 : vector<4x128xi1>, vector<4x128xf32>
    %463 = arith.index_cast %c10_i32 : i32 to index
    %c0_94 = arith.constant 0 : index
    %c0_95 = arith.constant 0 : index
    %464 = vector.load %arg6[%463, %c0_94, %c0_95] : memref<16x4x128xf32, #tpu.memory_space<vmem>>, vector<1x4x128xf32>
    %465 = vector.shape_cast %464 : vector<1x4x128xf32> to vector<4x128xf32>
    %466 = vector.shape_cast %462 : vector<4x128xf32> to vector<1x4x128xf32>
    tpu.vector_store %arg6[%463, %c0_94, %c0_95], %466 {strides = array<i32>} : memref<16x4x128xf32, #tpu.memory_space<vmem>>, vector<1x4x128xf32>,
    %467 = vector.shape_cast %458 : vector<4x1xi1> to vector<4x1xi1>
    %468 = vector.broadcast %467 : vector<4x1xi1> to vector<4x128xi1>
    %469 = arith.select %468, %455, %427 : vector<4x128xi1>, vector<4x128xf32>
    %c11_i32 = arith.constant 11 : i32
    %470 = arith.index_cast %c11_i32 : i32 to index
    %c0_96 = arith.constant 0 : index
    %c0_97 = arith.constant 0 : index
    %471 = vector.load %arg3[%470, %c0_96, %c0_97] : memref<16x4x384xbf16, #tpu.memory_space<vmem>>, vector<1x4x384xbf16>
    %472 = vector.shape_cast %471 : vector<1x4x384xbf16> to vector<4x384xbf16>
    %473 = arith.extf %472 : vector<4x384xbf16> to vector<4x384xf32>
    %474 = arith.truncf %469 : vector<4x128xf32> to vector<4x128xbf16>
    %cst_98 = arith.constant dense<0.000000e+00> : vector<4x384xf32>
    %475 = tpu.matmul %474, %4, %cst_98 {dimension_numbers = #tpu.dot_dimension_numbers<[1], [0], [0], [1], [0, 0, 1, 1], [], []>} : vector<4x128xbf16>, vector<128x384xbf16>, vector<4x384xf32> -> vector<4x384xf32>
    %476 = vector.extract_strided_slice %473 {offsets = [0, 0], sizes = [4, 256], strides = [1, 1]} : vector<4x384xf32> to vector<4x256xf32>
    %477 = vector.extract_strided_slice %475 {offsets = [0, 0], sizes = [4, 256], strides = [1, 1]} : vector<4x384xf32> to vector<4x256xf32>
    %478 = arith.addf %476, %477 : vector<4x256xf32>
    %479 = arith.negf %478 : vector<4x256xf32>
    %480 = math.exp %479 : vector<4x256xf32>
    %cst_99 = arith.constant 1.000000e+00 : f32
    %481 = vector.broadcast %cst_99 : f32 to vector<4x256xf32>
    %482 = arith.addf %481, %480 : vector<4x256xf32>
    %483 = arith.divf %481, %482 : vector<4x256xf32>
    %484 = vector.extract_strided_slice %483 {offsets = [0, 0], sizes = [4, 128], strides = [1, 1]} : vector<4x256xf32> to vector<4x128xf32>
    %485 = vector.extract_strided_slice %483 {offsets = [0, 128], sizes = [4, 128], strides = [1, 1]} : vector<4x256xf32> to vector<4x128xf32>
    %486 = vector.extract_strided_slice %473 {offsets = [0, 256], sizes = [4, 128], strides = [1, 1]} : vector<4x384xf32> to vector<4x128xf32>
    %487 = vector.extract_strided_slice %475 {offsets = [0, 256], sizes = [4, 128], strides = [1, 1]} : vector<4x384xf32> to vector<4x128xf32>
    %488 = vector.broadcast %5 : vector<1x128xf32> to vector<4x128xf32>
    %489 = arith.addf %487, %488 : vector<4x128xf32>
    %490 = arith.mulf %484, %489 : vector<4x128xf32>
    %491 = arith.addf %486, %490 : vector<4x128xf32>
    %492 = math.tanh %491 : vector<4x128xf32>
    %cst_100 = arith.constant 1.000000e+00 : f32
    %493 = vector.broadcast %cst_100 : f32 to vector<4x128xf32>
    %494 = arith.subf %493, %485 : vector<4x128xf32>
    %495 = arith.mulf %494, %492 : vector<4x128xf32>
    %496 = arith.mulf %485, %469 : vector<4x128xf32>
    %497 = arith.addf %495, %496 : vector<4x128xf32>
    %498 = arith.addi %6, %c11_i32 : i32
    %499 = vector.broadcast %498 : i32 to vector<4x1xi32>
    %500 = arith.cmpi sgt, %3, %499 : vector<4x1xi32>
    %cst_101 = arith.constant 0.000000e+00 : f32
    %501 = vector.shape_cast %500 : vector<4x1xi1> to vector<4x1xi1>
    %502 = vector.broadcast %501 : vector<4x1xi1> to vector<4x128xi1>
    %503 = vector.broadcast %cst_101 : f32 to vector<4x128xf32>
    %504 = arith.select %502, %497, %503 : vector<4x128xi1>, vector<4x128xf32>
    %505 = arith.index_cast %c11_i32 : i32 to index
    %c0_102 = arith.constant 0 : index
    %c0_103 = arith.constant 0 : index
    %506 = vector.load %arg6[%505, %c0_102, %c0_103] : memref<16x4x128xf32, #tpu.memory_space<vmem>>, vector<1x4x128xf32>
    %507 = vector.shape_cast %506 : vector<1x4x128xf32> to vector<4x128xf32>
    %508 = vector.shape_cast %504 : vector<4x128xf32> to vector<1x4x128xf32>
    tpu.vector_store %arg6[%505, %c0_102, %c0_103], %508 {strides = array<i32>} : memref<16x4x128xf32, #tpu.memory_space<vmem>>, vector<1x4x128xf32>,
    %509 = vector.shape_cast %500 : vector<4x1xi1> to vector<4x1xi1>
    %510 = vector.broadcast %509 : vector<4x1xi1> to vector<4x128xi1>
    %511 = arith.select %510, %497, %469 : vector<4x128xi1>, vector<4x128xf32>
    %c12_i32 = arith.constant 12 : i32
    %512 = arith.index_cast %c12_i32 : i32 to index
    %c0_104 = arith.constant 0 : index
    %c0_105 = arith.constant 0 : index
    %513 = vector.load %arg3[%512, %c0_104, %c0_105] : memref<16x4x384xbf16, #tpu.memory_space<vmem>>, vector<1x4x384xbf16>
    %514 = vector.shape_cast %513 : vector<1x4x384xbf16> to vector<4x384xbf16>
    %515 = arith.extf %514 : vector<4x384xbf16> to vector<4x384xf32>
    %516 = arith.truncf %511 : vector<4x128xf32> to vector<4x128xbf16>
    %cst_106 = arith.constant dense<0.000000e+00> : vector<4x384xf32>
    %517 = tpu.matmul %516, %4, %cst_106 {dimension_numbers = #tpu.dot_dimension_numbers<[1], [0], [0], [1], [0, 0, 1, 1], [], []>} : vector<4x128xbf16>, vector<128x384xbf16>, vector<4x384xf32> -> vector<4x384xf32>
    %518 = vector.extract_strided_slice %515 {offsets = [0, 0], sizes = [4, 256], strides = [1, 1]} : vector<4x384xf32> to vector<4x256xf32>
    %519 = vector.extract_strided_slice %517 {offsets = [0, 0], sizes = [4, 256], strides = [1, 1]} : vector<4x384xf32> to vector<4x256xf32>
    %520 = arith.addf %518, %519 : vector<4x256xf32>
    %521 = arith.negf %520 : vector<4x256xf32>
    %522 = math.exp %521 : vector<4x256xf32>
    %cst_107 = arith.constant 1.000000e+00 : f32
    %523 = vector.broadcast %cst_107 : f32 to vector<4x256xf32>
    %524 = arith.addf %523, %522 : vector<4x256xf32>
    %525 = arith.divf %523, %524 : vector<4x256xf32>
    %526 = vector.extract_strided_slice %525 {offsets = [0, 0], sizes = [4, 128], strides = [1, 1]} : vector<4x256xf32> to vector<4x128xf32>
    %527 = vector.extract_strided_slice %525 {offsets = [0, 128], sizes = [4, 128], strides = [1, 1]} : vector<4x256xf32> to vector<4x128xf32>
    %528 = vector.extract_strided_slice %515 {offsets = [0, 256], sizes = [4, 128], strides = [1, 1]} : vector<4x384xf32> to vector<4x128xf32>
    %529 = vector.extract_strided_slice %517 {offsets = [0, 256], sizes = [4, 128], strides = [1, 1]} : vector<4x384xf32> to vector<4x128xf32>
    %530 = vector.broadcast %5 : vector<1x128xf32> to vector<4x128xf32>
    %531 = arith.addf %529, %530 : vector<4x128xf32>
    %532 = arith.mulf %526, %531 : vector<4x128xf32>
    %533 = arith.addf %528, %532 : vector<4x128xf32>
    %534 = math.tanh %533 : vector<4x128xf32>
    %cst_108 = arith.constant 1.000000e+00 : f32
    %535 = vector.broadcast %cst_108 : f32 to vector<4x128xf32>
    %536 = arith.subf %535, %527 : vector<4x128xf32>
    %537 = arith.mulf %536, %534 : vector<4x128xf32>
    %538 = arith.mulf %527, %511 : vector<4x128xf32>
    %539 = arith.addf %537, %538 : vector<4x128xf32>
    %540 = arith.addi %6, %c12_i32 : i32
    %541 = vector.broadcast %540 : i32 to vector<4x1xi32>
    %542 = arith.cmpi sgt, %3, %541 : vector<4x1xi32>
    %cst_109 = arith.constant 0.000000e+00 : f32
    %543 = vector.shape_cast %542 : vector<4x1xi1> to vector<4x1xi1>
    %544 = vector.broadcast %543 : vector<4x1xi1> to vector<4x128xi1>
    %545 = vector.broadcast %cst_109 : f32 to vector<4x128xf32>
    %546 = arith.select %544, %539, %545 : vector<4x128xi1>, vector<4x128xf32>
    %547 = arith.index_cast %c12_i32 : i32 to index
    %c0_110 = arith.constant 0 : index
    %c0_111 = arith.constant 0 : index
    %548 = vector.load %arg6[%547, %c0_110, %c0_111] : memref<16x4x128xf32, #tpu.memory_space<vmem>>, vector<1x4x128xf32>
    %549 = vector.shape_cast %548 : vector<1x4x128xf32> to vector<4x128xf32>
    %550 = vector.shape_cast %546 : vector<4x128xf32> to vector<1x4x128xf32>
    tpu.vector_store %arg6[%547, %c0_110, %c0_111], %550 {strides = array<i32>} : memref<16x4x128xf32, #tpu.memory_space<vmem>>, vector<1x4x128xf32>,
    %551 = vector.shape_cast %542 : vector<4x1xi1> to vector<4x1xi1>
    %552 = vector.broadcast %551 : vector<4x1xi1> to vector<4x128xi1>
    %553 = arith.select %552, %539, %511 : vector<4x128xi1>, vector<4x128xf32>
    %c13_i32 = arith.constant 13 : i32
    %554 = arith.index_cast %c13_i32 : i32 to index
    %c0_112 = arith.constant 0 : index
    %c0_113 = arith.constant 0 : index
    %555 = vector.load %arg3[%554, %c0_112, %c0_113] : memref<16x4x384xbf16, #tpu.memory_space<vmem>>, vector<1x4x384xbf16>
    %556 = vector.shape_cast %555 : vector<1x4x384xbf16> to vector<4x384xbf16>
    %557 = arith.extf %556 : vector<4x384xbf16> to vector<4x384xf32>
    %558 = arith.truncf %553 : vector<4x128xf32> to vector<4x128xbf16>
    %cst_114 = arith.constant dense<0.000000e+00> : vector<4x384xf32>
    %559 = tpu.matmul %558, %4, %cst_114 {dimension_numbers = #tpu.dot_dimension_numbers<[1], [0], [0], [1], [0, 0, 1, 1], [], []>} : vector<4x128xbf16>, vector<128x384xbf16>, vector<4x384xf32> -> vector<4x384xf32>
    %560 = vector.extract_strided_slice %557 {offsets = [0, 0], sizes = [4, 256], strides = [1, 1]} : vector<4x384xf32> to vector<4x256xf32>
    %561 = vector.extract_strided_slice %559 {offsets = [0, 0], sizes = [4, 256], strides = [1, 1]} : vector<4x384xf32> to vector<4x256xf32>
    %562 = arith.addf %560, %561 : vector<4x256xf32>
    %563 = arith.negf %562 : vector<4x256xf32>
    %564 = math.exp %563 : vector<4x256xf32>
    %cst_115 = arith.constant 1.000000e+00 : f32
    %565 = vector.broadcast %cst_115 : f32 to vector<4x256xf32>
    %566 = arith.addf %565, %564 : vector<4x256xf32>
    %567 = arith.divf %565, %566 : vector<4x256xf32>
    %568 = vector.extract_strided_slice %567 {offsets = [0, 0], sizes = [4, 128], strides = [1, 1]} : vector<4x256xf32> to vector<4x128xf32>
    %569 = vector.extract_strided_slice %567 {offsets = [0, 128], sizes = [4, 128], strides = [1, 1]} : vector<4x256xf32> to vector<4x128xf32>
    %570 = vector.extract_strided_slice %557 {offsets = [0, 256], sizes = [4, 128], strides = [1, 1]} : vector<4x384xf32> to vector<4x128xf32>
    %571 = vector.extract_strided_slice %559 {offsets = [0, 256], sizes = [4, 128], strides = [1, 1]} : vector<4x384xf32> to vector<4x128xf32>
    %572 = vector.broadcast %5 : vector<1x128xf32> to vector<4x128xf32>
    %573 = arith.addf %571, %572 : vector<4x128xf32>
    %574 = arith.mulf %568, %573 : vector<4x128xf32>
    %575 = arith.addf %570, %574 : vector<4x128xf32>
    %576 = math.tanh %575 : vector<4x128xf32>
    %cst_116 = arith.constant 1.000000e+00 : f32
    %577 = vector.broadcast %cst_116 : f32 to vector<4x128xf32>
    %578 = arith.subf %577, %569 : vector<4x128xf32>
    %579 = arith.mulf %578, %576 : vector<4x128xf32>
    %580 = arith.mulf %569, %553 : vector<4x128xf32>
    %581 = arith.addf %579, %580 : vector<4x128xf32>
    %582 = arith.addi %6, %c13_i32 : i32
    %583 = vector.broadcast %582 : i32 to vector<4x1xi32>
    %584 = arith.cmpi sgt, %3, %583 : vector<4x1xi32>
    %cst_117 = arith.constant 0.000000e+00 : f32
    %585 = vector.shape_cast %584 : vector<4x1xi1> to vector<4x1xi1>
    %586 = vector.broadcast %585 : vector<4x1xi1> to vector<4x128xi1>
    %587 = vector.broadcast %cst_117 : f32 to vector<4x128xf32>
    %588 = arith.select %586, %581, %587 : vector<4x128xi1>, vector<4x128xf32>
    %589 = arith.index_cast %c13_i32 : i32 to index
    %c0_118 = arith.constant 0 : index
    %c0_119 = arith.constant 0 : index
    %590 = vector.load %arg6[%589, %c0_118, %c0_119] : memref<16x4x128xf32, #tpu.memory_space<vmem>>, vector<1x4x128xf32>
    %591 = vector.shape_cast %590 : vector<1x4x128xf32> to vector<4x128xf32>
    %592 = vector.shape_cast %588 : vector<4x128xf32> to vector<1x4x128xf32>
    tpu.vector_store %arg6[%589, %c0_118, %c0_119], %592 {strides = array<i32>} : memref<16x4x128xf32, #tpu.memory_space<vmem>>, vector<1x4x128xf32>,
    %593 = vector.shape_cast %584 : vector<4x1xi1> to vector<4x1xi1>
    %594 = vector.broadcast %593 : vector<4x1xi1> to vector<4x128xi1>
    %595 = arith.select %594, %581, %553 : vector<4x128xi1>, vector<4x128xf32>
    %c14_i32 = arith.constant 14 : i32
    %596 = arith.index_cast %c14_i32 : i32 to index
    %c0_120 = arith.constant 0 : index
    %c0_121 = arith.constant 0 : index
    %597 = vector.load %arg3[%596, %c0_120, %c0_121] : memref<16x4x384xbf16, #tpu.memory_space<vmem>>, vector<1x4x384xbf16>
    %598 = vector.shape_cast %597 : vector<1x4x384xbf16> to vector<4x384xbf16>
    %599 = arith.extf %598 : vector<4x384xbf16> to vector<4x384xf32>
    %600 = arith.truncf %595 : vector<4x128xf32> to vector<4x128xbf16>
    %cst_122 = arith.constant dense<0.000000e+00> : vector<4x384xf32>
    %601 = tpu.matmul %600, %4, %cst_122 {dimension_numbers = #tpu.dot_dimension_numbers<[1], [0], [0], [1], [0, 0, 1, 1], [], []>} : vector<4x128xbf16>, vector<128x384xbf16>, vector<4x384xf32> -> vector<4x384xf32>
    %602 = vector.extract_strided_slice %599 {offsets = [0, 0], sizes = [4, 256], strides = [1, 1]} : vector<4x384xf32> to vector<4x256xf32>
    %603 = vector.extract_strided_slice %601 {offsets = [0, 0], sizes = [4, 256], strides = [1, 1]} : vector<4x384xf32> to vector<4x256xf32>
    %604 = arith.addf %602, %603 : vector<4x256xf32>
    %605 = arith.negf %604 : vector<4x256xf32>
    %606 = math.exp %605 : vector<4x256xf32>
    %cst_123 = arith.constant 1.000000e+00 : f32
    %607 = vector.broadcast %cst_123 : f32 to vector<4x256xf32>
    %608 = arith.addf %607, %606 : vector<4x256xf32>
    %609 = arith.divf %607, %608 : vector<4x256xf32>
    %610 = vector.extract_strided_slice %609 {offsets = [0, 0], sizes = [4, 128], strides = [1, 1]} : vector<4x256xf32> to vector<4x128xf32>
    %611 = vector.extract_strided_slice %609 {offsets = [0, 128], sizes = [4, 128], strides = [1, 1]} : vector<4x256xf32> to vector<4x128xf32>
    %612 = vector.extract_strided_slice %599 {offsets = [0, 256], sizes = [4, 128], strides = [1, 1]} : vector<4x384xf32> to vector<4x128xf32>
    %613 = vector.extract_strided_slice %601 {offsets = [0, 256], sizes = [4, 128], strides = [1, 1]} : vector<4x384xf32> to vector<4x128xf32>
    %614 = vector.broadcast %5 : vector<1x128xf32> to vector<4x128xf32>
    %615 = arith.addf %613, %614 : vector<4x128xf32>
    %616 = arith.mulf %610, %615 : vector<4x128xf32>
    %617 = arith.addf %612, %616 : vector<4x128xf32>
    %618 = math.tanh %617 : vector<4x128xf32>
    %cst_124 = arith.constant 1.000000e+00 : f32
    %619 = vector.broadcast %cst_124 : f32 to vector<4x128xf32>
    %620 = arith.subf %619, %611 : vector<4x128xf32>
    %621 = arith.mulf %620, %618 : vector<4x128xf32>
    %622 = arith.mulf %611, %595 : vector<4x128xf32>
    %623 = arith.addf %621, %622 : vector<4x128xf32>
    %624 = arith.addi %6, %c14_i32 : i32
    %625 = vector.broadcast %624 : i32 to vector<4x1xi32>
    %626 = arith.cmpi sgt, %3, %625 : vector<4x1xi32>
    %cst_125 = arith.constant 0.000000e+00 : f32
    %627 = vector.shape_cast %626 : vector<4x1xi1> to vector<4x1xi1>
    %628 = vector.broadcast %627 : vector<4x1xi1> to vector<4x128xi1>
    %629 = vector.broadcast %cst_125 : f32 to vector<4x128xf32>
    %630 = arith.select %628, %623, %629 : vector<4x128xi1>, vector<4x128xf32>
    %631 = arith.index_cast %c14_i32 : i32 to index
    %c0_126 = arith.constant 0 : index
    %c0_127 = arith.constant 0 : index
    %632 = vector.load %arg6[%631, %c0_126, %c0_127] : memref<16x4x128xf32, #tpu.memory_space<vmem>>, vector<1x4x128xf32>
    %633 = vector.shape_cast %632 : vector<1x4x128xf32> to vector<4x128xf32>
    %634 = vector.shape_cast %630 : vector<4x128xf32> to vector<1x4x128xf32>
    tpu.vector_store %arg6[%631, %c0_126, %c0_127], %634 {strides = array<i32>} : memref<16x4x128xf32, #tpu.memory_space<vmem>>, vector<1x4x128xf32>,
    %635 = vector.shape_cast %626 : vector<4x1xi1> to vector<4x1xi1>
    %636 = vector.broadcast %635 : vector<4x1xi1> to vector<4x128xi1>
    %637 = arith.select %636, %623, %595 : vector<4x128xi1>, vector<4x128xf32>
    %c15_i32 = arith.constant 15 : i32
    %638 = arith.index_cast %c15_i32 : i32 to index
    %c0_128 = arith.constant 0 : index
    %c0_129 = arith.constant 0 : index
    %639 = vector.load %arg3[%638, %c0_128, %c0_129] : memref<16x4x384xbf16, #tpu.memory_space<vmem>>, vector<1x4x384xbf16>
    %640 = vector.shape_cast %639 : vector<1x4x384xbf16> to vector<4x384xbf16>
    %641 = arith.extf %640 : vector<4x384xbf16> to vector<4x384xf32>
    %642 = arith.truncf %637 : vector<4x128xf32> to vector<4x128xbf16>
    %cst_130 = arith.constant dense<0.000000e+00> : vector<4x384xf32>
    %643 = tpu.matmul %642, %4, %cst_130 {dimension_numbers = #tpu.dot_dimension_numbers<[1], [0], [0], [1], [0, 0, 1, 1], [], []>} : vector<4x128xbf16>, vector<128x384xbf16>, vector<4x384xf32> -> vector<4x384xf32>
    %644 = vector.extract_strided_slice %641 {offsets = [0, 0], sizes = [4, 256], strides = [1, 1]} : vector<4x384xf32> to vector<4x256xf32>
    %645 = vector.extract_strided_slice %643 {offsets = [0, 0], sizes = [4, 256], strides = [1, 1]} : vector<4x384xf32> to vector<4x256xf32>
    %646 = arith.addf %644, %645 : vector<4x256xf32>
    %647 = arith.negf %646 : vector<4x256xf32>
    %648 = math.exp %647 : vector<4x256xf32>
    %cst_131 = arith.constant 1.000000e+00 : f32
    %649 = vector.broadcast %cst_131 : f32 to vector<4x256xf32>
    %650 = arith.addf %649, %648 : vector<4x256xf32>
    %651 = arith.divf %649, %650 : vector<4x256xf32>
    %652 = vector.extract_strided_slice %651 {offsets = [0, 0], sizes = [4, 128], strides = [1, 1]} : vector<4x256xf32> to vector<4x128xf32>
    %653 = vector.extract_strided_slice %651 {offsets = [0, 128], sizes = [4, 128], strides = [1, 1]} : vector<4x256xf32> to vector<4x128xf32>
    %654 = vector.extract_strided_slice %641 {offsets = [0, 256], sizes = [4, 128], strides = [1, 1]} : vector<4x384xf32> to vector<4x128xf32>
    %655 = vector.extract_strided_slice %643 {offsets = [0, 256], sizes = [4, 128], strides = [1, 1]} : vector<4x384xf32> to vector<4x128xf32>
    %656 = vector.broadcast %5 : vector<1x128xf32> to vector<4x128xf32>
    %657 = arith.addf %655, %656 : vector<4x128xf32>
    %658 = arith.mulf %652, %657 : vector<4x128xf32>
    %659 = arith.addf %654, %658 : vector<4x128xf32>
    %660 = math.tanh %659 : vector<4x128xf32>
    %cst_132 = arith.constant 1.000000e+00 : f32
    %661 = vector.broadcast %cst_132 : f32 to vector<4x128xf32>
    %662 = arith.subf %661, %653 : vector<4x128xf32>
    %663 = arith.mulf %662, %660 : vector<4x128xf32>
    %664 = arith.mulf %653, %637 : vector<4x128xf32>
    %665 = arith.addf %663, %664 : vector<4x128xf32>
    %666 = arith.addi %6, %c15_i32 : i32
    %667 = vector.broadcast %666 : i32 to vector<4x1xi32>
    %668 = arith.cmpi sgt, %3, %667 : vector<4x1xi32>
    %cst_133 = arith.constant 0.000000e+00 : f32
    %669 = vector.shape_cast %668 : vector<4x1xi1> to vector<4x1xi1>
    %670 = vector.broadcast %669 : vector<4x1xi1> to vector<4x128xi1>
    %671 = vector.broadcast %cst_133 : f32 to vector<4x128xf32>
    %672 = arith.select %670, %665, %671 : vector<4x128xi1>, vector<4x128xf32>
    %673 = arith.index_cast %c15_i32 : i32 to index
    %c0_134 = arith.constant 0 : index
    %c0_135 = arith.constant 0 : index
    %674 = vector.load %arg6[%673, %c0_134, %c0_135] : memref<16x4x128xf32, #tpu.memory_space<vmem>>, vector<1x4x128xf32>
    %675 = vector.shape_cast %674 : vector<1x4x128xf32> to vector<4x128xf32>
    %676 = vector.shape_cast %672 : vector<4x128xf32> to vector<1x4x128xf32>
    tpu.vector_store %arg6[%673, %c0_134, %c0_135], %676 {strides = array<i32>} : memref<16x4x128xf32, #tpu.memory_space<vmem>>, vector<1x4x128xf32>,
    %677 = vector.shape_cast %668 : vector<4x1xi1> to vector<4x1xi1>
    %678 = vector.broadcast %677 : vector<4x1xi1> to vector<4x128xi1>
    %679 = arith.select %678, %665, %637 : vector<4x128xi1>, vector<4x128xf32>
    %c16_i32_136 = arith.constant 16 : i32
    %c0_137 = arith.constant 0 : index
    %c0_138 = arith.constant 0 : index
    %680 = vector.load %arg8[%c0_137, %c0_138] : memref<4x128xf32, #tpu.memory_space<vmem>>, vector<4x128xf32>
    tpu.vector_store %arg8[%c0_137, %c0_138], %679 {strides = array<i32>} : memref<4x128xf32, #tpu.memory_space<vmem>>, vector<4x128xf32>,
    %c0_i32_139 = arith.constant 0 : i32
    %681 = arith.cmpi eq, %arg1, %c0_i32_139 : i32
    %682 = arith.extui %681 : i1 to i32
    %c0_i32_140 = arith.constant 0 : i32
    %683 = arith.cmpi ne, %682, %c0_i32_140 : i32
    scf.if %683 {
      %c0_141 = arith.constant 0 : index
      %c0_142 = arith.constant 0 : index
      %684 = vector.load %arg7[%c0_141, %c0_142] : memref<4x128xf32, #tpu.memory_space<vmem>>, vector<4x128xf32>
      tpu.vector_store %arg7[%c0_141, %c0_142], %679 {strides = array<i32>} : memref<4x128xf32, #tpu.memory_space<vmem>>, vector<4x128xf32>,
    } else {
    }
    return
  }
  func.func @transform_0(%arg0: i32, %arg1: i32) -> (i32, i32) {
    %c0_i32 = arith.constant 0 : i32
    %c0_i32_0 = arith.constant 0 : i32
    return %arg0, %c0_i32 : i32, i32
  }
  func.func @transform_1(%arg0: i32, %arg1: i32) -> (i32, i32, i32) {
    %c0_i32 = arith.constant 0 : i32
    %c0_i32_0 = arith.constant 0 : i32
    return %arg1, %arg0, %c0_i32 : i32, i32, i32
  }
  func.func @transform_2(%arg0: i32, %arg1: i32) -> (i32, i32) {
    %c0_i32 = arith.constant 0 : i32
    %c0_i32_0 = arith.constant 0 : i32
    %c0_i32_1 = arith.constant 0 : i32
    return %c0_i32, %c0_i32_0 : i32, i32
  }
  func.func @transform_3(%arg0: i32, %arg1: i32) -> (i32, i32) {
    %c0_i32 = arith.constant 0 : i32
    %c0_i32_0 = arith.constant 0 : i32
    %c0_i32_1 = arith.constant 0 : i32
    return %c0_i32, %c0_i32_0 : i32, i32
  }
  func.func @transform_4(%arg0: i32, %arg1: i32) -> (i32, i32, i32) {
    %c0_i32 = arith.constant 0 : i32
    %c0_i32_0 = arith.constant 0 : i32
    return %arg1, %arg0, %c0_i32 : i32, i32, i32
  }
  func.func @transform_5(%arg0: i32, %arg1: i32) -> (i32, i32) {
    %c0_i32 = arith.constant 0 : i32
    %c0_i32_0 = arith.constant 0 : i32
    return %arg0, %c0_i32 : i32, i32
  }
}

</mosaic_0001>

<bundles_post_ra>
// kernel: gru_encoder_forward.1
= control target key start
LH: loop header
LB: loop body
LE: loop exit
PB: predicated region body
PF: predicated region fallthrough
CT: control target
= control target key end

     0   :  { %v2840_v1 = vmov 0.0   ;;  %v2841_v2 = vmov 0   ;;  %vm2842_vm0 = vmmov 0   ;;  %s3972_s2 = inlined_call_operand.vmem [shape: bf16[128,384], index: 2, kind: input, shape index: {}]   ;;  %s3973_s0 = inlined_call_operand.vmem [shape: s32[4,1], index: 0, kind: input, shape index: {}]   ;;  %s3974_s1 = inlined_call_operand.vmem [shape: bf16[16,4,384], index: 1, kind: input, shape index: {}]   ;;  %s3975_s3 = inlined_call_operand.vmem [shape: f32[1,128], index: 3, kind: input, shape index: {}]   ;;  %s3976_s4 = inlined_call_operand.vmem [shape: f32[16,4,128], index: 4, kind: output, shape index: {0}]   ;;  %s3977_s5 = inlined_call_operand.vmem [shape: f32[4,128], index: 5, kind: output, shape index: {1}]  }
   0x1   :  { %v2876_v0 = vld [vmem:[%s3972_s2 + $0xac] ss:$12 sps:$4 sm:$0xff]   ;;  %2340 = vmatprep.subr.bf16.mxu1 %v2840_v1  ;;  %24 = vst [vmem:[#allocation2] sm:$0xf] %v2840_v1  ;;  %225 = vmatprep.mubr.bf16.mxu0 %v2841_v2  ;;  %v2884_v3 = vld [vmem:[%s3972_s2 + $0xa8] ss:$12 sps:$4 sm:$0xff]  }
   0x2   :  { %2356 = vmatprep.mubr.msk.bf16.mxu1 %vm2842_vm0, %v2840_v1  ;;  %2663 = vset.pattern.permute.xlu0 %v2841_v2  ;;  %v2893_v4 = vld [vmem:[%s3972_s2 + $0x94] ss:$12 sps:$4 sm:$0xff]   ;;  %v2900_v5 = vld [vmem:[%s3972_s2 + $0x90] ss:$12 sps:$4 sm:$0xff]   ;;  %v2912_v7 = vld [vmem:[%s3972_s2 + $0x78] ss:$12 sps:$4 sm:$0xff]  }
   0x3   :  { %193 = vmatprep.subr.bf16.mxu0 %v2876_v0  ;;  %2664 = vset.pattern.permute.xlu1 %v2841_v2  ;;  %v2906_v6 = vld [vmem:[%s3972_s2 + $0x7c] ss:$12 sps:$4 sm:$0xff]   ;;  %v2918_v8 = vld [vmem:[%s3972_s2 + $0x64] ss:$12 sps:$4 sm:$0xff]   ;;  %v2924_v9 = vld [vmem:[%s3972_s2 + $0x60] ss:$12 sps:$4 sm:$0xff]  }
   0x4   :  { %194 = vmatpush1.bf16.msra.mxu0 %v2884_v3  ;;  %v2929_v10 = vld [vmem:[%s3972_s2 + $0xb0] ss:$12 sps:$4 sm:$0xff]   ;;  %v2935_v11 = vld [vmem:[%s3972_s2 + $0x4c] ss:$12 sps:$4 sm:$0xff]   ;;  %v2948_v13 = vld [vmem:[%s3972_s2 + $0x48] ss:$12 sps:$4 sm:$0xff]  }
   0x5   :  { %195 = vmatprep.subr.bf16.mxu0 %v2893_v4  ;;  %2341 = vmatpush3.bf16.msra.mxu1 %v2929_v10  ;;  %v2941_v12 = vld [vmem:[%s3972_s2 + $0x98] ss:$12 sps:$4 sm:$0xff]   ;;  %v2954_v14 = vld [vmem:[%s3972_s2 + $0x34] ss:$12 sps:$4 sm:$0xff]   ;;  %v2967_v16 = vld [vmem:[%s3972_s2 + $0x30] ss:$12 sps:$4 sm:$0xff]  }
   0x6   :  { %2342 = vmatprep.subr.bf16.mxu1 %v2840_v1  ;;  %v2960_v15 = vld [vmem:[%s3972_s2 + $0x80] ss:$12 sps:$4 sm:$0xff]   ;;  %v2978_v18 = vld [vmem:[%s3972_s2 + $0x1c] ss:$12 sps:$4 sm:$0xff]   ;;  %v2994_v21 = vld [vmem:[%s3972_s2 + $0x18] ss:$12 sps:$4 sm:$0xff]  }
   0x7   :  { %v2972_v17 = vld [vmem:[%s3973_s0] sm:$0xf]  ;;  %v2986_v19 = vld [vmem:[%s3972_s2 + $0x68] ss:$12 sps:$4 sm:$0xff]   ;;  %v3001_v23 = vld [vmem:[%s3972_s2 + $0x4] ss:$12 sps:$4 sm:$0xff]  }
   0x8   :  { %196 = vmatpush1.bf16.msra.mxu0 %v2900_v5  ;;  %vm303_vm1 = vcmp.gt.s32.totalorder %v2972_v17, 0  ;;  %vm422_vm2 = vcmp.gt.s32.totalorder %v2972_v17, 1  ;;  %vm782_vm3 = vcmp.gt.s32.totalorder %v2972_v17, 4  ;;  %v3008_v24 = vld [vmem:[%s3972_s2 + $0x50] ss:$12 sps:$4 sm:$0xff]   ;;  %vm1022_vm4 = vcmp.gt.s32.totalorder %v2972_v17, 6 }
   0x9   :  { %197 = vmatprep.subr.bf16.mxu0 %v2906_v6  ;;  %2343 = vmatpush3.bf16.msra.mxu1 %v2941_v12  ;;  %v304_v20 = vsel %vm303_vm1, 1, %v2841_v2  ;;  %v423_v22 = vsel %vm422_vm2, 1, %v2841_v2  ;;  %v3015_v25 = vld [vmem:[%s3972_s2] ss:$12 sps:$4 sm:$0xff]   ;;  %v783_v27 = vsel %vm782_vm3, 1, %v2841_v2  ;;  %v1023_v30 = vsel %vm1022_vm4, 1, %v2841_v2 }
   0xa   :  { %2344 = vmatprep.subr.bf16.mxu1 %v2840_v1  ;;  %306 = vperm.xlu0 %2663, %v304_v20   ;;  %v3017_v26 = vld [vmem:[#allocation2] sm:$0xf]  ;;  %v3025_v28 = vld [vmem:[%s3972_s2 + $0x38] ss:$12 sps:$4 sm:$0xff]   ;;  %vm1262_vm5 = vcmp.gt.s32.totalorder %v2972_v17, 8  ;;  %vm1502_vm6 = vcmp.gt.s32.totalorder %v2972_v17, 10 }
   0xb   :  { %v64_v29 = vpack.c.bf16 %v3017_v26, %v3017_v26  ;;  %v3038_v31 = vld [vmem:[%s3972_s2 + $0x20] ss:$12 sps:$4 sm:$0xff]   ;;  %v1263_v32 = vsel %vm1262_vm5, 1, %v2841_v2  ;;  %v3050_v33 = vld [vmem:[%s3972_s2 + $0x8] ss:$12 sps:$4 sm:$0xff]   ;;  %v1503_v34 = vsel %vm1502_vm6, 1, %v2841_v2 }
   0xc   :  { %198 = vmatpush1.bf16.msra.mxu0 %v2912_v7  ;;  %vm1742_vm7 = vcmp.gt.s32.totalorder %v2972_v17, 12  ;;  %vm1982_vm8 = vcmp.gt.s32.totalorder %v2972_v17, 14  ;;  %v61_v37 = vld [vmem:[%s3974_s1] sm:$0x3f]  ;;  %vm542_vm10 = vcmp.gt.s32.totalorder %v2972_v17, 2  ;;  %vm662_vm11 = vcmp.gt.s32.totalorder %v2972_v17, 3 }
   0xd   :  { %199 = vmatprep.subr.bf16.mxu0 %v2918_v8  ;;  %2345 = vmatpush3.bf16.msra.mxu1 %v2960_v15  ;;  %v1743_v35 = vsel %vm1742_vm7, 1, %v2841_v2  ;;  %v1983_v36 = vsel %vm1982_vm8, 1, %v2841_v2  ;;  %v62_v39 = vunpack.c.l.bf16 %v61_v37  ;;  %v3099_v52 = vld [vmem:[%s3975_s3] ss:$0 sm:$0xff]  ;;  %v63_v54 = vunpack.c.h.bf16 %v61_v37 }
   0xe   :  { %2346 = vmatprep.subr.bf16.mxu1 %v2840_v1  ;;  %425 = vperm.xlu0 %2663, %v423_v22   ;;  %vm902_vm12 = vcmp.gt.s32.totalorder %v2972_v17, 5  ;;  %vm1142_vm13 = vcmp.gt.s32.totalorder %v2972_v17, 7  ;;  %vm1382_vm14 = vcmp.gt.s32.totalorder %v2972_v17, 9  ;;  %vm1622_vm15 = vcmp.gt.s32.totalorder %v2972_v17, 11 }
   0xf   :  { %vm1862_vm1 = vcmp.gt.s32.totalorder %v2972_v17, 13  ;;  %vm2102_vm2 = vcmp.gt.s32.totalorder %v2972_v17, 15 }
  0x10   :  { %200 = vmatpush1.bf16.msra.mxu0 %v2924_v9  ;;  %v1863_v37 = vsel %vm1862_vm1, 1, %v2841_v2 }
  0x11   :  { %201 = vmatprep.subr.bf16.mxu0 %v2935_v11  ;;  %2347 = vmatpush3.bf16.msra.mxu1 %v2986_v19 }
  0x12   :  { %2348 = vmatprep.subr.bf16.mxu1 %v2840_v1  ;;  %785 = vperm.xlu0 %2663, %v783_v27  }
  0x14   :  { %202 = vmatpush1.bf16.msra.mxu0 %v2948_v13 }
  0x15   :  { %203 = vmatprep.subr.bf16.mxu0 %v2954_v14  ;;  %2349 = vmatpush3.bf16.msra.mxu1 %v3008_v24 }
  0x16   :  { %2350 = vmatprep.subr.bf16.mxu1 %v2840_v1  ;;  %1025 = vperm.xlu0 %2663, %v1023_v30   ;;  %v663_v30 = vsel %vm662_vm11, 1, %v2841_v2 }
  0x18   :  { %204 = vmatpush1.bf16.msra.mxu0 %v2967_v16 }
  0x19   :  { %205 = vmatprep.subr.bf16.mxu0 %v2978_v18  ;;  %2351 = vmatpush3.bf16.msra.mxu1 %v3025_v28 }
  0x1a   :  { %2352 = vmatprep.subr.bf16.mxu1 %v2840_v1  ;;  %1265 = vperm.xlu0 %2663, %v1263_v32   ;;  %v903_v32 = vsel %vm902_vm12, 1, %v2841_v2 }
  0x1c   :  { %206 = vmatpush1.bf16.msra.mxu0 %v2994_v21 }
  0x1d   :  { %207 = vmatprep.subr.bf16.mxu0 %v3001_v23  ;;  %2353 = vmatpush3.bf16.msra.mxu1 %v3038_v31 }
  0x1e   :  { %2354 = vmatprep.subr.bf16.mxu1 %v2840_v1  ;;  %1505 = vperm.xlu0 %2663, %v1503_v34   ;;  %v1143_v34 = vsel %vm1142_vm13, 1, %v2841_v2 }
  0x20   :  { %208 = vmatpush1.bf16.msra.mxu0 %v3015_v25 }
  0x21   :  { %317 = vmatprep.subr.bf16.mxu0 %v2876_v0  ;;  %2355 = vmatpush3.bf16.msra.mxu1 %v3050_v33 }
  0x22   :  { %2360 = vmatprep.subr.bf16.mxu1 %v2840_v1  ;;  %1745 = vperm.xlu0 %2663, %v1743_v35   ;;  %v1383_v35 = vsel %vm1382_vm14, 1, %v2841_v2 }
  0x23   :  { %226 = vmatmul.mubr.bf16.vlgmr.msra.gmra.mxu0 %v64_v29 }
  0x24   :  { %318 = vmatpush1.bf16.msra.mxu0 %v2884_v3  ;;  %349 = vmatprep.mubr.bf16.mxu0 %v2841_v2 }
  0x25   :  { %319 = vmatprep.subr.bf16.mxu0 %v2893_v4  ;;  %2357 = vmatmul.mubr.bf16.vlgmr.msra.gmra.mxu1 %v64_v29 }
  0x26   :  { %2361 = vmatpush3.bf16.msra.mxu1 %v2929_v10  ;;  %2376 = vmatprep.mubr.msk.bf16.mxu1 %vm2842_vm0, %v2840_v1 }
  0x27   :  { %2362 = vmatprep.subr.bf16.mxu1 %v2840_v1  ;;  %1985 = vperm.xlu0 %2663, %v1983_v36   ;;  %v1623_v36 = vsel %vm1622_vm15, 1, %v2841_v2 }
  0x28   :  { %320 = vmatpush1.bf16.msra.mxu0 %v2900_v5 }
  0x29   :  { %321 = vmatprep.subr.bf16.mxu0 %v2906_v6 }
  0x2a   :  { %2363 = vmatpush3.bf16.msra.mxu1 %v2941_v12 }
  0x2b   :  { %2364 = vmatprep.subr.bf16.mxu1 %v2840_v1 }
  0x2c   :  { %322 = vmatpush1.bf16.msra.mxu0 %v2912_v7 }
  0x2d   :  { %323 = vmatprep.subr.bf16.mxu0 %v2918_v8 }
  0x2e   :  { %2365 = vmatpush3.bf16.msra.mxu1 %v2960_v15 }
  0x2f   :  { %2366 = vmatprep.subr.bf16.mxu1 %v2840_v1 }
  0x30   :  { %324 = vmatpush1.bf16.msra.mxu0 %v2924_v9 }
  0x31   :  { %325 = vmatprep.subr.bf16.mxu0 %v2935_v11 }
  0x32   :  { %2367 = vmatpush3.bf16.msra.mxu1 %v2986_v19 }
  0x33   :  { %2368 = vmatprep.subr.bf16.mxu1 %v2840_v1 }
  0x34   :  { %326 = vmatpush1.bf16.msra.mxu0 %v2948_v13 }
  0x35   :  { %327 = vmatprep.subr.bf16.mxu0 %v2954_v14 }
  0x36   :  { %2369 = vmatpush3.bf16.msra.mxu1 %v3008_v24 }
  0x37   :  { %2370 = vmatprep.subr.bf16.mxu1 %v2840_v1 }
  0x38   :  { %328 = vmatpush1.bf16.msra.mxu0 %v2967_v16 }
  0x39   :  { %329 = vmatprep.subr.bf16.mxu0 %v2978_v18 }
  0x3a   :  { %2371 = vmatpush3.bf16.msra.mxu1 %v3025_v28 }
  0x3b   :  { %2372 = vmatprep.subr.bf16.mxu1 %v2840_v1 }
  0x3c   :  { %330 = vmatpush1.bf16.msra.mxu0 %v2994_v21 }
  0x3d   :  { %331 = vmatprep.subr.bf16.mxu0 %v3001_v23 }
  0x3e   :  { %2373 = vmatpush3.bf16.msra.mxu1 %v3038_v31 }
  0x3f   :  { %2374 = vmatprep.subr.bf16.mxu1 %v2840_v1 }
  0x40   :  { %332 = vmatpush1.bf16.msra.mxu0 %v3015_v25 }
  0x41   :  { %437 = vmatprep.subr.bf16.mxu0 %v2876_v0 }
  0x42   :  { %2375 = vmatpush3.bf16.msra.mxu1 %v3050_v33 }
  0x43   :  { %2380 = vmatprep.subr.bf16.mxu1 %v2840_v1 }
  0x85   :  { %v307_v63 = vpop.permute.xlu0 %306 }
  0x86   :  { %vm308_vm9 = vcmp.eq.s32.totalorder %v307_v63, 1 }
  0xe3   :  { %v227_v38 = vpop.f32.mrf.mxu0 }
  0xe5   :  { %v229_v40 = vpop.f32.mrf.mxu0  ;;  %v268_v46 = vpop.f32.mrf.mxu1 }
  0xe6   :  { %v276_v41 = vcombine.low %v227_v38, %v229_v40  ;;  %v291_v53 = vadd.f32 %v3099_v52, %v268_v46  ;;  %v2103_v38 = vsel %vm2102_vm2, 1, %v2841_v2 }
  0xe7   :  { %v231_v42 = vpop.f32.mrf.mxu0  ;;  %v2358_v47 = vpop.f32.mrf.mxu1 }
  0xe8   :  { %v278_v43 = vadd.f32 %v276_v41, %v62_v39  ;;  %v2151_v39 = vld [vmem:[%s3974_s1 + $0x6] sm:$0x3f] }
  0xe9   :  { %v232_v44 = vpop.f32.mrf.mxu0  ;;  %v271_v48 = vpop.f32.mrf.mxu1  ;;  %v314_v42 = vunpack.c.l.bf16 %v2151_v39 }
  0xea   :  { %v2149_v45 = vmul.f32 -1.442695, %v278_v43 }
  0xeb   :  { %v2359_v49 = vpop.f32.mrf.mxu1 }
  0xec   :  { %2697 = vpow2.f32 %v2149_v45 }
  0xf9   :  { %v2698_v50 = vpop.eup %2697 }
  0xfa   :  { %v282_v51 = vadd.f32 1.0, %v2698_v50 }
  0xfc   :  { %2699 = vrcp.f32 %v282_v51 }
 0x109   :  { %v2700_v55 = vpop.eup %2699 }
 0x10a   :  { %v292_v56 = vmul.f32 %v2700_v55, %v291_v53  ;;  %v296_v58 = vrot.slane %v2700_v55, 4  ;;  %v315_v55 = vunpack.c.h.bf16 %v2151_v39 }
 0x10c   :  { %v293_v57 = vadd.f32 %v292_v56, %v63_v54  ;;  %v298_v59 = vsub.f32 1.0, %v296_v58  ;;  %v300_v62 = vmul.f32 %v296_v58, %v3017_v26 }
 0x10e   :  { %2701 = vtanh.f32 %v293_v57 }
 0x11b   :  { %v2702_v60 = vpop.eup %2701 }
 0x11c   :  { %v299_v61 = vmul.f32 %v2702_v60, %v298_v59 }
 0x11e   :  { %v301_v20 = vadd.f32 %v300_v62, %v299_v61 }
 0x120   :  { %v309_v22 = vsel %vm308_vm9, %v301_v20, 0.0  ;;  %v3104_v27 = vsel %vm308_vm9, %v301_v20, %v3017_v26  ;;  %v543_v26 = vsel %vm542_vm10, 1, %v2841_v2  ;;  %v426_v20 = vpop.permute.xlu0 %425 }
 0x121   :  { %310 = vst [vmem:[%s3976_s4] sm:$0xf] %v309_v22  ;;  %v316_v29 = vpack.c.bf16 %v3104_v27, %v3104_v27  ;;  %545 = vperm.xlu1 %2664, %v543_v26   ;;  %vm427_vm3 = vcmp.eq.s32.totalorder %v426_v20, 1 }
 0x123   :  { %350 = vmatmul.mubr.bf16.vlgmr.msra.gmra.mxu0 %v316_v29  ;;  %2377 = vmatmul.mubr.bf16.vlgmr.msra.gmra.mxu1 %v316_v29 }
 0x124   :  { %438 = vmatpush1.bf16.msra.mxu0 %v2884_v3  ;;  %2381 = vmatpush3.bf16.msra.mxu1 %v2929_v10 }
 0x125   :  { %439 = vmatprep.subr.bf16.mxu0 %v2893_v4  ;;  %2382 = vmatprep.subr.bf16.mxu1 %v2840_v1 }
 0x126   :  { %469 = vmatprep.mubr.bf16.mxu0 %v2841_v2  ;;  %2396 = vmatprep.mubr.msk.bf16.mxu1 %vm2842_vm0, %v2840_v1 }
 0x127   :  { %665 = vperm.xlu1 %2664, %v663_v30  }
 0x128   :  { %440 = vmatpush1.bf16.msra.mxu0 %v2900_v5  ;;  %2383 = vmatpush3.bf16.msra.mxu1 %v2941_v12 }
 0x129   :  { %441 = vmatprep.subr.bf16.mxu0 %v2906_v6  ;;  %2384 = vmatprep.subr.bf16.mxu1 %v2840_v1 }
 0x12b   :  { %905 = vperm.xlu1 %2664, %v903_v32  }
 0x12c   :  { %442 = vmatpush1.bf16.msra.mxu0 %v2912_v7  ;;  %2385 = vmatpush3.bf16.msra.mxu1 %v2960_v15 }
 0x12d   :  { %443 = vmatprep.subr.bf16.mxu0 %v2918_v8  ;;  %2386 = vmatprep.subr.bf16.mxu1 %v2840_v1 }
 0x12f   :  { %1145 = vperm.xlu1 %2664, %v1143_v34  }
 0x130   :  { %444 = vmatpush1.bf16.msra.mxu0 %v2924_v9  ;;  %2387 = vmatpush3.bf16.msra.mxu1 %v2986_v19 }
 0x131   :  { %445 = vmatprep.subr.bf16.mxu0 %v2935_v11  ;;  %2388 = vmatprep.subr.bf16.mxu1 %v2840_v1 }
 0x133   :  { %1385 = vperm.xlu1 %2664, %v1383_v35  }
 0x134   :  { %446 = vmatpush1.bf16.msra.mxu0 %v2948_v13  ;;  %2389 = vmatpush3.bf16.msra.mxu1 %v3008_v24 }
 0x135   :  { %447 = vmatprep.subr.bf16.mxu0 %v2954_v14  ;;  %2390 = vmatprep.subr.bf16.mxu1 %v2840_v1 }
 0x137   :  { %1625 = vperm.xlu1 %2664, %v1623_v36  }
 0x138   :  { %448 = vmatpush1.bf16.msra.mxu0 %v2967_v16  ;;  %2391 = vmatpush3.bf16.msra.mxu1 %v3025_v28 }
 0x139   :  { %449 = vmatprep.subr.bf16.mxu0 %v2978_v18  ;;  %2392 = vmatprep.subr.bf16.mxu1 %v2840_v1 }
 0x13b   :  { %1865 = vperm.xlu1 %2664, %v1863_v37  }
 0x13c   :  { %450 = vmatpush1.bf16.msra.mxu0 %v2994_v21  ;;  %2393 = vmatpush3.bf16.msra.mxu1 %v3038_v31 }
 0x13d   :  { %451 = vmatprep.subr.bf16.mxu0 %v3001_v23  ;;  %2394 = vmatprep.subr.bf16.mxu1 %v2840_v1 }
 0x13f   :  { %2105 = vperm.xlu1 %2664, %v2103_v38  }
 0x140   :  { %452 = vmatpush1.bf16.msra.mxu0 %v3015_v25  ;;  %2395 = vmatpush3.bf16.msra.mxu1 %v3050_v33 }
 0x141   :  { %557 = vmatprep.subr.bf16.mxu0 %v2876_v0  ;;  %2400 = vmatprep.subr.bf16.mxu1 %v2840_v1 }
 0x1e3   :  { %v351_v40 = vpop.f32.mrf.mxu0  ;;  %v392_v41 = vpop.f32.mrf.mxu1 }
 0x1e4   :  { %v409_v54 = vadd.f32 %v3099_v52, %v392_v41 }
 0x1e5   :  { %v353_v43 = vpop.f32.mrf.mxu0  ;;  %v2378_v44 = vpop.f32.mrf.mxu1 }
 0x1e6   :  { %v400_v45 = vcombine.low %v351_v40, %v353_v43 }
 0x1e7   :  { %v355_v46 = vpop.f32.mrf.mxu0  ;;  %v395_v47 = vpop.f32.mrf.mxu1 }
 0x1e8   :  { %v402_v48 = vadd.f32 %v400_v45, %v314_v42 }
 0x1e9   :  { %v356_v49 = vpop.f32.mrf.mxu0  ;;  %v2379_v50 = vpop.f32.mrf.mxu1 }
 0x1ea   :  { %v2152_v17 = vmul.f32 -1.442695, %v402_v48 }
 0x1ec   :  { %2703 = vpow2.f32 %v2152_v17 }
 0x1f9   :  { %v2704_v51 = vpop.eup %2703 }
 0x1fa   :  { %v406_v53 = vadd.f32 1.0, %v2704_v51 }
 0x1fc   :  { %2705 = vrcp.f32 %v406_v53 }
 0x209   :  { %v2706_v56 = vpop.eup %2705 }
 0x20a   :  { %v410_v57 = vmul.f32 %v2706_v56, %v409_v54  ;;  %v414_v59 = vrot.slane %v2706_v56, 4 }
 0x20c   :  { %v411_v58 = vadd.f32 %v410_v57, %v315_v55  ;;  %v416_v60 = vsub.f32 1.0, %v414_v59  ;;  %v418_v63 = vmul.f32 %v414_v59, %v3104_v27  ;;  %v546_v55 = vpop.permute.xlu1 %545 }
 0x20d   :  { %vm547_vm4 = vcmp.eq.s32.totalorder %v546_v55, 1  ;;  %v2160_v55 = vld [vmem:[%s3974_s1 + $0x18] sm:$0x3f] }
 0x20e   :  { %2707 = vtanh.f32 %v411_v58 }
 0x21b   :  { %v2708_v61 = vpop.eup %2707 }
 0x21c   :  { %v417_v62 = vmul.f32 %v2708_v61, %v416_v60 }
 0x21e   :  { %v419_v22 = vadd.f32 %v418_v63, %v417_v62  ;;  %v2157_v62 = vld [vmem:[%s3974_s1 + $0x12] sm:$0x3f] }
 0x220   :  { %v428_v29 = vsel %vm427_vm3, %v419_v22, 0.0  ;;  %v3168_v26 = vsel %vm427_vm3, %v419_v22, %v3104_v27  ;;  %v2154_v27 = vld [vmem:[%s3974_s1 + $0xc] sm:$0x3f]  ;;  %v554_v22 = vunpack.c.l.bf16 %v2157_v62 }
 0x221   :  { %2153 = vst [vmem:[%s3976_s4 + $0x4] sm:$0xf] %v428_v29  ;;  %v436_v30 = vpack.c.bf16 %v3168_v26, %v3168_v26  ;;  %v434_v35 = vunpack.c.l.bf16 %v2154_v27  ;;  %v435_v48 = vunpack.c.h.bf16 %v2154_v27 }
 0x223   :  { %470 = vmatmul.mubr.bf16.vlgmr.msra.gmra.mxu0 %v436_v30  ;;  %2397 = vmatmul.mubr.bf16.vlgmr.msra.gmra.mxu1 %v436_v30 }
 0x224   :  { %558 = vmatpush1.bf16.msra.mxu0 %v2884_v3  ;;  %2401 = vmatpush3.bf16.msra.mxu1 %v2929_v10 }
 0x225   :  { %559 = vmatprep.subr.bf16.mxu0 %v2893_v4  ;;  %2402 = vmatprep.subr.bf16.mxu1 %v2840_v1 }
 0x226   :  { %589 = vmatprep.mubr.bf16.mxu0 %v2841_v2  ;;  %2416 = vmatprep.mubr.msk.bf16.mxu1 %vm2842_vm0, %v2840_v1 }
 0x228   :  { %560 = vmatpush1.bf16.msra.mxu0 %v2900_v5  ;;  %2403 = vmatpush3.bf16.msra.mxu1 %v2941_v12 }
 0x229   :  { %561 = vmatprep.subr.bf16.mxu0 %v2906_v6  ;;  %2404 = vmatprep.subr.bf16.mxu1 %v2840_v1 }
 0x22c   :  { %562 = vmatpush1.bf16.msra.mxu0 %v2912_v7  ;;  %2405 = vmatpush3.bf16.msra.mxu1 %v2960_v15 }
 0x22d   :  { %563 = vmatprep.subr.bf16.mxu0 %v2918_v8  ;;  %2406 = vmatprep.subr.bf16.mxu1 %v2840_v1 }
 0x230   :  { %564 = vmatpush1.bf16.msra.mxu0 %v2924_v9  ;;  %2407 = vmatpush3.bf16.msra.mxu1 %v2986_v19 }
 0x231   :  { %565 = vmatprep.subr.bf16.mxu0 %v2935_v11  ;;  %2408 = vmatprep.subr.bf16.mxu1 %v2840_v1 }
 0x234   :  { %566 = vmatpush1.bf16.msra.mxu0 %v2948_v13  ;;  %2409 = vmatpush3.bf16.msra.mxu1 %v3008_v24 }
 0x235   :  { %567 = vmatprep.subr.bf16.mxu0 %v2954_v14  ;;  %2410 = vmatprep.subr.bf16.mxu1 %v2840_v1 }
 0x238   :  { %568 = vmatpush1.bf16.msra.mxu0 %v2967_v16  ;;  %2411 = vmatpush3.bf16.msra.mxu1 %v3025_v28 }
 0x239   :  { %569 = vmatprep.subr.bf16.mxu0 %v2978_v18  ;;  %2412 = vmatprep.subr.bf16.mxu1 %v2840_v1 }
 0x23c   :  { %570 = vmatpush1.bf16.msra.mxu0 %v2994_v21  ;;  %2413 = vmatpush3.bf16.msra.mxu1 %v3038_v31 }
 0x23d   :  { %571 = vmatprep.subr.bf16.mxu0 %v3001_v23  ;;  %2414 = vmatprep.subr.bf16.mxu1 %v2840_v1 }
 0x240   :  { %572 = vmatpush1.bf16.msra.mxu0 %v3015_v25  ;;  %2415 = vmatpush3.bf16.msra.mxu1 %v3050_v33 }
 0x241   :  { %677 = vmatprep.subr.bf16.mxu0 %v2876_v0  ;;  %2420 = vmatprep.subr.bf16.mxu1 %v2840_v1 }
 0x2e3   :  { %v471_v32 = vpop.f32.mrf.mxu0  ;;  %v512_v34 = vpop.f32.mrf.mxu1 }
 0x2e4   :  { %v529_v47 = vadd.f32 %v3099_v52, %v512_v34 }
 0x2e5   :  { %v473_v36 = vpop.f32.mrf.mxu0  ;;  %v2398_v37 = vpop.f32.mrf.mxu1 }
 0x2e6   :  { %v520_v38 = vcombine.low %v471_v32, %v473_v36 }
 0x2e7   :  { %v475_v39 = vpop.f32.mrf.mxu0  ;;  %v515_v40 = vpop.f32.mrf.mxu1 }
 0x2e8   :  { %v522_v41 = vadd.f32 %v520_v38, %v434_v35 }
 0x2e9   :  { %v476_v42 = vpop.f32.mrf.mxu0  ;;  %v2399_v43 = vpop.f32.mrf.mxu1 }
 0x2ea   :  { %v2155_v44 = vmul.f32 -1.442695, %v522_v41  ;;  %v555_v41 = vunpack.c.h.bf16 %v2157_v62 }
 0x2ec   :  { %2709 = vpow2.f32 %v2155_v44 }
 0x2f9   :  { %v2710_v45 = vpop.eup %2709 }
 0x2fa   :  { %v526_v46 = vadd.f32 1.0, %v2710_v45 }
 0x2fc   :  { %2711 = vrcp.f32 %v526_v46 }
 0x309   :  { %v2712_v49 = vpop.eup %2711 }
 0x30a   :  { %v530_v50 = vmul.f32 %v2712_v49, %v529_v47  ;;  %v534_v51 = vrot.slane %v2712_v49, 4 }
 0x30c   :  { %v531_v17 = vadd.f32 %v530_v50, %v435_v48  ;;  %v536_v53 = vsub.f32 1.0, %v534_v51  ;;  %v538_v57 = vmul.f32 %v534_v51, %v3168_v26  ;;  %v666_v50 = vpop.permute.xlu1 %665 }
 0x30d   :  { %vm667_vm5 = vcmp.eq.s32.totalorder %v666_v50, 1 }
 0x30e   :  { %2713 = vtanh.f32 %v531_v17 }
 0x31b   :  { %v2714_v54 = vpop.eup %2713 }
 0x31c   :  { %v537_v56 = vmul.f32 %v2714_v54, %v536_v53 }
 0x31e   :  { %v539_v58 = vadd.f32 %v538_v57, %v537_v56 }
 0x320   :  { %v548_v59 = vsel %vm547_vm4, %v539_v58, 0.0  ;;  %v3216_v60 = vsel %vm547_vm4, %v539_v58, %v3168_v26  ;;  %v674_v58 = vunpack.c.l.bf16 %v2160_v55 }
 0x321   :  { %2156 = vst [vmem:[%s3976_s4 + $0x8] sm:$0xf] %v548_v59  ;;  %v556_v61 = vpack.c.bf16 %v3216_v60, %v3216_v60 }
 0x323   :  { %590 = vmatmul.mubr.bf16.vlgmr.msra.gmra.mxu0 %v556_v61  ;;  %2417 = vmatmul.mubr.bf16.vlgmr.msra.gmra.mxu1 %v556_v61 }
 0x324   :  { %678 = vmatpush1.bf16.msra.mxu0 %v2884_v3  ;;  %2421 = vmatpush3.bf16.msra.mxu1 %v2929_v10 }
 0x325   :  { %679 = vmatprep.subr.bf16.mxu0 %v2893_v4  ;;  %2422 = vmatprep.subr.bf16.mxu1 %v2840_v1 }
 0x326   :  { %709 = vmatprep.mubr.bf16.mxu0 %v2841_v2  ;;  %2436 = vmatprep.mubr.msk.bf16.mxu1 %vm2842_vm0, %v2840_v1 }
 0x328   :  { %680 = vmatpush1.bf16.msra.mxu0 %v2900_v5  ;;  %2423 = vmatpush3.bf16.msra.mxu1 %v2941_v12 }
 0x329   :  { %681 = vmatprep.subr.bf16.mxu0 %v2906_v6  ;;  %2424 = vmatprep.subr.bf16.mxu1 %v2840_v1 }
 0x32c   :  { %682 = vmatpush1.bf16.msra.mxu0 %v2912_v7  ;;  %2425 = vmatpush3.bf16.msra.mxu1 %v2960_v15 }
 0x32d   :  { %683 = vmatprep.subr.bf16.mxu0 %v2918_v8  ;;  %2426 = vmatprep.subr.bf16.mxu1 %v2840_v1 }
 0x330   :  { %684 = vmatpush1.bf16.msra.mxu0 %v2924_v9  ;;  %2427 = vmatpush3.bf16.msra.mxu1 %v2986_v19 }
 0x331   :  { %685 = vmatprep.subr.bf16.mxu0 %v2935_v11  ;;  %2428 = vmatprep.subr.bf16.mxu1 %v2840_v1 }
 0x334   :  { %686 = vmatpush1.bf16.msra.mxu0 %v2948_v13  ;;  %2429 = vmatpush3.bf16.msra.mxu1 %v3008_v24 }
 0x335   :  { %687 = vmatprep.subr.bf16.mxu0 %v2954_v14  ;;  %2430 = vmatprep.subr.bf16.mxu1 %v2840_v1 }
 0x338   :  { %688 = vmatpush1.bf16.msra.mxu0 %v2967_v16  ;;  %2431 = vmatpush3.bf16.msra.mxu1 %v3025_v28 }
 0x339   :  { %689 = vmatprep.subr.bf16.mxu0 %v2978_v18  ;;  %2432 = vmatprep.subr.bf16.mxu1 %v2840_v1 }
 0x33c   :  { %690 = vmatpush1.bf16.msra.mxu0 %v2994_v21  ;;  %2433 = vmatpush3.bf16.msra.mxu1 %v3038_v31 }
 0x33d   :  { %691 = vmatprep.subr.bf16.mxu0 %v3001_v23  ;;  %2434 = vmatprep.subr.bf16.mxu1 %v2840_v1 }
 0x340   :  { %692 = vmatpush1.bf16.msra.mxu0 %v3015_v25  ;;  %2435 = vmatpush3.bf16.msra.mxu1 %v3050_v33 }
 0x341   :  { %797 = vmatprep.subr.bf16.mxu0 %v2876_v0  ;;  %2440 = vmatprep.subr.bf16.mxu1 %v2840_v1 }
 0x3e3   :  { %v591_v63 = vpop.f32.mrf.mxu0  ;;  %v632_v20 = vpop.f32.mrf.mxu1 }
 0x3e4   :  { %v649_v40 = vadd.f32 %v3099_v52, %v632_v20 }
 0x3e5   :  { %v593_v29 = vpop.f32.mrf.mxu0  ;;  %v2418_v26 = vpop.f32.mrf.mxu1 }
 0x3e6   :  { %v640_v30 = vcombine.low %v591_v63, %v593_v29 }
 0x3e7   :  { %v595_v27 = vpop.f32.mrf.mxu0  ;;  %v635_v32 = vpop.f32.mrf.mxu1 }
 0x3e8   :  { %v642_v34 = vadd.f32 %v640_v30, %v554_v22  ;;  %v675_v32 = vunpack.c.h.bf16 %v2160_v55 }
 0x3e9   :  { %v596_v35 = vpop.f32.mrf.mxu0  ;;  %v2419_v36 = vpop.f32.mrf.mxu1 }
 0x3ea   :  { %v2158_v37 = vmul.f32 -1.442695, %v642_v34 }
 0x3ec   :  { %2715 = vpow2.f32 %v2158_v37 }
 0x3f9   :  { %v2716_v38 = vpop.eup %2715 }
 0x3fa   :  { %v646_v39 = vadd.f32 1.0, %v2716_v38 }
 0x3fc   :  { %2717 = vrcp.f32 %v646_v39 }
 0x409   :  { %v2718_v42 = vpop.eup %2717 }
 0x40a   :  { %v650_v43 = vmul.f32 %v2718_v42, %v649_v40  ;;  %v654_v45 = vrot.slane %v2718_v42, 4  ;;  %v786_v42 = vpop.permute.xlu0 %785 }
 0x40b   :  { %vm787_vm6 = vcmp.eq.s32.totalorder %v786_v42, 1 }
 0x40c   :  { %v651_v44 = vadd.f32 %v650_v43, %v555_v41  ;;  %v656_v46 = vsub.f32 1.0, %v654_v45  ;;  %v658_v49 = vmul.f32 %v654_v45, %v3216_v60 }
 0x40e   :  { %2719 = vtanh.f32 %v651_v44 }
 0x41b   :  { %v2720_v47 = vpop.eup %2719 }
 0x41c   :  { %v657_v48 = vmul.f32 %v2720_v47, %v656_v46 }
 0x41e   :  { %v659_v17 = vadd.f32 %v658_v49, %v657_v48 }
 0x420   :  { %v668_v51 = vsel %vm667_vm5, %v659_v17, 0.0  ;;  %v3264_v53 = vsel %vm667_vm5, %v659_v17, %v3216_v60 }
 0x421   :  { %2159 = vst [vmem:[%s3976_s4 + $0xc] sm:$0xf] %v668_v51  ;;  %v676_v54 = vpack.c.bf16 %v3264_v53, %v3264_v53 }
 0x423   :  { %710 = vmatmul.mubr.bf16.vlgmr.msra.gmra.mxu0 %v676_v54  ;;  %2437 = vmatmul.mubr.bf16.vlgmr.msra.gmra.mxu1 %v676_v54 }
 0x424   :  { %798 = vmatpush1.bf16.msra.mxu0 %v2884_v3  ;;  %2441 = vmatpush3.bf16.msra.mxu1 %v2929_v10 }
 0x425   :  { %799 = vmatprep.subr.bf16.mxu0 %v2893_v4  ;;  %2442 = vmatprep.subr.bf16.mxu1 %v2840_v1 }
 0x426   :  { %829 = vmatprep.mubr.bf16.mxu0 %v2841_v2  ;;  %2456 = vmatprep.mubr.msk.bf16.mxu1 %vm2842_vm0, %v2840_v1 }
 0x428   :  { %800 = vmatpush1.bf16.msra.mxu0 %v2900_v5  ;;  %2443 = vmatpush3.bf16.msra.mxu1 %v2941_v12 }
 0x429   :  { %801 = vmatprep.subr.bf16.mxu0 %v2906_v6  ;;  %2444 = vmatprep.subr.bf16.mxu1 %v2840_v1 }
 0x42c   :  { %802 = vmatpush1.bf16.msra.mxu0 %v2912_v7  ;;  %2445 = vmatpush3.bf16.msra.mxu1 %v2960_v15 }
 0x42d   :  { %803 = vmatprep.subr.bf16.mxu0 %v2918_v8  ;;  %2446 = vmatprep.subr.bf16.mxu1 %v2840_v1 }
 0x430   :  { %804 = vmatpush1.bf16.msra.mxu0 %v2924_v9  ;;  %2447 = vmatpush3.bf16.msra.mxu1 %v2986_v19 }
 0x431   :  { %805 = vmatprep.subr.bf16.mxu0 %v2935_v11  ;;  %2448 = vmatprep.subr.bf16.mxu1 %v2840_v1 }
 0x434   :  { %806 = vmatpush1.bf16.msra.mxu0 %v2948_v13  ;;  %2449 = vmatpush3.bf16.msra.mxu1 %v3008_v24 }
 0x435   :  { %807 = vmatprep.subr.bf16.mxu0 %v2954_v14  ;;  %2450 = vmatprep.subr.bf16.mxu1 %v2840_v1 }
 0x438   :  { %808 = vmatpush1.bf16.msra.mxu0 %v2967_v16  ;;  %2451 = vmatpush3.bf16.msra.mxu1 %v3025_v28 }
 0x439   :  { %809 = vmatprep.subr.bf16.mxu0 %v2978_v18  ;;  %2452 = vmatprep.subr.bf16.mxu1 %v2840_v1 }
 0x43c   :  { %810 = vmatpush1.bf16.msra.mxu0 %v2994_v21  ;;  %2453 = vmatpush3.bf16.msra.mxu1 %v3038_v31 }
 0x43d   :  { %811 = vmatprep.subr.bf16.mxu0 %v3001_v23  ;;  %2454 = vmatprep.subr.bf16.mxu1 %v2840_v1 }
 0x440   :  { %812 = vmatpush1.bf16.msra.mxu0 %v3015_v25  ;;  %2455 = vmatpush3.bf16.msra.mxu1 %v3050_v33 }
 0x441   :  { %917 = vmatprep.subr.bf16.mxu0 %v2876_v0  ;;  %2460 = vmatprep.subr.bf16.mxu1 %v2840_v1 }
 0x4e3   :  { %v711_v56 = vpop.f32.mrf.mxu0  ;;  %v752_v57 = vpop.f32.mrf.mxu1 }
 0x4e4   :  { %v769_v27 = vadd.f32 %v3099_v52, %v752_v57 }
 0x4e5   :  { %v713_v59 = vpop.f32.mrf.mxu0  ;;  %v2438_v60 = vpop.f32.mrf.mxu1 }
 0x4e6   :  { %v760_v61 = vcombine.low %v711_v56, %v713_v59  ;;  %v3381_v59 = vld [vmem:[%s3972_s2 + $0xb0] ss:$12 sps:$4 sm:$0xff]   ;;  %v3387_v60 = vld [vmem:[%s3972_s2 + $0x94] ss:$12 sps:$4 sm:$0xff]  }
 0x4e7   :  { %v715_v62 = vpop.f32.mrf.mxu0  ;;  %v755_v63 = vpop.f32.mrf.mxu1 }
 0x4e8   :  { %v762_v20 = vadd.f32 %v760_v61, %v674_v58  ;;  %v3375_v58 = vld [vmem:[%s3972_s2 + $0xa8] ss:$12 sps:$4 sm:$0xff]   ;;  %v3397_v61 = vld [vmem:[%s3972_s2 + $0x90] ss:$12 sps:$4 sm:$0xff]   ;;  %v3403_v62 = vld [vmem:[%s3972_s2 + $0x98] ss:$12 sps:$4 sm:$0xff]  }
 0x4e9   :  { %v716_v22 = vpop.f32.mrf.mxu0  ;;  %v2439_v29 = vpop.f32.mrf.mxu1  ;;  %v3409_v63 = vld [vmem:[%s3972_s2 + $0x7c] ss:$12 sps:$4 sm:$0xff]  }
 0x4ea   :  { %v2161_v26 = vmul.f32 -1.442695, %v762_v20  ;;  %v3416_v20 = vld [vmem:[%s3972_s2 + $0x78] ss:$12 sps:$4 sm:$0xff]   ;;  %v3422_v22 = vld [vmem:[%s3972_s2 + $0x80] ss:$12 sps:$4 sm:$0xff]  }
 0x4eb   :  { %v3428_v29 = vld [vmem:[%s3972_s2 + $0x64] ss:$12 sps:$4 sm:$0xff]  }
 0x4ec   :  { %2721 = vpow2.f32 %v2161_v26  ;;  %v3435_v26 = vld [vmem:[%s3972_s2 + $0x60] ss:$12 sps:$4 sm:$0xff]  }
 0x4f9   :  { %v2722_v0 = vpop.eup %2721 }
 0x4fa   :  { %v766_v30 = vadd.f32 1.0, %v2722_v0  ;;  %v3441_v0 = vld [vmem:[%s3972_s2 + $0x68] ss:$12 sps:$4 sm:$0xff]  }
 0x4fc   :  { %2723 = vrcp.f32 %v766_v30  ;;  %v3447_v30 = vld [vmem:[%s3972_s2 + $0x4c] ss:$12 sps:$4 sm:$0xff]  }
 0x509   :  { %v2724_v34 = vpop.eup %2723 }
 0x50a   :  { %v770_v35 = vmul.f32 %v2724_v34, %v769_v27  ;;  %v774_v37 = vrot.slane %v2724_v34, 4  ;;  %v3454_v27 = vld [vmem:[%s3972_s2 + $0x48] ss:$12 sps:$4 sm:$0xff]  }
 0x50b   :  { %v3466_v34 = vld [vmem:[%s3972_s2 + $0x34] ss:$12 sps:$4 sm:$0xff]  }
 0x50c   :  { %v771_v36 = vadd.f32 %v770_v35, %v675_v32  ;;  %v776_v38 = vsub.f32 1.0, %v774_v37  ;;  %v778_v41 = vmul.f32 %v774_v37, %v3264_v53  ;;  %v3460_v32 = vld [vmem:[%s3972_s2 + $0x50] ss:$12 sps:$4 sm:$0xff]   ;;  %v3487_v37 = vld [vmem:[%s3972_s2 + $0x18] ss:$12 sps:$4 sm:$0xff]  }
 0x50d   :  { %v3473_v35 = vld [vmem:[%s3972_s2 + $0x30] ss:$12 sps:$4 sm:$0xff]  }
 0x50e   :  { %2725 = vtanh.f32 %v771_v36  ;;  %v3480_v36 = vld [vmem:[%s3972_s2 + $0x1c] ss:$12 sps:$4 sm:$0xff]  }
 0x51b   :  { %v2726_v39 = vpop.eup %2725 }
 0x51c   :  { %v777_v40 = vmul.f32 %v2726_v39, %v776_v38  ;;  %v3501_v38 = vld [vmem:[%s3972_s2] ss:$12 sps:$4 sm:$0xff]  }
 0x51e   :  { %v779_v43 = vadd.f32 %v778_v41, %v777_v40 }
 0x520   :  { %v788_v44 = vsel %vm787_vm6, %v779_v43, 0.0  ;;  %v3312_v45 = vsel %vm787_vm6, %v779_v43, %v3264_v53  ;;  %v906_v53 = vpop.permute.xlu1 %905 }
 0x521   :  { %2162 = vst [vmem:[%s3976_s4 + $0x10] sm:$0xf] %v788_v44  ;;  %v796_v46 = vpack.c.bf16 %v3312_v45, %v3312_v45  ;;  %vm907_vm7 = vcmp.eq.s32.totalorder %v906_v53, 1 }
 0x523   :  { %830 = vmatmul.mubr.bf16.vlgmr.msra.gmra.mxu0 %v796_v46  ;;  %2457 = vmatmul.mubr.bf16.vlgmr.msra.gmra.mxu1 %v796_v46 }
 0x524   :  { %918 = vmatpush1.bf16.msra.mxu0 %v2884_v3  ;;  %2461 = vmatpush3.bf16.msra.mxu1 %v2929_v10  ;;  %v3355_v3 = vld [vmem:[%s3972_s2 + $0xac] ss:$12 sps:$4 sm:$0xff]  }
 0x525   :  { %919 = vmatprep.subr.bf16.mxu0 %v2893_v4  ;;  %2462 = vmatprep.subr.bf16.mxu1 %v2840_v1  ;;  %v2163_v4 = vld [vmem:[%s3974_s1 + $0x1e] sm:$0x3f] }
 0x526   :  { %949 = vmatprep.mubr.bf16.mxu0 %v2841_v2  ;;  %2476 = vmatprep.mubr.msk.bf16.mxu1 %vm2842_vm0, %v2840_v1 }
 0x528   :  { %920 = vmatpush1.bf16.msra.mxu0 %v2900_v5  ;;  %2463 = vmatpush3.bf16.msra.mxu1 %v2941_v12 }
 0x529   :  { %921 = vmatprep.subr.bf16.mxu0 %v2906_v6  ;;  %2464 = vmatprep.subr.bf16.mxu1 %v2840_v1 }
 0x52c   :  { %922 = vmatpush1.bf16.msra.mxu0 %v2912_v7  ;;  %2465 = vmatpush3.bf16.msra.mxu1 %v2960_v15  ;;  %v794_v7 = vunpack.c.l.bf16 %v2163_v4 }
 0x52d   :  { %923 = vmatprep.subr.bf16.mxu0 %v2918_v8  ;;  %2466 = vmatprep.subr.bf16.mxu1 %v2840_v1 }
 0x530   :  { %924 = vmatpush1.bf16.msra.mxu0 %v2924_v9  ;;  %2467 = vmatpush3.bf16.msra.mxu1 %v2986_v19 }
 0x531   :  { %925 = vmatprep.subr.bf16.mxu0 %v2935_v11  ;;  %2468 = vmatprep.subr.bf16.mxu1 %v2840_v1 }
 0x534   :  { %926 = vmatpush1.bf16.msra.mxu0 %v2948_v13  ;;  %2469 = vmatpush3.bf16.msra.mxu1 %v3008_v24 }
 0x535   :  { %927 = vmatprep.subr.bf16.mxu0 %v2954_v14  ;;  %2470 = vmatprep.subr.bf16.mxu1 %v2840_v1 }
 0x538   :  { %928 = vmatpush1.bf16.msra.mxu0 %v2967_v16  ;;  %2471 = vmatpush3.bf16.msra.mxu1 %v3025_v28 }
 0x539   :  { %929 = vmatprep.subr.bf16.mxu0 %v2978_v18  ;;  %2472 = vmatprep.subr.bf16.mxu1 %v2840_v1 }
 0x53c   :  { %930 = vmatpush1.bf16.msra.mxu0 %v2994_v21  ;;  %2473 = vmatpush3.bf16.msra.mxu1 %v3038_v31 }
 0x53d   :  { %931 = vmatprep.subr.bf16.mxu0 %v3001_v23  ;;  %2474 = vmatprep.subr.bf16.mxu1 %v2840_v1  ;;  %v795_v23 = vunpack.c.h.bf16 %v2163_v4 }
 0x540   :  { %932 = vmatpush1.bf16.msra.mxu0 %v3015_v25  ;;  %2475 = vmatpush3.bf16.msra.mxu1 %v3050_v33 }
 0x541   :  { %1037 = vmatprep.subr.bf16.mxu0 %v3355_v3  ;;  %2480 = vmatprep.subr.bf16.mxu1 %v2840_v1 }
 0x5e3   :  { %v831_v5 = vpop.f32.mrf.mxu0  ;;  %v872_v6 = vpop.f32.mrf.mxu1 }
 0x5e4   :  { %v889_v21 = vadd.f32 %v3099_v52, %v872_v6 }
 0x5e5   :  { %v833_v8 = vpop.f32.mrf.mxu0  ;;  %v2458_v9 = vpop.f32.mrf.mxu1 }
 0x5e6   :  { %v880_v10 = vcombine.low %v831_v5, %v833_v8 }
 0x5e7   :  { %v835_v11 = vpop.f32.mrf.mxu0  ;;  %v875_v12 = vpop.f32.mrf.mxu1 }
 0x5e8   :  { %v882_v13 = vadd.f32 %v880_v10, %v794_v7 }
 0x5e9   :  { %v836_v14 = vpop.f32.mrf.mxu0  ;;  %v2459_v15 = vpop.f32.mrf.mxu1 }
 0x5ea   :  { %v2164_v16 = vmul.f32 -1.442695, %v882_v13 }
 0x5ec   :  { %2727 = vpow2.f32 %v2164_v16 }
 0x5f9   :  { %v2728_v18 = vpop.eup %2727 }
 0x5fa   :  { %v886_v19 = vadd.f32 1.0, %v2728_v18 }
 0x5fc   :  { %2729 = vrcp.f32 %v886_v19 }
 0x609   :  { %v2730_v24 = vpop.eup %2729 }
 0x60a   :  { %v890_v25 = vmul.f32 %v2730_v24, %v889_v21  ;;  %v894_v48 = vrot.slane %v2730_v24, 4  ;;  %v1026_v21 = vpop.permute.xlu0 %1025 }
 0x60b   :  { %vm1027_vm8 = vcmp.eq.s32.totalorder %v1026_v21, 1 }
 0x60c   :  { %v891_v47 = vadd.f32 %v890_v25, %v795_v23  ;;  %v896_v49 = vsub.f32 1.0, %v894_v48  ;;  %v898_v51 = vmul.f32 %v894_v48, %v3312_v45  ;;  %v3556_v48 = vld [vmem:[%s3972_s2 + $0x20] ss:$12 sps:$4 sm:$0xff]  }
 0x60e   :  { %2731 = vtanh.f32 %v891_v47  ;;  %v3547_v47 = vld [vmem:[%s3972_s2 + $0x38] ss:$12 sps:$4 sm:$0xff]  }
 0x61b   :  { %v2732_v50 = vpop.eup %2731 }
 0x61c   :  { %v897_v17 = vmul.f32 %v2732_v50, %v896_v49  ;;  %v3565_v49 = vld [vmem:[%s3972_s2 + $0x8] ss:$12 sps:$4 sm:$0xff]  }
 0x61d   :  { %v2169_v50 = vld [vmem:[%s3974_s1 + $0x2a] sm:$0x3f] }
 0x61e   :  { %v899_v54 = vadd.f32 %v898_v51, %v897_v17  ;;  %v1034_v53 = vunpack.c.l.bf16 %v2169_v50 }
 0x620   :  { %v908_v55 = vsel %vm907_vm7, %v899_v54, 0.0  ;;  %v3365_v56 = vsel %vm907_vm7, %v899_v54, %v3312_v45 }
 0x621   :  { %2165 = vst [vmem:[%s3976_s4 + $0x14] sm:$0xf] %v908_v55  ;;  %v916_v57 = vpack.c.bf16 %v3365_v56, %v3365_v56 }
 0x623   :  { %950 = vmatmul.mubr.bf16.vlgmr.msra.gmra.mxu0 %v916_v57  ;;  %2477 = vmatmul.mubr.bf16.vlgmr.msra.gmra.mxu1 %v916_v57 }
 0x624   :  { %1038 = vmatpush1.bf16.msra.mxu0 %v3375_v58  ;;  %2481 = vmatpush3.bf16.msra.mxu1 %v3381_v59 }
 0x625   :  { %1039 = vmatprep.subr.bf16.mxu0 %v3387_v60  ;;  %2482 = vmatprep.subr.bf16.mxu1 %v2840_v1 }
 0x626   :  { %1069 = vmatprep.mubr.bf16.mxu0 %v2841_v2  ;;  %2496 = vmatprep.mubr.msk.bf16.mxu1 %vm2842_vm0, %v2840_v1 }
 0x628   :  { %1040 = vmatpush1.bf16.msra.mxu0 %v3397_v61  ;;  %2483 = vmatpush3.bf16.msra.mxu1 %v3403_v62 }
 0x629   :  { %1041 = vmatprep.subr.bf16.mxu0 %v3409_v63  ;;  %2484 = vmatprep.subr.bf16.mxu1 %v2840_v1 }
 0x62c   :  { %1042 = vmatpush1.bf16.msra.mxu0 %v3416_v20  ;;  %2485 = vmatpush3.bf16.msra.mxu1 %v3422_v22 }
 0x62d   :  { %1043 = vmatprep.subr.bf16.mxu0 %v3428_v29  ;;  %2486 = vmatprep.subr.bf16.mxu1 %v2840_v1 }
 0x630   :  { %1044 = vmatpush1.bf16.msra.mxu0 %v3435_v26  ;;  %2487 = vmatpush3.bf16.msra.mxu1 %v3441_v0 }
 0x631   :  { %1045 = vmatprep.subr.bf16.mxu0 %v3447_v30  ;;  %2488 = vmatprep.subr.bf16.mxu1 %v2840_v1 }
 0x634   :  { %1046 = vmatpush1.bf16.msra.mxu0 %v3454_v27  ;;  %2489 = vmatpush3.bf16.msra.mxu1 %v3460_v32 }
 0x635   :  { %1047 = vmatprep.subr.bf16.mxu0 %v3466_v34  ;;  %2490 = vmatprep.subr.bf16.mxu1 %v2840_v1 }
 0x638   :  { %1048 = vmatpush1.bf16.msra.mxu0 %v3473_v35  ;;  %2491 = vmatpush3.bf16.msra.mxu1 %v3025_v28  ;;  %v3494_v28 = vld [vmem:[%s3972_s2 + $0x4] ss:$12 sps:$4 sm:$0xff]  }
 0x639   :  { %1049 = vmatprep.subr.bf16.mxu0 %v3480_v36  ;;  %2492 = vmatprep.subr.bf16.mxu1 %v2840_v1 }
 0x63c   :  { %1050 = vmatpush1.bf16.msra.mxu0 %v3487_v37  ;;  %2493 = vmatpush3.bf16.msra.mxu1 %v3038_v31  ;;  %v2166_v31 = vld [vmem:[%s3974_s1 + $0x24] sm:$0x3f] }
 0x63d   :  { %1051 = vmatprep.subr.bf16.mxu0 %v3494_v28  ;;  %2494 = vmatprep.subr.bf16.mxu1 %v2840_v1  ;;  %v914_v41 = vunpack.c.l.bf16 %v2166_v31  ;;  %v915_v10 = vunpack.c.h.bf16 %v2166_v31 }
 0x640   :  { %1052 = vmatpush1.bf16.msra.mxu0 %v3501_v38  ;;  %2495 = vmatpush3.bf16.msra.mxu1 %v3050_v33 }
 0x641   :  { %1157 = vmatprep.subr.bf16.mxu0 %v3355_v3  ;;  %2500 = vmatprep.subr.bf16.mxu1 %v2840_v1 }
 0x6e3   :  { %v951_v39 = vpop.f32.mrf.mxu0  ;;  %v992_v40 = vpop.f32.mrf.mxu1 }
 0x6e4   :  { %v1009_v9 = vadd.f32 %v3099_v52, %v992_v40 }
 0x6e5   :  { %v953_v42 = vpop.f32.mrf.mxu0  ;;  %v2478_v43 = vpop.f32.mrf.mxu1 }
 0x6e6   :  { %v1000_v44 = vcombine.low %v951_v39, %v953_v42 }
 0x6e7   :  { %v955_v45 = vpop.f32.mrf.mxu0  ;;  %v995_v46 = vpop.f32.mrf.mxu1 }
 0x6e8   :  { %v1002_v4 = vadd.f32 %v1000_v44, %v914_v41  ;;  %v3576_v45 = vld [vmem:[%s3975_s3] ss:$0 sm:$0xff] }
 0x6e9   :  { %v956_v5 = vpop.f32.mrf.mxu0  ;;  %v2479_v6 = vpop.f32.mrf.mxu1 }
 0x6ea   :  { %v2167_v33 = vmul.f32 -1.442695, %v1002_v4  ;;  %v1035_v4 = vunpack.c.h.bf16 %v2169_v50 }
 0x6ec   :  { %2733 = vpow2.f32 %v2167_v33 }
 0x6f9   :  { %v2734_v7 = vpop.eup %2733 }
 0x6fa   :  { %v1006_v8 = vadd.f32 1.0, %v2734_v7 }
 0x6fc   :  { %2735 = vrcp.f32 %v1006_v8 }
 0x709   :  { %v2736_v11 = vpop.eup %2735 }
 0x70a   :  { %v1010_v12 = vmul.f32 %v2736_v11, %v1009_v9  ;;  %v1014_v14 = vrot.slane %v2736_v11, 4 }
 0x70c   :  { %v1011_v13 = vadd.f32 %v1010_v12, %v915_v10  ;;  %v1016_v15 = vsub.f32 1.0, %v1014_v14  ;;  %v1018_v19 = vmul.f32 %v1014_v14, %v3365_v56  ;;  %v1146_v12 = vpop.permute.xlu1 %1145 }
 0x70d   :  { %vm1147_vm9 = vcmp.eq.s32.totalorder %v1146_v12, 1 }
 0x70e   :  { %2737 = vtanh.f32 %v1011_v13 }
 0x71b   :  { %v2738_v16 = vpop.eup %2737 }
 0x71c   :  { %v1017_v18 = vmul.f32 %v2738_v16, %v1016_v15 }
 0x71e   :  { %v1019_v23 = vadd.f32 %v1018_v19, %v1017_v18  ;;  %v2172_v18 = vld [vmem:[%s3974_s1 + $0x30] sm:$0x3f] }
 0x720   :  { %v1028_v24 = vsel %vm1027_vm8, %v1019_v23, 0.0  ;;  %v3513_v25 = vsel %vm1027_vm8, %v1019_v23, %v3365_v56  ;;  %v1154_v23 = vunpack.c.l.bf16 %v2172_v18 }
 0x721   :  { %2168 = vst [vmem:[%s3976_s4 + $0x18] sm:$0xf] %v1028_v24  ;;  %v1036_v52 = vpack.c.bf16 %v3513_v25, %v3513_v25 }
 0x723   :  { %1070 = vmatmul.mubr.bf16.vlgmr.msra.gmra.mxu0 %v1036_v52  ;;  %2497 = vmatmul.mubr.bf16.vlgmr.msra.gmra.mxu1 %v1036_v52 }
 0x724   :  { %1158 = vmatpush1.bf16.msra.mxu0 %v3375_v58  ;;  %2501 = vmatpush3.bf16.msra.mxu1 %v3381_v59 }
 0x725   :  { %1159 = vmatprep.subr.bf16.mxu0 %v3387_v60  ;;  %2502 = vmatprep.subr.bf16.mxu1 %v2840_v1 }
 0x726   :  { %1189 = vmatprep.mubr.bf16.mxu0 %v2841_v2  ;;  %2516 = vmatprep.mubr.msk.bf16.mxu1 %vm2842_vm0, %v2840_v1 }
 0x728   :  { %1160 = vmatpush1.bf16.msra.mxu0 %v3397_v61  ;;  %2503 = vmatpush3.bf16.msra.mxu1 %v3403_v62 }
 0x729   :  { %1161 = vmatprep.subr.bf16.mxu0 %v3409_v63  ;;  %2504 = vmatprep.subr.bf16.mxu1 %v2840_v1 }
 0x72c   :  { %1162 = vmatpush1.bf16.msra.mxu0 %v3416_v20  ;;  %2505 = vmatpush3.bf16.msra.mxu1 %v3422_v22 }
 0x72d   :  { %1163 = vmatprep.subr.bf16.mxu0 %v3428_v29  ;;  %2506 = vmatprep.subr.bf16.mxu1 %v2840_v1 }
 0x730   :  { %1164 = vmatpush1.bf16.msra.mxu0 %v3435_v26  ;;  %2507 = vmatpush3.bf16.msra.mxu1 %v3441_v0 }
 0x731   :  { %1165 = vmatprep.subr.bf16.mxu0 %v3447_v30  ;;  %2508 = vmatprep.subr.bf16.mxu1 %v2840_v1 }
 0x734   :  { %1166 = vmatpush1.bf16.msra.mxu0 %v3454_v27  ;;  %2509 = vmatpush3.bf16.msra.mxu1 %v3460_v32 }
 0x735   :  { %1167 = vmatprep.subr.bf16.mxu0 %v3466_v34  ;;  %2510 = vmatprep.subr.bf16.mxu1 %v2840_v1 }
 0x738   :  { %1168 = vmatpush1.bf16.msra.mxu0 %v3473_v35  ;;  %2511 = vmatpush3.bf16.msra.mxu1 %v3547_v47 }
 0x739   :  { %1169 = vmatprep.subr.bf16.mxu0 %v3480_v36  ;;  %2512 = vmatprep.subr.bf16.mxu1 %v2840_v1 }
 0x73c   :  { %1170 = vmatpush1.bf16.msra.mxu0 %v3487_v37  ;;  %2513 = vmatpush3.bf16.msra.mxu1 %v3556_v48 }
 0x73d   :  { %1171 = vmatprep.subr.bf16.mxu0 %v3494_v28  ;;  %2514 = vmatprep.subr.bf16.mxu1 %v2840_v1 }
 0x740   :  { %1172 = vmatpush1.bf16.msra.mxu0 %v3501_v38  ;;  %2515 = vmatpush3.bf16.msra.mxu1 %v3565_v49 }
 0x741   :  { %1277 = vmatprep.subr.bf16.mxu0 %v3355_v3  ;;  %2520 = vmatprep.subr.bf16.mxu1 %v2840_v1 }
 0x7e3   :  { %v1071_v17 = vpop.f32.mrf.mxu0  ;;  %v1112_v51 = vpop.f32.mrf.mxu1 }
 0x7e4   :  { %v1129_v46 = vadd.f32 %v3576_v45, %v1112_v51 }
 0x7e5   :  { %v1073_v54 = vpop.f32.mrf.mxu0  ;;  %v2498_v55 = vpop.f32.mrf.mxu1 }
 0x7e6   :  { %v1120_v56 = vcombine.low %v1071_v17, %v1073_v54 }
 0x7e7   :  { %v1075_v57 = vpop.f32.mrf.mxu0  ;;  %v1115_v31 = vpop.f32.mrf.mxu1 }
 0x7e8   :  { %v1122_v39 = vadd.f32 %v1120_v56, %v1034_v53 }
 0x7e9   :  { %v1076_v40 = vpop.f32.mrf.mxu0  ;;  %v2499_v41 = vpop.f32.mrf.mxu1 }
 0x7ea   :  { %v2170_v42 = vmul.f32 -1.442695, %v1122_v39  ;;  %v1155_v39 = vunpack.c.h.bf16 %v2172_v18 }
 0x7ec   :  { %2739 = vpow2.f32 %v2170_v42 }
 0x7f9   :  { %v2740_v43 = vpop.eup %2739 }
 0x7fa   :  { %v1126_v44 = vadd.f32 1.0, %v2740_v43 }
 0x7fc   :  { %2741 = vrcp.f32 %v1126_v44 }
 0x809   :  { %v2742_v5 = vpop.eup %2741 }
 0x80a   :  { %v1130_v6 = vmul.f32 %v2742_v5, %v1129_v46  ;;  %v1134_v7 = vrot.slane %v2742_v5, 4 }
 0x80c   :  { %v1131_v33 = vadd.f32 %v1130_v6, %v1035_v4  ;;  %v1136_v8 = vsub.f32 1.0, %v1134_v7  ;;  %v1138_v11 = vmul.f32 %v1134_v7, %v3513_v25  ;;  %v1266_v6 = vpop.permute.xlu0 %1265 }
 0x80d   :  { %vm1267_vm10 = vcmp.eq.s32.totalorder %v1266_v6, 1 }
 0x80e   :  { %2743 = vtanh.f32 %v1131_v33 }
 0x81b   :  { %v2744_v9 = vpop.eup %2743 }
 0x81c   :  { %v1137_v10 = vmul.f32 %v2744_v9, %v1136_v8 }
 0x81e   :  { %v1139_v13 = vadd.f32 %v1138_v11, %v1137_v10  ;;  %v2175_v10 = vld [vmem:[%s3974_s1 + $0x36] sm:$0x3f] }
 0x820   :  { %v1148_v14 = vsel %vm1147_vm9, %v1139_v13, 0.0  ;;  %v3581_v15 = vsel %vm1147_vm9, %v1139_v13, %v3513_v25  ;;  %v1274_v13 = vunpack.c.l.bf16 %v2175_v10 }
 0x821   :  { %2171 = vst [vmem:[%s3976_s4 + $0x1c] sm:$0xf] %v1148_v14  ;;  %v1156_v16 = vpack.c.bf16 %v3581_v15, %v3581_v15 }
 0x823   :  { %1190 = vmatmul.mubr.bf16.vlgmr.msra.gmra.mxu0 %v1156_v16  ;;  %2517 = vmatmul.mubr.bf16.vlgmr.msra.gmra.mxu1 %v1156_v16 }
 0x824   :  { %1278 = vmatpush1.bf16.msra.mxu0 %v3375_v58  ;;  %2521 = vmatpush3.bf16.msra.mxu1 %v3381_v59 }
 0x825   :  { %1279 = vmatprep.subr.bf16.mxu0 %v3387_v60  ;;  %2522 = vmatprep.subr.bf16.mxu1 %v2840_v1 }
 0x826   :  { %1309 = vmatprep.mubr.bf16.mxu0 %v2841_v2  ;;  %2536 = vmatprep.mubr.msk.bf16.mxu1 %vm2842_vm0, %v2840_v1 }
 0x828   :  { %1280 = vmatpush1.bf16.msra.mxu0 %v3397_v61  ;;  %2523 = vmatpush3.bf16.msra.mxu1 %v3403_v62 }
 0x829   :  { %1281 = vmatprep.subr.bf16.mxu0 %v3409_v63  ;;  %2524 = vmatprep.subr.bf16.mxu1 %v2840_v1 }
 0x82c   :  { %1282 = vmatpush1.bf16.msra.mxu0 %v3416_v20  ;;  %2525 = vmatpush3.bf16.msra.mxu1 %v3422_v22 }
 0x82d   :  { %1283 = vmatprep.subr.bf16.mxu0 %v3428_v29  ;;  %2526 = vmatprep.subr.bf16.mxu1 %v2840_v1 }
 0x830   :  { %1284 = vmatpush1.bf16.msra.mxu0 %v3435_v26  ;;  %2527 = vmatpush3.bf16.msra.mxu1 %v3441_v0 }
 0x831   :  { %1285 = vmatprep.subr.bf16.mxu0 %v3447_v30  ;;  %2528 = vmatprep.subr.bf16.mxu1 %v2840_v1 }
 0x834   :  { %1286 = vmatpush1.bf16.msra.mxu0 %v3454_v27  ;;  %2529 = vmatpush3.bf16.msra.mxu1 %v3460_v32 }
 0x835   :  { %1287 = vmatprep.subr.bf16.mxu0 %v3466_v34  ;;  %2530 = vmatprep.subr.bf16.mxu1 %v2840_v1 }
 0x838   :  { %1288 = vmatpush1.bf16.msra.mxu0 %v3473_v35  ;;  %2531 = vmatpush3.bf16.msra.mxu1 %v3547_v47 }
 0x839   :  { %1289 = vmatprep.subr.bf16.mxu0 %v3480_v36  ;;  %2532 = vmatprep.subr.bf16.mxu1 %v2840_v1 }
 0x83c   :  { %1290 = vmatpush1.bf16.msra.mxu0 %v3487_v37  ;;  %2533 = vmatpush3.bf16.msra.mxu1 %v3556_v48 }
 0x83d   :  { %1291 = vmatprep.subr.bf16.mxu0 %v3494_v28  ;;  %2534 = vmatprep.subr.bf16.mxu1 %v2840_v1 }
 0x840   :  { %1292 = vmatpush1.bf16.msra.mxu0 %v3501_v38  ;;  %2535 = vmatpush3.bf16.msra.mxu1 %v3565_v49 }
 0x841   :  { %1397 = vmatprep.subr.bf16.mxu0 %v3355_v3  ;;  %2540 = vmatprep.subr.bf16.mxu1 %v2840_v1 }
 0x8e3   :  { %v1191_v19 = vpop.f32.mrf.mxu0  ;;  %v1232_v21 = vpop.f32.mrf.mxu1 }
 0x8e4   :  { %v1249_v31 = vadd.f32 %v3576_v45, %v1232_v21 }
 0x8e5   :  { %v1193_v24 = vpop.f32.mrf.mxu0  ;;  %v2518_v25 = vpop.f32.mrf.mxu1 }
 0x8e6   :  { %v1240_v52 = vcombine.low %v1191_v19, %v1193_v24 }
 0x8e7   :  { %v1195_v50 = vpop.f32.mrf.mxu0  ;;  %v1235_v17 = vpop.f32.mrf.mxu1 }
 0x8e8   :  { %v1242_v51 = vadd.f32 %v1240_v52, %v1154_v23 }
 0x8e9   :  { %v1196_v53 = vpop.f32.mrf.mxu0  ;;  %v2519_v54 = vpop.f32.mrf.mxu1 }
 0x8ea   :  { %v2173_v55 = vmul.f32 -1.442695, %v1242_v51  ;;  %v1275_v51 = vunpack.c.h.bf16 %v2175_v10 }
 0x8ec   :  { %2745 = vpow2.f32 %v2173_v55 }
 0x8f9   :  { %v2746_v56 = vpop.eup %2745 }
 0x8fa   :  { %v1246_v57 = vadd.f32 1.0, %v2746_v56 }
 0x8fc   :  { %2747 = vrcp.f32 %v1246_v57 }
 0x909   :  { %v2748_v40 = vpop.eup %2747 }
 0x90a   :  { %v1250_v41 = vmul.f32 %v2748_v40, %v1249_v31  ;;  %v1254_v43 = vrot.slane %v2748_v40, 4 }
 0x90c   :  { %v1251_v42 = vadd.f32 %v1250_v41, %v1155_v39  ;;  %v1256_v44 = vsub.f32 1.0, %v1254_v43  ;;  %v1258_v5 = vmul.f32 %v1254_v43, %v3581_v15  ;;  %v1386_v41 = vpop.permute.xlu1 %1385 }
 0x90d   :  { %vm1387_vm11 = vcmp.eq.s32.totalorder %v1386_v41, 1 }
 0x90e   :  { %2749 = vtanh.f32 %v1251_v42 }
 0x91b   :  { %v2750_v46 = vpop.eup %2749 }
 0x91c   :  { %v1257_v4 = vmul.f32 %v2750_v46, %v1256_v44 }
 0x91e   :  { %v1259_v33 = vadd.f32 %v1258_v5, %v1257_v4  ;;  %v2178_v4 = vld [vmem:[%s3974_s1 + $0x3c] sm:$0x3f] }
 0x920   :  { %v1268_v7 = vsel %vm1267_vm10, %v1259_v33, 0.0  ;;  %v3629_v8 = vsel %vm1267_vm10, %v1259_v33, %v3581_v15  ;;  %v1394_v33 = vunpack.c.l.bf16 %v2178_v4 }
 0x921   :  { %2174 = vst [vmem:[%s3976_s4 + $0x20] sm:$0xf] %v1268_v7  ;;  %v1276_v9 = vpack.c.bf16 %v3629_v8, %v3629_v8 }
 0x923   :  { %1310 = vmatmul.mubr.bf16.vlgmr.msra.gmra.mxu0 %v1276_v9  ;;  %2537 = vmatmul.mubr.bf16.vlgmr.msra.gmra.mxu1 %v1276_v9 }
 0x924   :  { %1398 = vmatpush1.bf16.msra.mxu0 %v3375_v58  ;;  %2541 = vmatpush3.bf16.msra.mxu1 %v3381_v59 }
 0x925   :  { %1399 = vmatprep.subr.bf16.mxu0 %v3387_v60  ;;  %2542 = vmatprep.subr.bf16.mxu1 %v2840_v1 }
 0x926   :  { %1429 = vmatprep.mubr.bf16.mxu0 %v2841_v2  ;;  %2556 = vmatprep.mubr.msk.bf16.mxu1 %vm2842_vm0, %v2840_v1 }
 0x928   :  { %1400 = vmatpush1.bf16.msra.mxu0 %v3397_v61  ;;  %2543 = vmatpush3.bf16.msra.mxu1 %v3403_v62 }
 0x929   :  { %1401 = vmatprep.subr.bf16.mxu0 %v3409_v63  ;;  %2544 = vmatprep.subr.bf16.mxu1 %v2840_v1 }
 0x92c   :  { %1402 = vmatpush1.bf16.msra.mxu0 %v3416_v20  ;;  %2545 = vmatpush3.bf16.msra.mxu1 %v3422_v22 }
 0x92d   :  { %1403 = vmatprep.subr.bf16.mxu0 %v3428_v29  ;;  %2546 = vmatprep.subr.bf16.mxu1 %v2840_v1 }
 0x930   :  { %1404 = vmatpush1.bf16.msra.mxu0 %v3435_v26  ;;  %2547 = vmatpush3.bf16.msra.mxu1 %v3441_v0 }
 0x931   :  { %1405 = vmatprep.subr.bf16.mxu0 %v3447_v30  ;;  %2548 = vmatprep.subr.bf16.mxu1 %v2840_v1 }
 0x934   :  { %1406 = vmatpush1.bf16.msra.mxu0 %v3454_v27  ;;  %2549 = vmatpush3.bf16.msra.mxu1 %v3460_v32 }
 0x935   :  { %1407 = vmatprep.subr.bf16.mxu0 %v3466_v34  ;;  %2550 = vmatprep.subr.bf16.mxu1 %v2840_v1 }
 0x938   :  { %1408 = vmatpush1.bf16.msra.mxu0 %v3473_v35  ;;  %2551 = vmatpush3.bf16.msra.mxu1 %v3547_v47 }
 0x939   :  { %1409 = vmatprep.subr.bf16.mxu0 %v3480_v36  ;;  %2552 = vmatprep.subr.bf16.mxu1 %v2840_v1 }
 0x93c   :  { %1410 = vmatpush1.bf16.msra.mxu0 %v3487_v37  ;;  %2553 = vmatpush3.bf16.msra.mxu1 %v3556_v48 }
 0x93d   :  { %1411 = vmatprep.subr.bf16.mxu0 %v3494_v28  ;;  %2554 = vmatprep.subr.bf16.mxu1 %v2840_v1 }
 0x940   :  { %1412 = vmatpush1.bf16.msra.mxu0 %v3501_v38  ;;  %2555 = vmatpush3.bf16.msra.mxu1 %v3565_v49 }
 0x941   :  { %1517 = vmatprep.subr.bf16.mxu0 %v3355_v3  ;;  %2560 = vmatprep.subr.bf16.mxu1 %v2840_v1 }
 0x9e3   :  { %v1311_v11 = vpop.f32.mrf.mxu0  ;;  %v1352_v12 = vpop.f32.mrf.mxu1 }
 0x9e4   :  { %v1369_v17 = vadd.f32 %v3576_v45, %v1352_v12 }
 0x9e5   :  { %v1313_v14 = vpop.f32.mrf.mxu0  ;;  %v2538_v15 = vpop.f32.mrf.mxu1 }
 0x9e6   :  { %v1360_v16 = vcombine.low %v1311_v11, %v1313_v14 }
 0x9e7   :  { %v1315_v18 = vpop.f32.mrf.mxu0  ;;  %v1355_v19 = vpop.f32.mrf.mxu1 }
 0x9e8   :  { %v1362_v21 = vadd.f32 %v1360_v16, %v1274_v13 }
 0x9e9   :  { %v1316_v23 = vpop.f32.mrf.mxu0  ;;  %v2539_v24 = vpop.f32.mrf.mxu1 }
 0x9ea   :  { %v2176_v25 = vmul.f32 -1.442695, %v1362_v21  ;;  %v1395_v21 = vunpack.c.h.bf16 %v2178_v4 }
 0x9ec   :  { %2751 = vpow2.f32 %v2176_v25 }
 0x9f9   :  { %v2752_v52 = vpop.eup %2751 }
 0x9fa   :  { %v1366_v50 = vadd.f32 1.0, %v2752_v52 }
 0x9fc   :  { %2753 = vrcp.f32 %v1366_v50 }
 0xa09   :  { %v2754_v53 = vpop.eup %2753 }
 0xa0a   :  { %v1370_v54 = vmul.f32 %v2754_v53, %v1369_v17  ;;  %v1374_v56 = vrot.slane %v2754_v53, 4 }
 0xa0c   :  { %v1371_v55 = vadd.f32 %v1370_v54, %v1275_v51  ;;  %v1376_v57 = vsub.f32 1.0, %v1374_v56  ;;  %v1378_v40 = vmul.f32 %v1374_v56, %v3629_v8  ;;  %v1506_v54 = vpop.permute.xlu0 %1505 }
 0xa0d   :  { %vm1507_vm12 = vcmp.eq.s32.totalorder %v1506_v54, 1 }
 0xa0e   :  { %2755 = vtanh.f32 %v1371_v55 }
 0xa1b   :  { %v2756_v31 = vpop.eup %2755 }
 0xa1c   :  { %v1377_v39 = vmul.f32 %v2756_v31, %v1376_v57 }
 0xa1e   :  { %v1379_v42 = vadd.f32 %v1378_v40, %v1377_v39  ;;  %v2181_v39 = vld [vmem:[%s3974_s1 + $0x42] sm:$0x3f] }
 0xa20   :  { %v1388_v43 = vsel %vm1387_vm11, %v1379_v42, 0.0  ;;  %v3677_v44 = vsel %vm1387_vm11, %v1379_v42, %v3629_v8  ;;  %v1514_v42 = vunpack.c.l.bf16 %v2181_v39 }
 0xa21   :  { %2177 = vst [vmem:[%s3976_s4 + $0x24] sm:$0xf] %v1388_v43  ;;  %v1396_v46 = vpack.c.bf16 %v3677_v44, %v3677_v44 }
 0xa23   :  { %1430 = vmatmul.mubr.bf16.vlgmr.msra.gmra.mxu0 %v1396_v46  ;;  %2557 = vmatmul.mubr.bf16.vlgmr.msra.gmra.mxu1 %v1396_v46 }
 0xa24   :  { %1518 = vmatpush1.bf16.msra.mxu0 %v3375_v58  ;;  %2561 = vmatpush3.bf16.msra.mxu1 %v3381_v59 }
 0xa25   :  { %1519 = vmatprep.subr.bf16.mxu0 %v3387_v60  ;;  %2562 = vmatprep.subr.bf16.mxu1 %v2840_v1 }
 0xa26   :  { %1549 = vmatprep.mubr.bf16.mxu0 %v2841_v2  ;;  %2576 = vmatprep.mubr.msk.bf16.mxu1 %vm2842_vm0, %v2840_v1 }
 0xa28   :  { %1520 = vmatpush1.bf16.msra.mxu0 %v3397_v61  ;;  %2563 = vmatpush3.bf16.msra.mxu1 %v3403_v62 }
 0xa29   :  { %1521 = vmatprep.subr.bf16.mxu0 %v3409_v63  ;;  %2564 = vmatprep.subr.bf16.mxu1 %v2840_v1 }
 0xa2c   :  { %1522 = vmatpush1.bf16.msra.mxu0 %v3416_v20  ;;  %2565 = vmatpush3.bf16.msra.mxu1 %v3422_v22 }
 0xa2d   :  { %1523 = vmatprep.subr.bf16.mxu0 %v3428_v29  ;;  %2566 = vmatprep.subr.bf16.mxu1 %v2840_v1 }
 0xa30   :  { %1524 = vmatpush1.bf16.msra.mxu0 %v3435_v26  ;;  %2567 = vmatpush3.bf16.msra.mxu1 %v3441_v0 }
 0xa31   :  { %1525 = vmatprep.subr.bf16.mxu0 %v3447_v30  ;;  %2568 = vmatprep.subr.bf16.mxu1 %v2840_v1 }
 0xa34   :  { %1526 = vmatpush1.bf16.msra.mxu0 %v3454_v27  ;;  %2569 = vmatpush3.bf16.msra.mxu1 %v3460_v32 }
 0xa35   :  { %1527 = vmatprep.subr.bf16.mxu0 %v3466_v34  ;;  %2570 = vmatprep.subr.bf16.mxu1 %v2840_v1 }
 0xa38   :  { %1528 = vmatpush1.bf16.msra.mxu0 %v3473_v35  ;;  %2571 = vmatpush3.bf16.msra.mxu1 %v3547_v47 }
 0xa39   :  { %1529 = vmatprep.subr.bf16.mxu0 %v3480_v36  ;;  %2572 = vmatprep.subr.bf16.mxu1 %v2840_v1 }
 0xa3c   :  { %1530 = vmatpush1.bf16.msra.mxu0 %v3487_v37  ;;  %2573 = vmatpush3.bf16.msra.mxu1 %v3556_v48 }
 0xa3d   :  { %1531 = vmatprep.subr.bf16.mxu0 %v3494_v28  ;;  %2574 = vmatprep.subr.bf16.mxu1 %v2840_v1 }
 0xa40   :  { %1532 = vmatpush1.bf16.msra.mxu0 %v3501_v38  ;;  %2575 = vmatpush3.bf16.msra.mxu1 %v3565_v49 }
 0xa41   :  { %1637 = vmatprep.subr.bf16.mxu0 %v3355_v3  ;;  %2580 = vmatprep.subr.bf16.mxu1 %v2840_v1 }
 0xae3   :  { %v1431_v5 = vpop.f32.mrf.mxu0  ;;  %v1472_v6 = vpop.f32.mrf.mxu1 }
 0xae4   :  { %v1489_v19 = vadd.f32 %v3576_v45, %v1472_v6 }
 0xae5   :  { %v1433_v7 = vpop.f32.mrf.mxu0  ;;  %v2558_v8 = vpop.f32.mrf.mxu1 }
 0xae6   :  { %v1480_v9 = vcombine.low %v1431_v5, %v1433_v7 }
 0xae7   :  { %v1435_v10 = vpop.f32.mrf.mxu0  ;;  %v1475_v11 = vpop.f32.mrf.mxu1 }
 0xae8   :  { %v1482_v12 = vadd.f32 %v1480_v9, %v1394_v33 }
 0xae9   :  { %v1436_v13 = vpop.f32.mrf.mxu0  ;;  %v2559_v14 = vpop.f32.mrf.mxu1 }
 0xaea   :  { %v2179_v15 = vmul.f32 -1.442695, %v1482_v12  ;;  %v1515_v12 = vunpack.c.h.bf16 %v2181_v39 }
 0xaec   :  { %2757 = vpow2.f32 %v2179_v15 }
 0xaf9   :  { %v2758_v16 = vpop.eup %2757 }
 0xafa   :  { %v1486_v18 = vadd.f32 1.0, %v2758_v16 }
 0xafc   :  { %2759 = vrcp.f32 %v1486_v18 }
 0xb09   :  { %v2760_v23 = vpop.eup %2759 }
 0xb0a   :  { %v1490_v24 = vmul.f32 %v2760_v23, %v1489_v19  ;;  %v1494_v52 = vrot.slane %v2760_v23, 4 }
 0xb0c   :  { %v1491_v25 = vadd.f32 %v1490_v24, %v1395_v21  ;;  %v1496_v50 = vsub.f32 1.0, %v1494_v52  ;;  %v1498_v53 = vmul.f32 %v1494_v52, %v3677_v44  ;;  %v1626_v24 = vpop.permute.xlu1 %1625 }
 0xb0d   :  { %vm1627_vm13 = vcmp.eq.s32.totalorder %v1626_v24, 1 }
 0xb0e   :  { %2761 = vtanh.f32 %v1491_v25 }
 0xb1b   :  { %v2762_v17 = vpop.eup %2761 }
 0xb1c   :  { %v1497_v51 = vmul.f32 %v2762_v17, %v1496_v50 }
 0xb1e   :  { %v1499_v55 = vadd.f32 %v1498_v53, %v1497_v51  ;;  %v2184_v51 = vld [vmem:[%s3974_s1 + $0x48] sm:$0x3f] }
 0xb20   :  { %v1508_v56 = vsel %vm1507_vm12, %v1499_v55, 0.0  ;;  %v3725_v57 = vsel %vm1507_vm12, %v1499_v55, %v3677_v44  ;;  %v1634_v55 = vunpack.c.l.bf16 %v2184_v51 }
 0xb21   :  { %2180 = vst [vmem:[%s3976_s4 + $0x28] sm:$0xf] %v1508_v56  ;;  %v1516_v31 = vpack.c.bf16 %v3725_v57, %v3725_v57 }
 0xb23   :  { %1550 = vmatmul.mubr.bf16.vlgmr.msra.gmra.mxu0 %v1516_v31  ;;  %2577 = vmatmul.mubr.bf16.vlgmr.msra.gmra.mxu1 %v1516_v31 }
 0xb24   :  { %1638 = vmatpush1.bf16.msra.mxu0 %v3375_v58  ;;  %2581 = vmatpush3.bf16.msra.mxu1 %v3381_v59 }
 0xb25   :  { %1639 = vmatprep.subr.bf16.mxu0 %v3387_v60  ;;  %2582 = vmatprep.subr.bf16.mxu1 %v2840_v1 }
 0xb26   :  { %1669 = vmatprep.mubr.bf16.mxu0 %v2841_v2  ;;  %2596 = vmatprep.mubr.msk.bf16.mxu1 %vm2842_vm0, %v2840_v1 }
 0xb28   :  { %1640 = vmatpush1.bf16.msra.mxu0 %v3397_v61  ;;  %2583 = vmatpush3.bf16.msra.mxu1 %v3403_v62 }
 0xb29   :  { %1641 = vmatprep.subr.bf16.mxu0 %v3409_v63  ;;  %2584 = vmatprep.subr.bf16.mxu1 %v2840_v1 }
 0xb2c   :  { %1642 = vmatpush1.bf16.msra.mxu0 %v3416_v20  ;;  %2585 = vmatpush3.bf16.msra.mxu1 %v3422_v22 }
 0xb2d   :  { %1643 = vmatprep.subr.bf16.mxu0 %v3428_v29  ;;  %2586 = vmatprep.subr.bf16.mxu1 %v2840_v1 }
 0xb30   :  { %1644 = vmatpush1.bf16.msra.mxu0 %v3435_v26  ;;  %2587 = vmatpush3.bf16.msra.mxu1 %v3441_v0 }
 0xb31   :  { %1645 = vmatprep.subr.bf16.mxu0 %v3447_v30  ;;  %2588 = vmatprep.subr.bf16.mxu1 %v2840_v1 }
 0xb34   :  { %1646 = vmatpush1.bf16.msra.mxu0 %v3454_v27  ;;  %2589 = vmatpush3.bf16.msra.mxu1 %v3460_v32 }
 0xb35   :  { %1647 = vmatprep.subr.bf16.mxu0 %v3466_v34  ;;  %2590 = vmatprep.subr.bf16.mxu1 %v2840_v1 }
 0xb38   :  { %1648 = vmatpush1.bf16.msra.mxu0 %v3473_v35  ;;  %2591 = vmatpush3.bf16.msra.mxu1 %v3547_v47 }
 0xb39   :  { %1649 = vmatprep.subr.bf16.mxu0 %v3480_v36  ;;  %2592 = vmatprep.subr.bf16.mxu1 %v2840_v1 }
 0xb3c   :  { %1650 = vmatpush1.bf16.msra.mxu0 %v3487_v37  ;;  %2593 = vmatpush3.bf16.msra.mxu1 %v3556_v48 }
 0xb3d   :  { %1651 = vmatprep.subr.bf16.mxu0 %v3494_v28  ;;  %2594 = vmatprep.subr.bf16.mxu1 %v2840_v1 }
 0xb40   :  { %1652 = vmatpush1.bf16.msra.mxu0 %v3501_v38  ;;  %2595 = vmatpush3.bf16.msra.mxu1 %v3565_v49 }
 0xb41   :  { %1757 = vmatprep.subr.bf16.mxu0 %v3355_v3  ;;  %2600 = vmatprep.subr.bf16.mxu1 %v2840_v1 }
 0xbe3   :  { %v1551_v40 = vpop.f32.mrf.mxu0  ;;  %v1592_v41 = vpop.f32.mrf.mxu1 }
 0xbe4   :  { %v1609_v11 = vadd.f32 %v3576_v45, %v1592_v41 }
 0xbe5   :  { %v1553_v43 = vpop.f32.mrf.mxu0  ;;  %v2578_v44 = vpop.f32.mrf.mxu1 }
 0xbe6   :  { %v1600_v46 = vcombine.low %v1551_v40, %v1553_v43 }
 0xbe7   :  { %v1555_v4 = vpop.f32.mrf.mxu0  ;;  %v1595_v5 = vpop.f32.mrf.mxu1 }
 0xbe8   :  { %v1602_v6 = vadd.f32 %v1600_v46, %v1514_v42  ;;  %v1635_v5 = vunpack.c.h.bf16 %v2184_v51 }
 0xbe9   :  { %v1556_v33 = vpop.f32.mrf.mxu0  ;;  %v2579_v7 = vpop.f32.mrf.mxu1 }
 0xbea   :  { %v2182_v8 = vmul.f32 -1.442695, %v1602_v6 }
 0xbec   :  { %2763 = vpow2.f32 %v2182_v8 }
 0xbf9   :  { %v2764_v9 = vpop.eup %2763 }
 0xbfa   :  { %v1606_v10 = vadd.f32 1.0, %v2764_v9 }
 0xbfc   :  { %2765 = vrcp.f32 %v1606_v10 }
 0xc09   :  { %v2766_v13 = vpop.eup %2765 }
 0xc0a   :  { %v1610_v14 = vmul.f32 %v2766_v13, %v1609_v11  ;;  %v1614_v16 = vrot.slane %v2766_v13, 4  ;;  %v1746_v13 = vpop.permute.xlu0 %1745 }
 0xc0b   :  { %vm1747_vm14 = vcmp.eq.s32.totalorder %v1746_v13, 1 }
 0xc0c   :  { %v1611_v15 = vadd.f32 %v1610_v14, %v1515_v12  ;;  %v1616_v18 = vsub.f32 1.0, %v1614_v16  ;;  %v1618_v23 = vmul.f32 %v1614_v16, %v3725_v57 }
 0xc0e   :  { %2767 = vtanh.f32 %v1611_v15 }
 0xc1b   :  { %v2768_v19 = vpop.eup %2767 }
 0xc1c   :  { %v1617_v21 = vmul.f32 %v2768_v19, %v1616_v18 }
 0xc1e   :  { %v1619_v25 = vadd.f32 %v1618_v23, %v1617_v21 }
 0xc20   :  { %v1628_v52 = vsel %vm1627_vm13, %v1619_v25, 0.0  ;;  %v3773_v50 = vsel %vm1627_vm13, %v1619_v25, %v3725_v57 }
 0xc21   :  { %2183 = vst [vmem:[%s3976_s4 + $0x2c] sm:$0xf] %v1628_v52  ;;  %v1636_v17 = vpack.c.bf16 %v3773_v50, %v3773_v50 }
 0xc23   :  { %1670 = vmatmul.mubr.bf16.vlgmr.msra.gmra.mxu0 %v1636_v17  ;;  %2597 = vmatmul.mubr.bf16.vlgmr.msra.gmra.mxu1 %v1636_v17 }
 0xc24   :  { %1758 = vmatpush1.bf16.msra.mxu0 %v3375_v58  ;;  %2601 = vmatpush3.bf16.msra.mxu1 %v3381_v59 }
 0xc25   :  { %1759 = vmatprep.subr.bf16.mxu0 %v3387_v60  ;;  %2602 = vmatprep.subr.bf16.mxu1 %v2840_v1 }
 0xc26   :  { %1789 = vmatprep.mubr.bf16.mxu0 %v2841_v2  ;;  %2616 = vmatprep.mubr.msk.bf16.mxu1 %vm2842_vm0, %v2840_v1 }
 0xc28   :  { %1760 = vmatpush1.bf16.msra.mxu0 %v3397_v61  ;;  %2603 = vmatpush3.bf16.msra.mxu1 %v3403_v62 }
 0xc29   :  { %1761 = vmatprep.subr.bf16.mxu0 %v3409_v63  ;;  %2604 = vmatprep.subr.bf16.mxu1 %v2840_v1 }
 0xc2c   :  { %1762 = vmatpush1.bf16.msra.mxu0 %v3416_v20  ;;  %2605 = vmatpush3.bf16.msra.mxu1 %v3422_v22 }
 0xc2d   :  { %1763 = vmatprep.subr.bf16.mxu0 %v3428_v29  ;;  %2606 = vmatprep.subr.bf16.mxu1 %v2840_v1 }
 0xc30   :  { %1764 = vmatpush1.bf16.msra.mxu0 %v3435_v26  ;;  %2607 = vmatpush3.bf16.msra.mxu1 %v3441_v0 }
 0xc31   :  { %1765 = vmatprep.subr.bf16.mxu0 %v3447_v30  ;;  %2608 = vmatprep.subr.bf16.mxu1 %v2840_v1 }
 0xc34   :  { %1766 = vmatpush1.bf16.msra.mxu0 %v3454_v27  ;;  %2609 = vmatpush3.bf16.msra.mxu1 %v3460_v32 }
 0xc35   :  { %1767 = vmatprep.subr.bf16.mxu0 %v3466_v34  ;;  %2610 = vmatprep.subr.bf16.mxu1 %v2840_v1 }
 0xc38   :  { %1768 = vmatpush1.bf16.msra.mxu0 %v3473_v35  ;;  %2611 = vmatpush3.bf16.msra.mxu1 %v3547_v47 }
 0xc39   :  { %1769 = vmatprep.subr.bf16.mxu0 %v3480_v36  ;;  %2612 = vmatprep.subr.bf16.mxu1 %v2840_v1 }
 0xc3c   :  { %1770 = vmatpush1.bf16.msra.mxu0 %v3487_v37  ;;  %2613 = vmatpush3.bf16.msra.mxu1 %v3556_v48 }
 0xc3d   :  { %1771 = vmatprep.subr.bf16.mxu0 %v3494_v28  ;;  %2614 = vmatprep.subr.bf16.mxu1 %v2840_v1 }
 0xc40   :  { %1772 = vmatpush1.bf16.msra.mxu0 %v3501_v38  ;;  %2615 = vmatpush3.bf16.msra.mxu1 %v3565_v49 }
 0xc41   :  { %1877 = vmatprep.subr.bf16.mxu0 %v3355_v3  ;;  %2620 = vmatprep.subr.bf16.mxu1 %v2840_v1 }
 0xce3   :  { %v1671_v53 = vpop.f32.mrf.mxu0  ;;  %v1712_v54 = vpop.f32.mrf.mxu1 }
 0xce4   :  { %v1729_v4 = vadd.f32 %v3576_v45, %v1712_v54 }
 0xce5   :  { %v1673_v56 = vpop.f32.mrf.mxu0  ;;  %v2598_v57 = vpop.f32.mrf.mxu1 }
 0xce6   :  { %v1720_v31 = vcombine.low %v1671_v53, %v1673_v56  ;;  %v2820_v56 = vld [vmem:[%s3972_s2 + $0xb0] ss:$12 sps:$4 sm:$0xff]   ;;  %v2821_v57 = vld [vmem:[%s3972_s2 + $0x94] ss:$12 sps:$4 sm:$0xff]  }
 0xce7   :  { %v1675_v39 = vpop.f32.mrf.mxu0  ;;  %v1715_v40 = vpop.f32.mrf.mxu1 }
 0xce8   :  { %v1722_v41 = vadd.f32 %v1720_v31, %v1634_v55  ;;  %v2819_v55 = vld [vmem:[%s3972_s2 + $0xa8] ss:$12 sps:$4 sm:$0xff]   ;;  %v2822_v31 = vld [vmem:[%s3972_s2 + $0x90] ss:$12 sps:$4 sm:$0xff]   ;;  %v2823_v39 = vld [vmem:[%s3972_s2 + $0x98] ss:$12 sps:$4 sm:$0xff]  }
 0xce9   :  { %v1676_v42 = vpop.f32.mrf.mxu0  ;;  %v2599_v43 = vpop.f32.mrf.mxu1  ;;  %v2824_v40 = vld [vmem:[%s3972_s2 + $0x7c] ss:$12 sps:$4 sm:$0xff]  }
 0xcea   :  { %v2185_v44 = vmul.f32 -1.442695, %v1722_v41  ;;  %v2826_v41 = vld [vmem:[%s3972_s2 + $0x80] ss:$12 sps:$4 sm:$0xff]   ;;  %v2827_v42 = vld [vmem:[%s3972_s2 + $0x64] ss:$12 sps:$4 sm:$0xff]  }
 0xceb   :  { %v2828_v43 = vld [vmem:[%s3972_s2 + $0x60] ss:$12 sps:$4 sm:$0xff]  }
 0xcec   :  { %2769 = vpow2.f32 %v2185_v44  ;;  %v2829_v44 = vld [vmem:[%s3972_s2 + $0x68] ss:$12 sps:$4 sm:$0xff]  }
 0xcf9   :  { %v2770_v3 = vpop.eup %2769 }
 0xcfa   :  { %v1726_v46 = vadd.f32 1.0, %v2770_v3  ;;  %v2830_v3 = vld [vmem:[%s3972_s2 + $0x4c] ss:$12 sps:$4 sm:$0xff]  }
 0xcfc   :  { %2771 = vrcp.f32 %v1726_v46  ;;  %v2831_v46 = vld [vmem:[%s3972_s2 + $0x48] ss:$12 sps:$4 sm:$0xff]  }
 0xd09   :  { %v2772_v6 = vpop.eup %2771 }
 0xd0a   :  { %v1730_v33 = vmul.f32 %v2772_v6, %v1729_v4  ;;  %v1734_v8 = vrot.slane %v2772_v6, 4  ;;  %v2832_v4 = vld [vmem:[%s3972_s2 + $0x50] ss:$12 sps:$4 sm:$0xff]  }
 0xd0b   :  { %v2834_v6 = vld [vmem:[%s3972_s2 + $0x30] ss:$12 sps:$4 sm:$0xff]  }
 0xd0c   :  { %v1731_v7 = vadd.f32 %v1730_v33, %v1635_v5  ;;  %v1736_v9 = vsub.f32 1.0, %v1734_v8  ;;  %v1738_v12 = vmul.f32 %v1734_v8, %v3773_v50  ;;  %v2833_v5 = vld [vmem:[%s3972_s2 + $0x34] ss:$12 sps:$4 sm:$0xff]   ;;  %v2835_v33 = vld [vmem:[%s3972_s2 + $0x1c] ss:$12 sps:$4 sm:$0xff]  }
 0xd0d   :  { %v2837_v8 = vld [vmem:[%s3972_s2 + $0x4] ss:$12 sps:$4 sm:$0xff]  }
 0xd0e   :  { %2773 = vtanh.f32 %v1731_v7  ;;  %v2836_v7 = vld [vmem:[%s3972_s2 + $0x18] ss:$12 sps:$4 sm:$0xff]  }
 0xd1b   :  { %v2774_v10 = vpop.eup %2773 }
 0xd1c   :  { %v1737_v11 = vmul.f32 %v2774_v10, %v1736_v9  ;;  %v2190_v9 = vld [vmem:[%s3974_s1 + $0x54] sm:$0x3f] }
 0xd1e   :  { %v1739_v14 = vadd.f32 %v1738_v12, %v1737_v11  ;;  %v1874_v11 = vunpack.c.l.bf16 %v2190_v9 }
 0xd20   :  { %v1748_v15 = vsel %vm1747_vm14, %v1739_v14, 0.0  ;;  %v3821_v16 = vsel %vm1747_vm14, %v1739_v14, %v3773_v50  ;;  %v1866_v50 = vpop.permute.xlu1 %1865 }
 0xd21   :  { %2186 = vst [vmem:[%s3976_s4 + $0x30] sm:$0xf] %v1748_v15  ;;  %v1756_v18 = vpack.c.bf16 %v3821_v16, %v3821_v16  ;;  %vm1867_vm15 = vcmp.eq.s32.totalorder %v1866_v50, 1 }
 0xd23   :  { %1790 = vmatmul.mubr.bf16.vlgmr.msra.gmra.mxu0 %v1756_v18  ;;  %2617 = vmatmul.mubr.bf16.vlgmr.msra.gmra.mxu1 %v1756_v18 }
 0xd24   :  { %1878 = vmatpush1.bf16.msra.mxu0 %v3375_v58  ;;  %2621 = vmatpush3.bf16.msra.mxu1 %v3381_v59  ;;  %v2818_v58 = vld [vmem:[%s3972_s2 + $0xac] ss:$12 sps:$4 sm:$0xff]  }
 0xd25   :  { %1879 = vmatprep.subr.bf16.mxu0 %v3387_v60  ;;  %2622 = vmatprep.subr.bf16.mxu1 %v2840_v1  ;;  %v2187_v59 = vld [vmem:[%s3974_s1 + $0x4e] sm:$0x3f] }
 0xd26   :  { %1909 = vmatprep.mubr.bf16.mxu0 %v2841_v2  ;;  %2636 = vmatprep.mubr.msk.bf16.mxu1 %vm2842_vm0, %v2840_v1 }
 0xd28   :  { %1880 = vmatpush1.bf16.msra.mxu0 %v3397_v61  ;;  %2623 = vmatpush3.bf16.msra.mxu1 %v3403_v62  ;;  %v1754_v62 = vunpack.c.l.bf16 %v2187_v59 }
 0xd29   :  { %1881 = vmatprep.subr.bf16.mxu0 %v3409_v63  ;;  %2624 = vmatprep.subr.bf16.mxu1 %v2840_v1 }
 0xd2c   :  { %1882 = vmatpush1.bf16.msra.mxu0 %v3416_v20  ;;  %2625 = vmatpush3.bf16.msra.mxu1 %v3422_v22 }
 0xd2d   :  { %1883 = vmatprep.subr.bf16.mxu0 %v3428_v29  ;;  %2626 = vmatprep.subr.bf16.mxu1 %v2840_v1 }
 0xd30   :  { %1884 = vmatpush1.bf16.msra.mxu0 %v3435_v26  ;;  %2627 = vmatpush3.bf16.msra.mxu1 %v3441_v0 }
 0xd31   :  { %1885 = vmatprep.subr.bf16.mxu0 %v3447_v30  ;;  %2628 = vmatprep.subr.bf16.mxu1 %v2840_v1 }
 0xd34   :  { %1886 = vmatpush1.bf16.msra.mxu0 %v3454_v27  ;;  %2629 = vmatpush3.bf16.msra.mxu1 %v3460_v32 }
 0xd35   :  { %1887 = vmatprep.subr.bf16.mxu0 %v3466_v34  ;;  %2630 = vmatprep.subr.bf16.mxu1 %v2840_v1 }
 0xd38   :  { %1888 = vmatpush1.bf16.msra.mxu0 %v3473_v35  ;;  %2631 = vmatpush3.bf16.msra.mxu1 %v3547_v47 }
 0xd39   :  { %1889 = vmatprep.subr.bf16.mxu0 %v3480_v36  ;;  %2632 = vmatprep.subr.bf16.mxu1 %v2840_v1 }
 0xd3c   :  { %1890 = vmatpush1.bf16.msra.mxu0 %v3487_v37  ;;  %2633 = vmatpush3.bf16.msra.mxu1 %v3556_v48  ;;  %v1755_v37 = vunpack.c.h.bf16 %v2187_v59 }
 0xd3d   :  { %1891 = vmatprep.subr.bf16.mxu0 %v3494_v28  ;;  %2634 = vmatprep.subr.bf16.mxu1 %v2840_v1 }
 0xd40   :  { %1892 = vmatpush1.bf16.msra.mxu0 %v3501_v38  ;;  %2635 = vmatpush3.bf16.msra.mxu1 %v3565_v49 }
 0xd41   :  { %1997 = vmatprep.subr.bf16.mxu0 %v2818_v58  ;;  %2640 = vmatprep.subr.bf16.mxu1 %v2840_v1 }
 0xde3   :  { %v1791_v60 = vpop.f32.mrf.mxu0  ;;  %v1832_v61 = vpop.f32.mrf.mxu1 }
 0xde4   :  { %v1849_v36 = vadd.f32 %v3576_v45, %v1832_v61 }
 0xde5   :  { %v1793_v63 = vpop.f32.mrf.mxu0  ;;  %v2618_v20 = vpop.f32.mrf.mxu1 }
 0xde6   :  { %v1840_v22 = vcombine.low %v1791_v60, %v1793_v63 }
 0xde7   :  { %v1795_v29 = vpop.f32.mrf.mxu0  ;;  %v1835_v26 = vpop.f32.mrf.mxu1 }
 0xde8   :  { %v1842_v0 = vadd.f32 %v1840_v22, %v1754_v62  ;;  %v1875_v62 = vunpack.c.h.bf16 %v2190_v9 }
 0xde9   :  { %v1796_v30 = vpop.f32.mrf.mxu0  ;;  %v2619_v27 = vpop.f32.mrf.mxu1 }
 0xdea   :  { %v2188_v32 = vmul.f32 -1.442695, %v1842_v0  ;;  %v1986_v30 = vpop.permute.xlu0 %1985 }
 0xdec   :  { %2775 = vpow2.f32 %v2188_v32 }
 0xdf9   :  { %v2776_v34 = vpop.eup %2775 }
 0xdfa   :  { %v1846_v35 = vadd.f32 1.0, %v2776_v34 }
 0xdfc   :  { %2777 = vrcp.f32 %v1846_v35 }
 0xe09   :  { %v2778_v28 = vpop.eup %2777 }
 0xe0a   :  { %v1850_v38 = vmul.f32 %v2778_v28, %v1849_v36  ;;  %v1854_v21 = vrot.slane %v2778_v28, 4 }
 0xe0c   :  { %v1851_v19 = vadd.f32 %v1850_v38, %v1755_v37  ;;  %v1856_v23 = vsub.f32 1.0, %v1854_v21  ;;  %v1858_v52 = vmul.f32 %v1854_v21, %v3821_v16  ;;  %v2193_v37 = vld [vmem:[%s3974_s1 + $0x5a] sm:$0x3f] }
 0xe0e   :  { %2779 = vtanh.f32 %v1851_v19  ;;  %v1994_v19 = vunpack.c.l.bf16 %v2193_v37 }
 0xe1b   :  { %v2780_v24 = vpop.eup %2779 }
 0xe1c   :  { %v1857_v25 = vmul.f32 %v2780_v24, %v1856_v23 }
 0xe1e   :  { %v1859_v17 = vadd.f32 %v1858_v52, %v1857_v25 }
 0xe20   :  { %v1868_v51 = vsel %vm1867_vm15, %v1859_v17, 0.0  ;;  %v3871_v53 = vsel %vm1867_vm15, %v1859_v17, %v3821_v16 }
 0xe21   :  { %2189 = vst [vmem:[%s3976_s4 + $0x34] sm:$0xf] %v1868_v51  ;;  %v1876_v54 = vpack.c.bf16 %v3871_v53, %v3871_v53 }
 0xe23   :  { %1910 = vmatmul.mubr.bf16.vlgmr.msra.gmra.mxu0 %v1876_v54  ;;  %2637 = vmatmul.mubr.bf16.vlgmr.msra.gmra.mxu1 %v1876_v54 }
 0xe24   :  { %1998 = vmatpush1.bf16.msra.mxu0 %v2819_v55  ;;  %2641 = vmatpush3.bf16.msra.mxu1 %v2820_v56  ;;  %v2839_v56 = vld [vmem:[%s3975_s3] ss:$0 sm:$0xff] }
 0xe25   :  { %1999 = vmatprep.subr.bf16.mxu0 %v2821_v57  ;;  %2642 = vmatprep.subr.bf16.mxu1 %v2840_v1 }
 0xe26   :  { %2029 = vmatprep.mubr.bf16.mxu0 %v2841_v2  ;;  %2656 = vmatprep.mubr.msk.bf16.mxu1 %vm2842_vm0, %v2840_v1  ;;  %v2825_v2 = vld [vmem:[%s3972_s2 + $0x78] ss:$12 sps:$4 sm:$0xff]   ;;  %vm1987_vm0 = vcmp.eq.s32.totalorder %v1986_v30, 1 }
 0xe28   :  { %2000 = vmatpush1.bf16.msra.mxu0 %v2822_v31  ;;  %2643 = vmatpush3.bf16.msra.mxu1 %v2823_v39  ;;  %v1995_v31 = vunpack.c.h.bf16 %v2193_v37 }
 0xe29   :  { %2001 = vmatprep.subr.bf16.mxu0 %v2824_v40  ;;  %2644 = vmatprep.subr.bf16.mxu1 %v2840_v1 }
 0xe2c   :  { %2002 = vmatpush1.bf16.msra.mxu0 %v2825_v2  ;;  %2645 = vmatpush3.bf16.msra.mxu1 %v2826_v41 }
 0xe2d   :  { %2003 = vmatprep.subr.bf16.mxu0 %v2827_v42  ;;  %2646 = vmatprep.subr.bf16.mxu1 %v2840_v1 }
 0xe30   :  { %2004 = vmatpush1.bf16.msra.mxu0 %v2828_v43  ;;  %2647 = vmatpush3.bf16.msra.mxu1 %v2829_v44  ;;  %v2106_v44 = vpop.permute.xlu1 %2105 }
 0xe31   :  { %2005 = vmatprep.subr.bf16.mxu0 %v2830_v3  ;;  %2648 = vmatprep.subr.bf16.mxu1 %v2840_v1  ;;  %vm2107_vm1 = vcmp.eq.s32.totalorder %v2106_v44, 1 }
 0xe34   :  { %2006 = vmatpush1.bf16.msra.mxu0 %v2831_v46  ;;  %2649 = vmatpush3.bf16.msra.mxu1 %v2832_v4 }
 0xe35   :  { %2007 = vmatprep.subr.bf16.mxu0 %v2833_v5  ;;  %2650 = vmatprep.subr.bf16.mxu1 %v2840_v1 }
 0xe38   :  { %2008 = vmatpush1.bf16.msra.mxu0 %v2834_v6  ;;  %2651 = vmatpush3.bf16.msra.mxu1 %v3547_v47  ;;  %v2838_v47 = vld [vmem:[%s3972_s2] ss:$12 sps:$4 sm:$0xff]  }
 0xe39   :  { %2009 = vmatprep.subr.bf16.mxu0 %v2835_v33  ;;  %2652 = vmatprep.subr.bf16.mxu1 %v2840_v1 }
 0xe3c   :  { %2010 = vmatpush1.bf16.msra.mxu0 %v2836_v7  ;;  %2653 = vmatpush3.bf16.msra.mxu1 %v3556_v48 }
 0xe3d   :  { %2011 = vmatprep.subr.bf16.mxu0 %v2837_v8  ;;  %2654 = vmatprep.subr.bf16.mxu1 %v2840_v1 }
 0xe40   :  { %2012 = vmatpush1.bf16.msra.mxu0 %v2838_v47  ;;  %2655 = vmatpush3.bf16.msra.mxu1 %v3565_v49 }
 0xee3   :  { %v1911_v10 = vpop.f32.mrf.mxu0  ;;  %v1952_v48 = vpop.f32.mrf.mxu1 }
 0xee4   :  { %v1969_v49 = vadd.f32 %v3576_v45, %v1952_v48 }
 0xee5   :  { %v1913_v12 = vpop.f32.mrf.mxu0  ;;  %v2638_v13 = vpop.f32.mrf.mxu1 }
 0xee6   :  { %v1960_v14 = vcombine.low %v1911_v10, %v1913_v12 }
 0xee7   :  { %v1915_v15 = vpop.f32.mrf.mxu0  ;;  %v1955_v16 = vpop.f32.mrf.mxu1 }
 0xee8   :  { %v1962_v1 = vadd.f32 %v1960_v14, %v1874_v11 }
 0xee9   :  { %v1916_v18 = vpop.f32.mrf.mxu0  ;;  %v2639_v58 = vpop.f32.mrf.mxu1 }
 0xeea   :  { %v2191_v59 = vmul.f32 -1.442695, %v1962_v1 }
 0xeec   :  { %2781 = vpow2.f32 %v2191_v59 }
 0xef9   :  { %v2782_v60 = vpop.eup %2781 }
 0xefa   :  { %v1966_v61 = vadd.f32 1.0, %v2782_v60 }
 0xefc   :  { %2783 = vrcp.f32 %v1966_v61 }
 0xf09   :  { %v2784_v63 = vpop.eup %2783 }
 0xf0a   :  { %v1970_v20 = vmul.f32 %v2784_v63, %v1969_v49  ;;  %v1974_v29 = vrot.slane %v2784_v63, 4 }
 0xf0c   :  { %v1971_v22 = vadd.f32 %v1970_v20, %v1875_v62  ;;  %v1976_v26 = vsub.f32 1.0, %v1974_v29  ;;  %v1978_v32 = vmul.f32 %v1974_v29, %v3871_v53 }
 0xf0e   :  { %2785 = vtanh.f32 %v1971_v22 }
 0xf1b   :  { %v2786_v0 = vpop.eup %2785 }
 0xf1c   :  { %v1977_v27 = vmul.f32 %v2786_v0, %v1976_v26 }
 0xf1e   :  { %v1979_v34 = vadd.f32 %v1978_v32, %v1977_v27 }
 0xf20   :  { %v1988_v35 = vsel %vm1987_vm0, %v1979_v34, 0.0  ;;  %v1991_v36 = vsel %vm1987_vm0, %v1979_v34, %v3871_v53 }
 0xf21   :  { %2192 = vst [vmem:[%s3976_s4 + $0x38] sm:$0xf] %v1988_v35  ;;  %v1996_v45 = vpack.c.bf16 %v1991_v36, %v1991_v36 }
 0xf23   :  { %2030 = vmatmul.mubr.bf16.vlgmr.msra.gmra.mxu0 %v1996_v45  ;;  %2657 = vmatmul.mubr.bf16.vlgmr.msra.gmra.mxu1 %v1996_v45 }
 0xfe3   :  { %v2031_v28 = vpop.f32.mrf.mxu0  ;;  %v2072_v38 = vpop.f32.mrf.mxu1 }
 0xfe4   :  { %v2089_v57 = vadd.f32 %v2839_v56, %v2072_v38 }
 0xfe5   :  { %v2033_v21 = vpop.f32.mrf.mxu0  ;;  %v2658_v23 = vpop.f32.mrf.mxu1 }
 0xfe6   :  { %v2080_v24 = vcombine.low %v2031_v28, %v2033_v21 }
 0xfe7   :  { %v2035_v25 = vpop.f32.mrf.mxu0  ;;  %v2075_v52 = vpop.f32.mrf.mxu1 }
 0xfe8   :  { %v2082_v50 = vadd.f32 %v2080_v24, %v1994_v19 }
 0xfe9   :  { %v2036_v17 = vpop.f32.mrf.mxu0  ;;  %v2659_v51 = vpop.f32.mrf.mxu1 }
 0xfea   :  { %v2194_v53 = vmul.f32 -1.442695, %v2082_v50 }
 0xfec   :  { %2787 = vpow2.f32 %v2194_v53 }
 0xff9   :  { %v2788_v54 = vpop.eup %2787 }
 0xffa   :  { %v2086_v55 = vadd.f32 1.0, %v2788_v54 }
 0xffc   :  { %2789 = vrcp.f32 %v2086_v55 }
0x1009   :  { %v2790_v39 = vpop.eup %2789 }
0x100a   :  { %v2090_v40 = vmul.f32 %v2790_v39, %v2089_v57  ;;  %v2094_v41 = vrot.slane %v2790_v39, 4 }
0x100c   :  { %v2091_v2 = vadd.f32 %v2090_v40, %v1995_v31  ;;  %v2096_v42 = vsub.f32 1.0, %v2094_v41  ;;  %v2098_v46 = vmul.f32 %v2094_v41, %v1991_v36 }
0x100e   :  { %2791 = vtanh.f32 %v2091_v2 }
0x101b   :  { %v2792_v43 = vpop.eup %2791 }
0x101c   :  { %v2097_v3 = vmul.f32 %v2792_v43, %v2096_v42 }
0x101e   :  { %v2099_v4 = vadd.f32 %v2098_v46, %v2097_v3 }
0x1020   :  { %v2108_v5 = vsel %vm2107_vm1, %v2099_v4, 0.0  ;;  %v2111_v6 = vsel %vm2107_vm1, %v2099_v4, %v1991_v36 }
0x1021   :  { %2195 = vst [vmem:[%s3976_s4 + $0x3c] sm:$0xf] %v2108_v5  ;;  %2112 = vst [vmem:[#allocation2] sm:$0xf] %v2111_v6 }
0x1022   :  { %2116 = vst [vmem:[%s3977_s5] sm:$0xf] %v2111_v6 }

</bundles_post_ra>
